<compile_context>
chip_gen: v7x
topology: tpu7x:2x2x1
jax: 0.10.0
libtpu: 0.0.40
codegen_flags: <defaults>
</compile_context>

<pallas_src>
from functools import partial

import jax
import jax.numpy as jnp
from jax import lax
from jax.experimental import pallas as pl
from jax.experimental.pallas import tpu as pltpu


# ----------------------------------------------------------------------------
# Small helpers
# ----------------------------------------------------------------------------
def _round_up(v, m):
    return ((v + m - 1) // m) * m


def _vmem_capacity_bytes():
    """Best-effort physical VMEM capacity query (None if unavailable)."""
    try:
        info = pltpu.get_tpu_info()
        cap = getattr(info, "vmem_capacity_bytes", None)
        if cap:
            return int(cap)
    except Exception:
        pass
    return None


def _choose_batch_tile(n, row_io_bytes, row_work_bytes, const_bytes,
                       budget_bytes, max_tile=512):
    """Largest multiple-of-8 batch tile that fits the VMEM budget, capped so
    the batch grid has >= 2 steps whenever N >= 16 (multi-TensorCore chips)."""
    avail = max(budget_bytes - const_bytes, 1)
    denom = max(2 * row_io_bytes + row_work_bytes, 1)   # double-buffered I/O
    affordable = avail // denom
    bn = max(8, min(max_tile, int(affordable)))
    bn = max(8, (bn // 8) * 8)
    if n >= 16:
        bn = min(bn, _round_up(-(-n // 2), 8))          # >= 2 grid steps
    bn = min(bn, _round_up(n, 8))
    return bn


# ----------------------------------------------------------------------------
# Fused RQ-VAE forward kernel (one batch tile per grid step)
# ----------------------------------------------------------------------------
def _rqvae_kernel(*refs, n_enc, n_dec, num_q, mm_dtype):
    # ---- unpack refs: x, enc (w,b)*, codebooks, e2, dec (w,b)*, outputs ----
    pos = 0
    x_ref = refs[pos]; pos += 1
    enc = []
    for _ in range(n_enc):
        enc.append((refs[pos], refs[pos + 1])); pos += 2
    cb_ref = refs[pos]; pos += 1          # (Q, Kp, Dp) stacked codebooks
    e2_ref = refs[pos]; pos += 1          # (Q, 1, Kp) ||e||^2 (padded rows=1e30)
    dec = []
    for _ in range(n_dec):
        dec.append((refs[pos], refs[pos + 1])); pos += 2
    out_ref, idx_ref, logit_ref, sse_ref = refs[pos:pos + 4]

    kp = cb_ref.shape[1]

    # ---- encoder MLP (activations stay VMEM / vreg resident) ----
    h = x_ref[...]
    for i, (w_ref, b_ref) in enumerate(enc):
        h = lax.dot_general(h.astype(mm_dtype), w_ref[...],
                            (((1,), (1,)), ((), ())),
                            preferred_element_type=jnp.float32) + b_ref[...]
        if i < n_enc - 1:
            h = jnp.maximum(h, 0.0)

    # ---- residual vector quantizer (statically unrolled over Q codebooks) --
    residual = h                               # f32
    x_q = jnp.zeros_like(h)
    idx_cols, sse_cols = [], []
    for q in range(num_q):
        e = cb_ref[q]                          # (Kp, Dp), mm_dtype
        e2 = e2_ref[q]                         # (1, Kp), f32
        xe = lax.dot_general(residual.astype(mm_dtype), e,
                             (((1,), (1,)), ((), ())),
                             preferred_element_type=jnp.float32)   # (bn, Kp)
        dpart = e2 - 2.0 * xe                  # argmin-equivalent distances (f32)

        # first-occurrence argmin along the codebook axis
        dmin = jnp.min(dpart, axis=-1, keepdims=True)
        iota = lax.broadcasted_iota(jnp.int32, dpart.shape, 1)
        sel = jnp.min(jnp.where(dpart == dmin, iota, jnp.int32(kp)),
                      axis=-1, keepdims=True)                      # (bn, 1)

        # codebook lookup as a matmul-gather (MXU, no per-row dynamic gathers)
        one_hot = (iota == sel).astype(mm_dtype)                   # (bn, Kp)
        xq = lax.dot_general(one_hot, e, (((1,), (0,)), ((), ())),
                             preferred_element_type=jnp.float32)   # (bn, Dp)

        # logits d = ||x||^2 + ||e||^2 - 2 x.e ; lane-dense store into the
        # flattened (bn, Q*Kp) output slab.
        x2 = jnp.sum(residual * residual, axis=1, keepdims=True)   # (bn, 1)
        logit_ref[:, q * kp:(q + 1) * kp] = (dpart + x2).astype(logit_ref.dtype)

        # ||r - e_sel||^2 == x2 + dmin exactly; reuse already-computed terms.
        sse_cols.append(x2 + dmin)
        idx_cols.append(sel)

        residual = residual - xq
        x_q = x_q + xq

    # single writes for the tiny stacked-per-codebook outputs
    idx_ref[...] = jnp.concatenate(idx_cols, axis=1)
    sse_ref[...] = jnp.concatenate(sse_cols, axis=1)

    # ---- decoder MLP ----
    out = x_q
    for i, (w_ref, b_ref) in enumerate(dec):
        out = lax.dot_general(out.astype(mm_dtype), w_ref[...],
                              (((1,), (1,)), ((), ())),
                              preferred_element_type=jnp.float32) + b_ref[...]
        if i < n_dec - 1:
            out = jnp.maximum(out, 0.0)
    out_ref[...] = out.astype(out_ref.dtype)


# ----------------------------------------------------------------------------
# Wrapper: pads to lane-dense shapes, builds specs, launches the fused kernel
# ----------------------------------------------------------------------------
def rqvae_forward(x, params, beta, matmul_dtype=jnp.float32):
    N, in_dim = x.shape
    enc, dec = params["enc"], params["dec"]
    codebooks = params["codebooks"]            # (Q, K, D)
    Q, K, D = codebooks.shape
    out_dim = dec[-1][0].shape[0]

    # ---- pad all feature dims and K to multiples of 128 (lane-dense) ----
    in_p, out_p = _round_up(in_dim, 128), _round_up(out_dim, 128)
    K_p, D_p = _round_up(K, 128), _round_up(D, 128)

    def pad_mlp(layer_params):
        padded = []
        for w, b in layer_params:
            o, i = w.shape
            o_p, i_p = _round_up(o, 128), _round_up(i, 128)
            w_p = jnp.pad(w, ((0, o_p - o), (0, i_p - i))).astype(matmul_dtype)
            b_p = jnp.pad(b, (0, o_p - o)).reshape(1, o_p).astype(jnp.float32)
            padded.append((w_p, b_p))
        return padded

    enc_p, dec_p = pad_mlp(enc), pad_mlp(dec)

    cb_pad = jnp.pad(codebooks, ((0, 0), (0, K_p - K), (0, D_p - D)))
    cb_mm = cb_pad.astype(matmul_dtype)
    # hoisted codebook squared norms (consistent with what the MXU sees);
    # padded codebook rows get a huge norm so they are never selected.
    cb_norm_src = cb_mm.astype(jnp.float32)
    e2 = jnp.sum(cb_norm_src * cb_norm_src, axis=-1)                 # (Q, Kp)
    if K_p > K:
        e2 = jnp.where(jnp.arange(K_p)[None, :] < K, e2, jnp.float32(1e30))
    e2 = e2[:, None, :]                                              # (Q, 1, Kp)

    # ---- batch tiling from a VMEM byte budget ----
    cap = _vmem_capacity_bytes()
    vmem_limit = int(cap * 0.7) if cap is not None else None
    budget = vmem_limit if vmem_limit is not None else 16 * 1024 * 1024

    const_bytes = 0
    for w, b in enc_p + dec_p:
        const_bytes += w.size * w.dtype.itemsize + b.size * b.dtype.itemsize
    const_bytes += cb_mm.size * cb_mm.dtype.itemsize + e2.size * 4
    const_bytes *= 2                                   # default double-buffering

    max_feat = max([in_p, out_p, D_p, K_p] + [w.shape[0] for w, _ in enc_p])
    row_io_bytes = 4 * (in_p + out_p + Q * K_p + 2 * Q)
    row_work_bytes = 4 * (3 * max_feat + 2 * K_p)
    bn = _choose_batch_tile(N, row_io_bytes, row_work_bytes, const_bytes, budget)

    N_p = _round_up(N, bn)
    grid_n = N_p // bn
    x_p = jnp.pad(x, ((0, N_p - N), (0, in_p - in_dim)))

    # ---- specs ----
    def _const_spec(shape):
        nd = len(shape)
        return pl.BlockSpec(shape, lambda i, _nd=nd: (0,) * _nd)

    inputs = [x_p]
    in_specs = [pl.BlockSpec((bn, in_p), lambda i: (i, 0))]
    for w, b in enc_p:
        inputs += [w, b]
        in_specs += [_const_spec(w.shape), _const_spec(b.shape)]
    inputs += [cb_mm, e2]
    in_specs += [_const_spec(cb_mm.shape), _const_spec(e2.shape)]
    for w, b in dec_p:
        inputs += [w, b]
        in_specs += [_const_spec(w.shape), _const_spec(b.shape)]

    out_shape = (
        jax.ShapeDtypeStruct((N_p, out_p), jnp.float32),      # reconstruction
        jax.ShapeDtypeStruct((N_p, Q), jnp.int32),            # indices
        jax.ShapeDtypeStruct((N_p, Q * K_p), jnp.float32),    # logits (flat)
        jax.ShapeDtypeStruct((N_p, Q), jnp.float32),          # per-row sq. err
    )
    out_specs = (
        pl.BlockSpec((bn, out_p), lambda i: (i, 0)),
        pl.BlockSpec((bn, Q), lambda i: (i, 0)),
        pl.BlockSpec((bn, Q * K_p), lambda i: (i, 0)),
        pl.BlockSpec((bn, Q), lambda i: (i, 0)),
    )

    # ---- advisory cost estimate for the XLA scheduler ----
    flops = 0
    for w, _ in enc_p + dec_p:
        o_p, i_p = w.shape
        flops += 2 * N_p * o_p * i_p
    flops += Q * 4 * N_p * K_p * D_p                  # xe + one_hot gather
    bytes_in = sum(a.size * a.dtype.itemsize for a in inputs)
    bytes_out = 4 * (N_p * out_p + N_p * Q + N_p * Q * K_p + N_p * Q)
    cost = pl.CostEstimate(flops=flops, transcendentals=0,
                           bytes_accessed=bytes_in + bytes_out)

    kernel = partial(_rqvae_kernel, n_enc=len(enc_p), n_dec=len(dec_p),
                     num_q=Q, mm_dtype=matmul_dtype)

    out_pad, idx_pad, logit_flat, sse_pad = pl.pallas_call(
        kernel,
        grid=(grid_n,),
        in_specs=in_specs,
        out_specs=out_specs,
        out_shape=out_shape,
        compiler_params=pltpu.CompilerParams(
            dimension_semantics=("parallel",),
            vmem_limit_bytes=vmem_limit),
        cost_estimate=cost,
    )(*inputs)

    # ---- slice padding away, rebuild one_hots, finish the loss reduce ----
    out = out_pad[:N, :out_dim]
    indices = idx_pad[:N]
    logits = logit_flat[:N].reshape(N, Q, K_p)[:, :, :K]
    row_sse = sse_pad[:N]
    one_hots = jax.nn.one_hot(indices, K, dtype=jnp.float32)

    # rq_loss = mean over codebooks of (1 + beta) * MSE(x_q, quantizer input)
    # (forward value of codebook_loss + beta * commitment_loss)
    rq_loss = (1.0 + beta) * jnp.mean(jnp.sum(row_sse, axis=0) / (N * D))
    return out, rq_loss, indices, one_hots, logits


# ----------------------------------------------------------------------------
# Pure-JAX reference of the PyTorch forward (for a correctness check)
# ----------------------------------------------------------------------------
def rqvae_reference(x, params, beta):
    enc, dec, codebooks = params["enc"], params["dec"], params["codebooks"]
    h = x
    for i, (w, b) in enumerate(enc):
        h = h @ w.T + b
        if i < len(enc) - 1:
            h = jnp.maximum(h, 0.0)
    residual, x_q = h, jnp.zeros_like(h)
    losses, idxs, ohs, ds = [], [], [], []
    for e in codebooks:
        x2 = jnp.sum(residual ** 2, axis=1, keepdims=True)
        e2 = jnp.sum(e ** 2, axis=1, keepdims=True).T
        xe = residual @ e.T
        d = x2 + e2 - 2.0 * xe
        idx = jnp.argmin(e2 - 2.0 * xe, axis=-1)   # argmin invariant to +x2
        oh = jax.nn.one_hot(idx, e.shape[0], dtype=jnp.float32)
        xq = e[idx]
        losses.append((1.0 + beta) * jnp.mean((xq - residual) ** 2))
        idxs.append(idx); ohs.append(oh); ds.append(d)
        residual = residual - xq
        x_q = x_q + xq
    out = x_q
    for i, (w, b) in enumerate(dec):
        out = out @ w.T + b
        if i < len(dec) - 1:
            out = jnp.maximum(out, 0.0)
    return (out, jnp.mean(jnp.stack(losses)), jnp.stack(idxs, axis=-1),
            jnp.stack(ohs, axis=1), jnp.stack(ds, axis=1))


# ----------------------------------------------------------------------------
# Deterministic parameter construction
# ----------------------------------------------------------------------------
def init_linear(key, in_dim, out_dim):
    kw, kb = jax.random.split(key)
    bound = 1.0 / jnp.sqrt(in_dim)
    w = jax.random.uniform(kw, (out_dim, in_dim), jnp.float32, -bound, bound)
    b = jax.random.uniform(kb, (out_dim,), jnp.float32, -bound, bound)
    return w, b


def init_params(key, in_dim, layers, e_dim, n_e_list):
    enc_dims = [in_dim] + layers + [e_dim]
    dec_dims = enc_dims[::-1]
    params = {"enc": [], "dec": []}
    for a, bdim in zip(enc_dims[:-1], enc_dims[1:]):
        key, sub = jax.random.split(key)
        params["enc"].append(init_linear(sub, a, bdim))
    for a, bdim in zip(dec_dims[:-1], dec_dims[1:]):
        key, sub = jax.random.split(key)
        params["dec"].append(init_linear(sub, a, bdim))
    cbs = []
    for n_e in n_e_list:
        key, sub = jax.random.split(key)
        cbs.append(jax.random.uniform(
            sub, (n_e, e_dim), jnp.float32, -1.0 / n_e, 1.0 / n_e))
    params["codebooks"] = jnp.stack(cbs)      # (Q, K, D), equal K per quantizer
    return params


if __name__ == "__main__":
    jax.config.update("jax_default_matmul_precision", "highest")

    # small deterministic config consistent with the module
    in_dim = 64
    layers_cfg = [32]
    e_dim = 16
    n_e_list = [32, 32]     # two residual codebooks
    beta = 0.25
    batch = 8

    key = jax.random.PRNGKey(0)
    key, kx, kp = jax.random.split(key, 3)
    x = jax.random.normal(kx, (batch, in_dim), dtype=jnp.float32)
    params = init_params(kp, in_dim, layers_cfg, e_dim, n_e_list)

    # exact (f32) path
    fwd = jax.jit(partial(rqvae_forward, beta=beta))
    out, rq_loss, indices, one_hots, logits = fwd(x, params)
    jax.block_until_ready((out, rq_loss, indices, one_hots, logits))

    Q, K = len(n_e_list), n_e_list[0]
    assert out.shape == (batch, in_dim)
    assert indices.shape == (batch, Q)
    assert one_hots.shape == (batch, Q, K)
    assert logits.shape == (batch, Q, K)
    assert rq_loss.shape == ()

    r_out, r_loss, r_idx, r_oh, r_logit = rqvae_reference(x, params, beta)
    assert jnp.array_equal(indices.astype(jnp.int32), r_idx.astype(jnp.int32))
    assert jnp.allclose(one_hots, r_oh)
    assert jnp.allclose(logits, r_logit, rtol=2e-3, atol=2e-3)
    assert jnp.allclose(out, r_out, rtol=2e-3, atol=2e-3)
    assert jnp.allclose(rq_loss, r_loss, rtol=2e-3, atol=2e-3)

    # bf16-MXU path (the v6e/v7x production configuration); sanity-only checks
    fwd_bf16 = jax.jit(partial(rqvae_forward, beta=beta,
                               matmul_dtype=jnp.bfloat16))
    b_out, b_loss, b_idx, b_oh, b_logit = fwd_bf16(x, params)
    jax.block_until_ready((b_out, b_loss, b_idx, b_oh, b_logit))
    assert b_out.shape == (batch, in_dim) and b_logit.shape == (batch, Q, K)
    assert bool(jnp.isfinite(b_loss)) and bool(jnp.all(jnp.isfinite(b_out)))
    assert bool(jnp.all((b_idx >= 0) & (b_idx < K)))

    print("KERNEL_OK")
</pallas_src>

<mosaic_0001>
module attributes {stable_mosaic.version = 11 : i64} {
  func.func @_rqvae_kernel(%arg0: i32, %arg1: memref<8x128xf32, #tpu.memory_space<vmem>>, %arg2: memref<128x128xf32, #tpu.memory_space<vmem>>, %arg3: memref<1x128xf32, #tpu.memory_space<vmem>>, %arg4: memref<128x128xf32, #tpu.memory_space<vmem>>, %arg5: memref<1x128xf32, #tpu.memory_space<vmem>>, %arg6: memref<2x128x128xf32, #tpu.memory_space<vmem>>, %arg7: memref<2x1x128xf32, #tpu.memory_space<vmem>>, %arg8: memref<128x128xf32, #tpu.memory_space<vmem>>, %arg9: memref<1x128xf32, #tpu.memory_space<vmem>>, %arg10: memref<128x128xf32, #tpu.memory_space<vmem>>, %arg11: memref<1x128xf32, #tpu.memory_space<vmem>>, %arg12: memref<8x128xf32, #tpu.memory_space<vmem>>, %arg13: memref<8x2xi32, #tpu.memory_space<vmem>>, %arg14: memref<8x256xf32, #tpu.memory_space<vmem>>, %arg15: memref<8x2xf32, #tpu.memory_space<vmem>>) attributes {dimension_semantics = [#tpu.dimension_semantics<parallel>], iteration_bounds = array<i64: 1>, scalar_prefetch = 0 : i64, scratch_operands = 0 : i64, tpu.core_type = #tpu.core_type<tc>, window_params = [{transform_indices = @transform_0, window_bounds = array<i64: 8, 128>}, {pipeline_mode = #tpu.pipeline_mode<synchronous>, transform_indices = @transform_1, window_bounds = array<i64: 128, 128>}, {pipeline_mode = #tpu.pipeline_mode<synchronous>, transform_indices = @transform_2, window_bounds = array<i64: 1, 128>}, {pipeline_mode = #tpu.pipeline_mode<synchronous>, transform_indices = @transform_3, window_bounds = array<i64: 128, 128>}, {pipeline_mode = #tpu.pipeline_mode<synchronous>, transform_indices = @transform_4, window_bounds = array<i64: 1, 128>}, {pipeline_mode = #tpu.pipeline_mode<synchronous>, transform_indices = @transform_5, window_bounds = array<i64: 2, 128, 128>}, {pipeline_mode = #tpu.pipeline_mode<synchronous>, transform_indices = @transform_6, window_bounds = array<i64: 2, 1, 128>}, {pipeline_mode = #tpu.pipeline_mode<synchronous>, transform_indices = @transform_7, window_bounds = array<i64: 128, 128>}, {pipeline_mode = #tpu.pipeline_mode<synchronous>, transform_indices = @transform_8, window_bounds = array<i64: 1, 128>}, {pipeline_mode = #tpu.pipeline_mode<synchronous>, transform_indices = @transform_9, window_bounds = array<i64: 128, 128>}, {pipeline_mode = #tpu.pipeline_mode<synchronous>, transform_indices = @transform_10, window_bounds = array<i64: 1, 128>}, {transform_indices = @transform_11, window_bounds = array<i64: 8, 128>}, {transform_indices = @transform_12, window_bounds = array<i64: 8, 2>}, {transform_indices = @transform_13, window_bounds = array<i64: 8, 256>}, {transform_indices = @transform_14, window_bounds = array<i64: 8, 2>}]} {
    %c0 = arith.constant 0 : index
    %c0_0 = arith.constant 0 : index
    %0 = vector.load %arg1[%c0, %c0_0] : memref<8x128xf32, #tpu.memory_space<vmem>>, vector<8x128xf32>
    %c0_1 = arith.constant 0 : index
    %c0_2 = arith.constant 0 : index
    %1 = vector.load %arg2[%c0_1, %c0_2] : memref<128x128xf32, #tpu.memory_space<vmem>>, vector<128x128xf32>
    %cst = arith.constant dense<0.000000e+00> : vector<8x128xf32>
    %2 = tpu.matmul %0, %1, %cst {dimension_numbers = #tpu.dot_dimension_numbers<[1], [1], [0], [0], [0, 0, 1, 0], [], []>, precision = #tpu.contract_precision<fp32>} : vector<8x128xf32>, vector<128x128xf32>, vector<8x128xf32> -> vector<8x128xf32>
    %c0_3 = arith.constant 0 : index
    %c0_4 = arith.constant 0 : index
    %3 = vector.load %arg3[%c0_3, %c0_4] : memref<1x128xf32, #tpu.memory_space<vmem>>, vector<1x128xf32>
    %4 = vector.broadcast %3 : vector<1x128xf32> to vector<8x128xf32>
    %5 = arith.addf %2, %4 : vector<8x128xf32>
    %cst_5 = arith.constant 0.000000e+00 : f32
    %6 = vector.broadcast %cst_5 : f32 to vector<8x128xf32>
    %7 = arith.maximumf %5, %6 : vector<8x128xf32>
    %c0_6 = arith.constant 0 : index
    %c0_7 = arith.constant 0 : index
    %8 = vector.load %arg4[%c0_6, %c0_7] : memref<128x128xf32, #tpu.memory_space<vmem>>, vector<128x128xf32>
    %cst_8 = arith.constant dense<0.000000e+00> : vector<8x128xf32>
    %9 = tpu.matmul %7, %8, %cst_8 {dimension_numbers = #tpu.dot_dimension_numbers<[1], [1], [0], [0], [0, 0, 1, 0], [], []>, precision = #tpu.contract_precision<fp32>} : vector<8x128xf32>, vector<128x128xf32>, vector<8x128xf32> -> vector<8x128xf32>
    %c0_9 = arith.constant 0 : index
    %c0_10 = arith.constant 0 : index
    %10 = vector.load %arg5[%c0_9, %c0_10] : memref<1x128xf32, #tpu.memory_space<vmem>>, vector<1x128xf32>
    %11 = vector.broadcast %10 : vector<1x128xf32> to vector<8x128xf32>
    %12 = arith.addf %9, %11 : vector<8x128xf32>
    %cst_11 = arith.constant 0.000000e+00 : f32
    %13 = vector.broadcast %cst_11 : f32 to vector<8x128xf32>
    %c0_12 = arith.constant 0 : index
    %c0_13 = arith.constant 0 : index
    %c0_14 = arith.constant 0 : index
    %14 = vector.load %arg6[%c0_12, %c0_13, %c0_14] : memref<2x128x128xf32, #tpu.memory_space<vmem>>, vector<1x128x128xf32>
    %15 = vector.shape_cast %14 : vector<1x128x128xf32> to vector<128x128xf32>
    %c0_15 = arith.constant 0 : index
    %c0_16 = arith.constant 0 : index
    %c0_17 = arith.constant 0 : index
    %16 = vector.load %arg7[%c0_15, %c0_16, %c0_17] : memref<2x1x128xf32, #tpu.memory_space<vmem>>, vector<1x1x128xf32>
    %17 = vector.shape_cast %16 : vector<1x1x128xf32> to vector<1x128xf32>
    %cst_18 = arith.constant dense<0.000000e+00> : vector<8x128xf32>
    %18 = tpu.matmul %12, %15, %cst_18 {dimension_numbers = #tpu.dot_dimension_numbers<[1], [1], [0], [0], [0, 0, 1, 0], [], []>, precision = #tpu.contract_precision<fp32>} : vector<8x128xf32>, vector<128x128xf32>, vector<8x128xf32> -> vector<8x128xf32>
    %cst_19 = arith.constant 2.000000e+00 : f32
    %19 = vector.broadcast %cst_19 : f32 to vector<8x128xf32>
    %20 = arith.mulf %19, %18 : vector<8x128xf32>
    %21 = vector.broadcast %17 : vector<1x128xf32> to vector<8x128xf32>
    %22 = arith.subf %21, %20 : vector<8x128xf32>
    %cst_20 = arith.constant dense<0x7F800000> : vector<8xf32>
    %23 = vector.multi_reduction <minimumf>, %22, %cst_20 [1] : vector<8x128xf32> to vector<8xf32>
    %24 = vector.shape_cast %23 : vector<8xf32> to vector<8x1xf32>
    %25 = tpu.iota {dimensions = array<i32: 1>} : vector<8x128xi32>
    %26 = vector.broadcast %24 : vector<8x1xf32> to vector<8x128xf32>
    %27 = arith.cmpf oeq, %22, %26 : vector<8x128xf32>
    %c128_i32 = arith.constant 128 : i32
    %28 = vector.broadcast %c128_i32 : i32 to vector<8x128xi32>
    %29 = arith.select %27, %25, %28 : vector<8x128xi1>, vector<8x128xi32>
    %cst_21 = arith.constant dense<2147483647> : vector<8xi32>
    %30 = vector.multi_reduction <minsi>, %29, %cst_21 [1] : vector<8x128xi32> to vector<8xi32>
    %31 = vector.shape_cast %30 : vector<8xi32> to vector<8x1xi32>
    %32 = vector.broadcast %31 : vector<8x1xi32> to vector<8x128xi32>
    %33 = arith.cmpi eq, %25, %32 : vector<8x128xi32>
    %34 = arith.extui %33 : vector<8x128xi1> to vector<8x128xi32>
    %35 = arith.sitofp %34 : vector<8x128xi32> to vector<8x128xf32>
    %cst_22 = arith.constant dense<0.000000e+00> : vector<8x128xf32>
    %36 = tpu.matmul %35, %15, %cst_22 {dimension_numbers = #tpu.dot_dimension_numbers<[1], [0], [0], [1], [0, 0, 1, 1], [], []>, precision = #tpu.contract_precision<fp32>} : vector<8x128xf32>, vector<128x128xf32>, vector<8x128xf32> -> vector<8x128xf32>
    %37 = arith.mulf %12, %12 : vector<8x128xf32>
    %cst_23 = arith.constant dense<0.000000e+00> : vector<8xf32>
    %38 = vector.multi_reduction <add>, %37, %cst_23 [1] : vector<8x128xf32> to vector<8xf32>
    %39 = vector.shape_cast %38 : vector<8xf32> to vector<8x1xf32>
    %40 = vector.broadcast %39 : vector<8x1xf32> to vector<8x128xf32>
    %41 = arith.addf %22, %40 : vector<8x128xf32>
    %c0_24 = arith.constant 0 : index
    %c0_25 = arith.constant 0 : index
    %42 = vector.load %arg14[%c0_24, %c0_25] : memref<8x256xf32, #tpu.memory_space<vmem>>, vector<8x128xf32>
    tpu.vector_store %arg14[%c0_24, %c0_25], %41 {strides = array<i32>} : memref<8x256xf32, #tpu.memory_space<vmem>>, vector<8x128xf32>,
    %43 = arith.addf %39, %24 : vector<8x1xf32>
    %44 = arith.subf %12, %36 : vector<8x128xf32>
    %45 = arith.addf %13, %36 : vector<8x128xf32>
    %c1 = arith.constant 1 : index
    %c0_26 = arith.constant 0 : index
    %c0_27 = arith.constant 0 : index
    %46 = vector.load %arg6[%c1, %c0_26, %c0_27] : memref<2x128x128xf32, #tpu.memory_space<vmem>>, vector<1x128x128xf32>
    %47 = vector.shape_cast %46 : vector<1x128x128xf32> to vector<128x128xf32>
    %c1_28 = arith.constant 1 : index
    %c0_29 = arith.constant 0 : index
    %c0_30 = arith.constant 0 : index
    %48 = vector.load %arg7[%c1_28, %c0_29, %c0_30] : memref<2x1x128xf32, #tpu.memory_space<vmem>>, vector<1x1x128xf32>
    %49 = vector.shape_cast %48 : vector<1x1x128xf32> to vector<1x128xf32>
    %cst_31 = arith.constant dense<0.000000e+00> : vector<8x128xf32>
    %50 = tpu.matmul %44, %47, %cst_31 {dimension_numbers = #tpu.dot_dimension_numbers<[1], [1], [0], [0], [0, 0, 1, 0], [], []>, precision = #tpu.contract_precision<fp32>} : vector<8x128xf32>, vector<128x128xf32>, vector<8x128xf32> -> vector<8x128xf32>
    %cst_32 = arith.constant 2.000000e+00 : f32
    %51 = vector.broadcast %cst_32 : f32 to vector<8x128xf32>
    %52 = arith.mulf %51, %50 : vector<8x128xf32>
    %53 = vector.broadcast %49 : vector<1x128xf32> to vector<8x128xf32>
    %54 = arith.subf %53, %52 : vector<8x128xf32>
    %cst_33 = arith.constant dense<0x7F800000> : vector<8xf32>
    %55 = vector.multi_reduction <minimumf>, %54, %cst_33 [1] : vector<8x128xf32> to vector<8xf32>
    %56 = vector.shape_cast %55 : vector<8xf32> to vector<8x1xf32>
    %57 = tpu.iota {dimensions = array<i32: 1>} : vector<8x128xi32>
    %58 = vector.broadcast %56 : vector<8x1xf32> to vector<8x128xf32>
    %59 = arith.cmpf oeq, %54, %58 : vector<8x128xf32>
    %c128_i32_34 = arith.constant 128 : i32
    %60 = vector.broadcast %c128_i32_34 : i32 to vector<8x128xi32>
    %61 = arith.select %59, %57, %60 : vector<8x128xi1>, vector<8x128xi32>
    %cst_35 = arith.constant dense<2147483647> : vector<8xi32>
    %62 = vector.multi_reduction <minsi>, %61, %cst_35 [1] : vector<8x128xi32> to vector<8xi32>
    %63 = vector.shape_cast %62 : vector<8xi32> to vector<8x1xi32>
    %64 = vector.broadcast %63 : vector<8x1xi32> to vector<8x128xi32>
    %65 = arith.cmpi eq, %57, %64 : vector<8x128xi32>
    %66 = arith.extui %65 : vector<8x128xi1> to vector<8x128xi32>
    %67 = arith.sitofp %66 : vector<8x128xi32> to vector<8x128xf32>
    %cst_36 = arith.constant dense<0.000000e+00> : vector<8x128xf32>
    %68 = tpu.matmul %67, %47, %cst_36 {dimension_numbers = #tpu.dot_dimension_numbers<[1], [0], [0], [1], [0, 0, 1, 1], [], []>, precision = #tpu.contract_precision<fp32>} : vector<8x128xf32>, vector<128x128xf32>, vector<8x128xf32> -> vector<8x128xf32>
    %69 = arith.mulf %44, %44 : vector<8x128xf32>
    %cst_37 = arith.constant dense<0.000000e+00> : vector<8xf32>
    %70 = vector.multi_reduction <add>, %69, %cst_37 [1] : vector<8x128xf32> to vector<8xf32>
    %71 = vector.shape_cast %70 : vector<8xf32> to vector<8x1xf32>
    %72 = vector.broadcast %71 : vector<8x1xf32> to vector<8x128xf32>
    %73 = arith.addf %54, %72 : vector<8x128xf32>
    %c0_38 = arith.constant 0 : index
    %c128 = arith.constant 128 : index
    %74 = vector.load %arg14[%c0_38, %c128] : memref<8x256xf32, #tpu.memory_space<vmem>>, vector<8x128xf32>
    tpu.vector_store %arg14[%c0_38, %c128], %73 {strides = array<i32>} : memref<8x256xf32, #tpu.memory_space<vmem>>, vector<8x128xf32>,
    %75 = arith.addf %71, %56 : vector<8x1xf32>
    %76 = arith.addf %45, %68 : vector<8x128xf32>
    %77 = tpu.concatenate %31, %63 in 1 : vector<8x1xi32>, vector<8x1xi32> -> vector<8x2xi32>
    %c0_39 = arith.constant 0 : index
    %c0_40 = arith.constant 0 : index
    %78 = vector.load %arg13[%c0_39, %c0_40] : memref<8x2xi32, #tpu.memory_space<vmem>>, vector<8x2xi32>
    tpu.vector_store %arg13[%c0_39, %c0_40], %77 {strides = array<i32>} : memref<8x2xi32, #tpu.memory_space<vmem>>, vector<8x2xi32>,
    %79 = tpu.concatenate %43, %75 in 1 : vector<8x1xf32>, vector<8x1xf32> -> vector<8x2xf32>
    %c0_41 = arith.constant 0 : index
    %c0_42 = arith.constant 0 : index
    %80 = vector.load %arg15[%c0_41, %c0_42] : memref<8x2xf32, #tpu.memory_space<vmem>>, vector<8x2xf32>
    tpu.vector_store %arg15[%c0_41, %c0_42], %79 {strides = array<i32>} : memref<8x2xf32, #tpu.memory_space<vmem>>, vector<8x2xf32>,
    %c0_43 = arith.constant 0 : index
    %c0_44 = arith.constant 0 : index
    %81 = vector.load %arg8[%c0_43, %c0_44] : memref<128x128xf32, #tpu.memory_space<vmem>>, vector<128x128xf32>
    %cst_45 = arith.constant dense<0.000000e+00> : vector<8x128xf32>
    %82 = tpu.matmul %76, %81, %cst_45 {dimension_numbers = #tpu.dot_dimension_numbers<[1], [1], [0], [0], [0, 0, 1, 0], [], []>, precision = #tpu.contract_precision<fp32>} : vector<8x128xf32>, vector<128x128xf32>, vector<8x128xf32> -> vector<8x128xf32>
    %c0_46 = arith.constant 0 : index
    %c0_47 = arith.constant 0 : index
    %83 = vector.load %arg9[%c0_46, %c0_47] : memref<1x128xf32, #tpu.memory_space<vmem>>, vector<1x128xf32>
    %84 = vector.broadcast %83 : vector<1x128xf32> to vector<8x128xf32>
    %85 = arith.addf %82, %84 : vector<8x128xf32>
    %cst_48 = arith.constant 0.000000e+00 : f32
    %86 = vector.broadcast %cst_48 : f32 to vector<8x128xf32>
    %87 = arith.maximumf %85, %86 : vector<8x128xf32>
    %c0_49 = arith.constant 0 : index
    %c0_50 = arith.constant 0 : index
    %88 = vector.load %arg10[%c0_49, %c0_50] : memref<128x128xf32, #tpu.memory_space<vmem>>, vector<128x128xf32>
    %cst_51 = arith.constant dense<0.000000e+00> : vector<8x128xf32>
    %89 = tpu.matmul %87, %88, %cst_51 {dimension_numbers = #tpu.dot_dimension_numbers<[1], [1], [0], [0], [0, 0, 1, 0], [], []>, precision = #tpu.contract_precision<fp32>} : vector<8x128xf32>, vector<128x128xf32>, vector<8x128xf32> -> vector<8x128xf32>
    %c0_52 = arith.constant 0 : index
    %c0_53 = arith.constant 0 : index
    %90 = vector.load %arg11[%c0_52, %c0_53] : memref<1x128xf32, #tpu.memory_space<vmem>>, vector<1x128xf32>
    %91 = vector.broadcast %90 : vector<1x128xf32> to vector<8x128xf32>
    %92 = arith.addf %89, %91 : vector<8x128xf32>
    %c0_54 = arith.constant 0 : index
    %c0_55 = arith.constant 0 : index
    %93 = vector.load %arg12[%c0_54, %c0_55] : memref<8x128xf32, #tpu.memory_space<vmem>>, vector<8x128xf32>
    tpu.vector_store %arg12[%c0_54, %c0_55], %92 {strides = array<i32>} : memref<8x128xf32, #tpu.memory_space<vmem>>, vector<8x128xf32>,
    return
  }
  func.func @transform_0(%arg0: i32) -> (i32, i32) {
    %c0_i32 = arith.constant 0 : i32
    %c0_i32_0 = arith.constant 0 : i32
    return %arg0, %c0_i32 : i32, i32
  }
  func.func @transform_1(%arg0: i32) -> (i32, i32) {
    %c0_i32 = arith.constant 0 : i32
    %c0_i32_0 = arith.constant 0 : i32
    %c0_i32_1 = arith.constant 0 : i32
    return %c0_i32, %c0_i32_0 : i32, i32
  }
  func.func @transform_2(%arg0: i32) -> (i32, i32) {
    %c0_i32 = arith.constant 0 : i32
    %c0_i32_0 = arith.constant 0 : i32
    %c0_i32_1 = arith.constant 0 : i32
    return %c0_i32, %c0_i32_0 : i32, i32
  }
  func.func @transform_3(%arg0: i32) -> (i32, i32) {
    %c0_i32 = arith.constant 0 : i32
    %c0_i32_0 = arith.constant 0 : i32
    %c0_i32_1 = arith.constant 0 : i32
    return %c0_i32, %c0_i32_0 : i32, i32
  }
  func.func @transform_4(%arg0: i32) -> (i32, i32) {
    %c0_i32 = arith.constant 0 : i32
    %c0_i32_0 = arith.constant 0 : i32
    %c0_i32_1 = arith.constant 0 : i32
    return %c0_i32, %c0_i32_0 : i32, i32
  }
  func.func @transform_5(%arg0: i32) -> (i32, i32, i32) {
    %c0_i32 = arith.constant 0 : i32
    %c0_i32_0 = arith.constant 0 : i32
    %c0_i32_1 = arith.constant 0 : i32
    %c0_i32_2 = arith.constant 0 : i32
    return %c0_i32, %c0_i32_0, %c0_i32_1 : i32, i32, i32
  }
  func.func @transform_6(%arg0: i32) -> (i32, i32, i32) {
    %c0_i32 = arith.constant 0 : i32
    %c0_i32_0 = arith.constant 0 : i32
    %c0_i32_1 = arith.constant 0 : i32
    %c0_i32_2 = arith.constant 0 : i32
    return %c0_i32, %c0_i32_0, %c0_i32_1 : i32, i32, i32
  }
  func.func @transform_7(%arg0: i32) -> (i32, i32) {
    %c0_i32 = arith.constant 0 : i32
    %c0_i32_0 = arith.constant 0 : i32
    %c0_i32_1 = arith.constant 0 : i32
    return %c0_i32, %c0_i32_0 : i32, i32
  }
  func.func @transform_8(%arg0: i32) -> (i32, i32) {
    %c0_i32 = arith.constant 0 : i32
    %c0_i32_0 = arith.constant 0 : i32
    %c0_i32_1 = arith.constant 0 : i32
    return %c0_i32, %c0_i32_0 : i32, i32
  }
  func.func @transform_9(%arg0: i32) -> (i32, i32) {
    %c0_i32 = arith.constant 0 : i32
    %c0_i32_0 = arith.constant 0 : i32
    %c0_i32_1 = arith.constant 0 : i32
    return %c0_i32, %c0_i32_0 : i32, i32
  }
  func.func @transform_10(%arg0: i32) -> (i32, i32) {
    %c0_i32 = arith.constant 0 : i32
    %c0_i32_0 = arith.constant 0 : i32
    %c0_i32_1 = arith.constant 0 : i32
    return %c0_i32, %c0_i32_0 : i32, i32
  }
  func.func @transform_11(%arg0: i32) -> (i32, i32) {
    %c0_i32 = arith.constant 0 : i32
    %c0_i32_0 = arith.constant 0 : i32
    return %arg0, %c0_i32 : i32, i32
  }
  func.func @transform_12(%arg0: i32) -> (i32, i32) {
    %c0_i32 = arith.constant 0 : i32
    %c0_i32_0 = arith.constant 0 : i32
    return %arg0, %c0_i32 : i32, i32
  }
  func.func @transform_13(%arg0: i32) -> (i32, i32) {
    %c0_i32 = arith.constant 0 : i32
    %c0_i32_0 = arith.constant 0 : i32
    return %arg0, %c0_i32 : i32, i32
  }
  func.func @transform_14(%arg0: i32) -> (i32, i32) {
    %c0_i32 = arith.constant 0 : i32
    %c0_i32_0 = arith.constant 0 : i32
    return %arg0, %c0_i32 : i32, i32
  }
}

</mosaic_0001>

<bundles_post_ra>
// kernel: rqvae_forward.1
= control target key start
LH: loop header
LB: loop body
LE: loop exit
PB: predicated region body
PF: predicated region fallthrough
CT: control target
= control target key end

     0   :  { %v9192_v2 = vmov 0.0|0.0   ;;  %vm9193_vm0 = vmmov 0   ;;  %v11863_v5 = vmov 0.0   ;;  %s11848_s0 = inlined_call_operand.vmem [shape: f32[8,128], index: 0, kind: input, shape index: {}]   ;;  %s11849_s1 = inlined_call_operand.vmem [shape: f32[128,128], index: 1, kind: input, shape index: {}]   ;;  %s11850_s2 = inlined_call_operand.vmem [shape: f32[1,128], index: 2, kind: input, shape index: {}]   ;;  %s11851_s3 = inlined_call_operand.vmem [shape: f32[128,128], index: 3, kind: input, shape index: {}]   ;;  %s11852_s4 = inlined_call_operand.vmem [shape: f32[1,128], index: 4, kind: input, shape index: {}]   ;;  %s11853_s5 = inlined_call_operand.vmem [shape: f32[2,128,128], index: 5, kind: input, shape index: {}]   ;;  %s11854_s6 = inlined_call_operand.vmem [shape: f32[2,1,128], index: 6, kind: input, shape index: {}]   ;;  %s11855_s7 = inlined_call_operand.vmem [shape: f32[128,128], index: 7, kind: input, shape index: {}]   ;;  %s11856_s8 = inlined_call_operand.vmem [shape: f32[1,128], index: 8, kind: input, shape index: {}]   ;;  %s11857_s9 = inlined_call_operand.vmem [shape: f32[128,128], index: 9, kind: input, shape index: {}]   ;;  %s11858_s10 = inlined_call_operand.vmem [shape: f32[1,128], index: 10, kind: input, shape index: {}]   ;;  %s11859_s11 = inlined_call_operand.hbm [shape: f32[8,128], index: 11, kind: output, shape index: {0}]   ;;  %s11860_s12 = inlined_call_operand.vmem [shape: s32[8,2], index: 12, kind: output, shape index: {1}]   ;;  %s11861_s13 = inlined_call_operand.vmem [shape: f32[8,256], index: 13, kind: output, shape index: {2}]   ;;  %s11862_s14 = inlined_call_operand.vmem [shape: f32[8,2], index: 14, kind: output, shape index: {3}]  }
   0x1   :  { %v44_v0 = vld [vmem:[%s11849_s1] sm:$0xff]  ;;  %v45_v1 = vld [vmem:[%s11849_s1 + $0x8] sm:$0xff]  ;;  %7937 = vmatprep.subr.bf16.mxu0 %v9192_v2  ;;  %6289 = vmatprep.mubr.msk.f32.mxu0 %vm9193_vm0, %v11863_v5  ;;  %v46_v6 = vld [vmem:[%s11849_s1 + $0x10] sm:$0xff] }
   0x2   :  { %v68_v3 = vand.u32 4294901760, %v44_v0  ;;  %v71_v4 = vand.u32 4294901760, %v45_v1  ;;  %v47_v7 = vld [vmem:[%s11849_s1 + $0x18] sm:$0xff]  ;;  %8081 = vmatprep.subr.bf16.mxu1 %v9192_v2  ;;  %6499 = vmatprep.mubr.msk.f32.mxu1 %vm9193_vm0, %v11863_v5  ;;  %v74_v9 = vand.u32 4294901760, %v46_v6 }
   0x3   :  { %v77_v10 = vand.u32 4294901760, %v47_v7 }
   0x4   :  { %v9290_v8 = vpack.c.bf16 %v71_v4, %v68_v3 }
   0x6   :  { %7939 = vmatpush3.bf16.xpose.msra.mxu0 %v9290_v8 }
   0x7   :  { %7940 = vmatprep.subr.bf16.mxu0 %v9192_v2 }
   0x8   :  { %20 = vsyncpa [#allocation3], 0  ;;  %v9294_v11 = vpack.c.bf16 %v77_v10, %v74_v9  ;;  %v48_v12 = vld [vmem:[%s11849_s1 + $0x20] sm:$0xff]  ;;  %v49_v13 = vld [vmem:[%s11849_s1 + $0x28] sm:$0xff]  ;;  %v9313_v21 = vsub.f32 %v44_v0, %v68_v3  ;;  %v9315_v22 = vsub.f32 %v45_v1, %v71_v4  ;;  %v9318_v23 = vsub.f32 %v46_v6, %v74_v9  ;;  %s9196_s29 = smov [#allocation2]  }
   0x9   :  { %v80_v14 = vand.u32 4294901760, %v48_v12  ;;  %v83_v15 = vand.u32 4294901760, %v49_v13  ;;  %v50_v17 = vld [vmem:[%s11849_s1 + $0x30] sm:$0xff]  ;;  %v51_v18 = vld [vmem:[%s11849_s1 + $0x38] sm:$0xff]  ;;  %v9320_v24 = vsub.f32 %v47_v7, %v77_v10  ;;  %v52_v26 = vld [vmem:[%s11849_s1 + $0x40] sm:$0xff]  ;;  %vm4048_vm6 = vcmask 7168  }
   0xa   :  { %v86_v19 = vand.u32 4294901760, %v50_v17  ;;  %v89_v20 = vand.u32 4294901760, %v51_v18  ;;  %v53_v27 = vld [vmem:[%s11849_s1 + $0x48] sm:$0xff]  ;;  %v7986_v31 = vpack.c.bf16 %v9315_v22, %v9313_v21  ;;  %v92_v34 = vand.u32 4294901760, %v52_v26  ;;  %v54_v41 = vld [vmem:[%s11849_s1 + $0x50] sm:$0xff]  ;;  %v55_v42 = vld [vmem:[%s11849_s1 + $0x58] sm:$0xff] }
   0xb   :  { %v9304_v16 = vpack.c.bf16 %v83_v15, %v80_v14  ;;  %v9322_v25 = vsub.f32 %v48_v12, %v80_v14  ;;  %v9330_v28 = vsub.f32 %v49_v13, %v83_v15  ;;  %v7989_v33 = vpack.c.bf16 %v9320_v24, %v9318_v23  ;;  %v56_v49 = vld [vmem:[%s11849_s1 + $0x60] sm:$0xff]  ;;  %v57_v50 = vld [vmem:[%s11849_s1 + $0x68] sm:$0xff]  ;;  %v58_v58 = vld [vmem:[%s11849_s1 + $0x70] sm:$0xff]  ;;  %s5390_s30 = sshll.u32 %s9196_s29, 4  ;;  %s5391_s30 = int_to_ptr.vmem [resolvable:$true] %s5390_s30 }
   0xc   :  { %v9332_v29 = vsub.f32 %v50_v17, %v86_v19  ;;  %v9334_v30 = vsub.f32 %v51_v18, %v89_v20  ;;  %v9338_v32 = vpack.c.bf16 %v89_v20, %v86_v19  ;;  %v95_v35 = vand.u32 4294901760, %v53_v27  ;;  %v43_v56 = vld [vmem:[%s11848_s0] sm:$0xff]  ;;  %v59_v59 = vld [vmem:[%s11849_s1 + $0x78] sm:$0xff]  ;;  %s9168_s0 = scalar_lea.vmem %s5391_s30, 128  ;;  %p9173_p1 = scmp.lt.s32.totalorder %s5391_s30, %s5391_s30 }
   0xd   :  { %v7992_v36 = vpack.c.bf16 %v9330_v28, %v9322_v25  ;;  %v9346_v38 = vsub.f32 %v52_v26, %v92_v34  ;;  %v98_v44 = vand.u32 4294901760, %v54_v41  ;;  %v101_v45 = vand.u32 4294901760, %v55_v42  ;;  %p9169_p0 = scmp.ne.s32.totalorder %s5391_s30, %s9168_s0  ;;  %p9174_p2 = scmp.lt.s32.totalorder %s9168_s0, %s9168_s0 }
   0xe   :  { %7942 = vmatpush3.bf16.xpose.msra.mxu0 %v9294_v11  ;;  %v7995_v37 = vpack.c.bf16 %v9334_v30, %v9332_v29  ;;  %v9348_v39 = vsub.f32 %v53_v27, %v95_v35  ;;  %v9360_v43 = vpack.c.bf16 %v95_v35, %v92_v34  ;;  %v104_v52 = vand.u32 4294901760, %v56_v49 }
   0xf   :  { %7943 = vmatprep.subr.bf16.mxu0 %v9192_v2  ;;  %v9362_v46 = vsub.f32 %v54_v41, %v98_v44  ;;  %v9364_v47 = vsub.f32 %v55_v42, %v101_v45  ;;  %v9376_v51 = vpack.c.bf16 %v101_v45, %v98_v44  ;;  %v107_v53 = vand.u32 4294901760, %v57_v50  ;;  %p9175_p3 = por %p9174_p2, %p9173_p1 }
  0x10   :  { %v7998_v40 = vpack.c.bf16 %v9348_v39, %v9346_v38  ;;  %v9378_v54 = vsub.f32 %v56_v49, %v104_v52  ;;  %v9395_v60 = vand.u32 4294901760, %v43_v56  ;;  %v110_v62 = vand.u32 4294901760, %v58_v58 }
  0x11   :  { %v8001_v48 = vpack.c.bf16 %v9364_v47, %v9362_v46  ;;  %v9380_v55 = vsub.f32 %v57_v50, %v107_v53  ;;  %v9397_v61 = vpack.c.bf16 %v107_v53, %v104_v52  ;;  %v113_v63 = vand.u32 4294901760, %v59_v59  ;;  %p9176_p4 = pnand %p9175_p3, %p9169_p0 }
  0x12   :  { %v9399_v0 = vsub.f32 %v58_v58, %v110_v62  ;;  %v9404_v3 = vsub.f32 %v43_v56, %v9395_v60  ;;  %v161_v4 = vand.u32 4294901760, %v9313_v21  ;;  %v168_v6 = vand.u32 4294901760, %v9315_v22 }
  0x13   :  { %v8004_v57 = vpack.c.bf16 %v9380_v55, %v9378_v54  ;;  %v9401_v1 = vsub.f32 %v59_v59, %v113_v63  ;;  %v9413_v10 = vpack.c.bf16 %v113_v63, %v110_v62  ;;  %v175_v18 = vand.u32 4294901760, %v9318_v23 }
  0x14   :  { %v150_v9 = vand.u32 4294901760, %v9404_v3  ;;  %v162_v12 = vsub.f32 %v9313_v21, %v161_v4  ;;  %v169_v13 = vsub.f32 %v9315_v22, %v168_v6  ;;  %v182_v19 = vand.u32 4294901760, %v9320_v24 }
  0x15   :  { %v8007_v7 = vpack.c.bf16 %v9401_v1, %v9399_v0  ;;  %v176_v27 = vsub.f32 %v9318_v23, %v175_v18  ;;  %v189_v42 = vand.u32 4294901760, %v9322_v25  ;;  %v196_v44 = vand.u32 4294901760, %v9330_v28 }
  0x16   :  { %7945 = vmatpush3.bf16.xpose.msra.mxu0 %v9304_v16  ;;  %v151_v14 = vsub.f32 %v9404_v3, %v150_v9  ;;  %v163_v15 = vand.u32 4294901760, %v162_v12  ;;  %v170_v17 = vand.u32 4294901760, %v169_v13  ;;  %v183_v34 = vsub.f32 %v9320_v24, %v182_v19 }
  0x17   :  { %7946 = vmatprep.subr.bf16.mxu0 %v9192_v2  ;;  %v177_v35 = vand.u32 4294901760, %v176_v27  ;;  %v190_v49 = vsub.f32 %v9322_v25, %v189_v42  ;;  %v197_v50 = vsub.f32 %v9330_v28, %v196_v44  ;;  %v203_v56 = vand.u32 4294901760, %v9332_v29 }
  0x18   :  { %v152_v20 = vand.u32 4294901760, %v151_v14  ;;  %v7962_v26 = vpack.c.bf16 %v170_v17, %v163_v15  ;;  %v184_v41 = vand.u32 4294901760, %v183_v34  ;;  %v210_v58 = vand.u32 4294901760, %v9334_v30 }
  0x19   :  { %v191_v52 = vand.u32 4294901760, %v190_v49  ;;  %v198_v53 = vand.u32 4294901760, %v197_v50  ;;  %v204_v62 = vsub.f32 %v9332_v29, %v203_v56  ;;  %v217_v14 = vand.u32 4294901760, %v9346_v38 }
  0x1a   :  { %v7965_v45 = vpack.c.bf16 %v184_v41, %v177_v35  ;;  %v211_v63 = vsub.f32 %v9334_v30, %v210_v58  ;;  %v224_v15 = vand.u32 4294901760, %v9348_v39  ;;  %v11870_v35 = vand.u32 4294901760, %v9362_v46 }
  0x1b   :  { %v7968_v59 = vpack.c.bf16 %v198_v53, %v191_v52  ;;  %v205_v12 = vand.u32 4294901760, %v204_v62  ;;  %v11869_v41 = vand.u32 4294901760, %v9364_v47  ;;  %v11867_v62 = vand.u32 4294901760, %v9380_v55 }
  0x1c   :  { %v212_v13 = vand.u32 4294901760, %v211_v63  ;;  %v232_v49 = vsub.f32 %v9362_v46, %v11870_v35  ;;  %v8046_v28 = vpack.c.bf16 %v224_v15, %v217_v14  ;;  %v11886_v30 = vand.u32 4294901760, %v9362_v46 }
  0x1d   :  { %v239_v50 = vsub.f32 %v9364_v47, %v11869_v41  ;;  %vm4050_vm7 = vcmask 15360  }
  0x1e   :  { %7948 = vmatpush3.bf16.xpose.msra.mxu0 %v9338_v32  ;;  %v7971_v17 = vpack.c.bf16 %v212_v13, %v205_v12  ;;  %v233_v52 = vand.u32 4294901760, %v232_v49  ;;  %v253_v13 = vsub.f32 %v9380_v55, %v11867_v62 }
  0x1f   :  { %7949 = vmatprep.subr.bf16.mxu0 %v9192_v2  ;;  %v240_v53 = vand.u32 4294901760, %v239_v50 }
  0x21   :  { %v7977_v63 = vpack.c.bf16 %v240_v53, %v233_v52 }
  0x26   :  { %7951 = vmatpush3.bf16.xpose.msra.mxu0 %v9360_v43 }
  0x27   :  { %7952 = vmatprep.subr.bf16.mxu0 %v9192_v2 }
  0x2e   :  { %7954 = vmatpush3.bf16.xpose.msra.mxu0 %v9376_v51 }
  0x2f   :  { %7955 = vmatprep.subr.bf16.mxu0 %v9192_v2 }
  0x36   :  { %7957 = vmatpush3.bf16.xpose.msra.mxu0 %v9397_v61 }
  0x37   :  { %7958 = vmatprep.subr.bf16.mxu0 %v9192_v2 }
  0x3e   :  { %7960 = vmatpush3.bf16.xpose.msra.mxu0 %v9413_v10 }
  0x3f   :  { %7961 = vmatprep.subr.bf16.mxu0 %v9192_v2 }
  0x45   :  { %6290 = vmatmul.mubr.f32.vlgmr.msra.gmra.mrb[0].mxu0 %v152_v20  ;;  %v218_v20 = vsub.f32 %v9346_v38, %v217_v14  ;;  %v11891_v14 = vand.u32 4294901760, %v9401_v1 }
  0x46   :  { %7963 = vmatpush3.bf16.xpose.msra.mxu0 %v7962_v26  ;;  %6324 = vmatprep.mubr.msk.f32.mxu0 %vm9193_vm0, %v11863_v5  ;;  %v225_v26 = vsub.f32 %v9348_v39, %v224_v15  ;;  %v11888_v39 = vand.u32 4294901760, %v9378_v54 }
  0x47   :  { %7964 = vmatprep.subr.bf16.mxu0 %v9192_v2  ;;  %v219_v27 = vand.u32 4294901760, %v218_v20  ;;  %v254_v20 = vand.u32 4294901760, %v253_v13 }
  0x48   :  { %v226_v34 = vand.u32 4294901760, %v225_v26  ;;  %v11866_v26 = vand.u32 4294901760, %v9399_v0 }
  0x4e   :  { %7966 = vmatpush3.bf16.xpose.msra.mxu0 %v7965_v45  ;;  %v7974_v45 = vpack.c.bf16 %v226_v34, %v219_v27  ;;  %v11865_v27 = vand.u32 4294901760, %v9401_v1 }
  0x4f   :  { %7967 = vmatprep.subr.bf16.mxu0 %v9192_v2 }
  0x50   :  { %v267_v49 = vsub.f32 %v9401_v1, %v11865_v27 }
  0x52   :  { %v268_v52 = vand.u32 4294901760, %v267_v49  ;;  %v719_v49 = vld [vmem:[%s11851_s3 + $0x50] sm:$0xff] }
  0x53   :  { %v763_v24 = vand.u32 4294901760, %v719_v49 }
  0x56   :  { %7969 = vmatpush3.bf16.xpose.msra.mxu0 %v7968_v59  ;;  %v11868_v59 = vand.u32 4294901760, %v9378_v54 }
  0x57   :  { %7970 = vmatprep.subr.bf16.mxu0 %v9192_v2 }
  0x58   :  { %v246_v12 = vsub.f32 %v9378_v54, %v11868_v59  ;;  %v11892_v54 = vmov 0.0  }
  0x5e   :  { %7972 = vmatpush3.bf16.xpose.msra.mxu0 %v7971_v17  ;;  %v247_v17 = vand.u32 4294901760, %v246_v12  ;;  %v717_v12 = vld [vmem:[%s11851_s3 + $0x40] sm:$0xff] }
  0x5f   :  { %7973 = vmatprep.subr.bf16.mxu0 %v9192_v2 }
  0x60   :  { %v7980_v34 = vpack.c.bf16 %v254_v20, %v247_v17 }
  0x66   :  { %7975 = vmatpush3.bf16.xpose.msra.mxu0 %v7974_v45  ;;  %v260_v45 = vsub.f32 %v9399_v0, %v11866_v26  ;;  %v9625_v26 = vsub.f32 %v719_v49, %v763_v24 }
  0x67   :  { %7976 = vmatprep.subr.bf16.mxu0 %v9192_v2 }
  0x68   :  { %v261_v50 = vand.u32 4294901760, %v260_v45  ;;  %v718_v45 = vld [vmem:[%s11851_s3 + $0x48] sm:$0xff] }
  0x69   :  { %v760_v23 = vand.u32 4294901760, %v718_v45 }
  0x6a   :  { %v7983_v53 = vpack.c.bf16 %v268_v52, %v261_v50  ;;  %v720_v50 = vld [vmem:[%s11851_s3 + $0x58] sm:$0xff]  ;;  %v8037_v52 = vpack.c.bf16 %v182_v19, %v175_v18  ;;  %v722_v19 = vld [vmem:[%s11851_s3 + $0x68] sm:$0xff] }
  0x6b   :  { %v766_v18 = vand.u32 4294901760, %v720_v50  ;;  %v9623_v27 = vsub.f32 %v718_v45, %v760_v23  ;;  %v772_v41 = vand.u32 4294901760, %v722_v19 }
  0x6d   :  { %v9629_v59 = vsub.f32 %v720_v50, %v766_v18  ;;  %v9669_v38 = vpack.c.bf16 %v766_v18, %v763_v24 }
  0x6e   :  { %7978 = vmatpush3.bf16.xpose.msra.mxu0 %v7977_v63  ;;  %v716_v63 = vld [vmem:[%s11851_s3 + $0x38] sm:$0xff] }
  0x6f   :  { %7979 = vmatprep.subr.bf16.mxu0 %v9192_v2 }
  0x76   :  { %7981 = vmatpush3.bf16.xpose.msra.mxu0 %v7980_v34 }
  0x77   :  { %7982 = vmatprep.subr.bf16.mxu0 %v9192_v2 }
  0x7e   :  { %7984 = vmatpush3.bf16.xpose.msra.mxu0 %v7983_v53 }
  0x7f   :  { %7985 = vmatprep.subr.bf16.mxu0 %v9192_v2 }
  0x85   :  { %6325 = vmatmul.mubr.f32.vlgmr.msra.gmra.mrb[0].mxu0 %v9395_v60 }
  0x86   :  { %7987 = vmatpush3.bf16.xpose.msra.mxu0 %v7986_v31  ;;  %6359 = vmatprep.mubr.msk.f32.mxu0 %vm9193_vm0, %v11863_v5  ;;  %v8034_v31 = vpack.c.bf16 %v168_v6, %v161_v4 }
  0x87   :  { %7988 = vmatprep.subr.bf16.mxu0 %v9192_v2 }
  0x8e   :  { %7990 = vmatpush3.bf16.xpose.msra.mxu0 %v7989_v33  ;;  %v709_v33 = vld [vmem:[%s11851_s3] sm:$0xff] }
  0x8f   :  { %7991 = vmatprep.subr.bf16.mxu0 %v9192_v2  ;;  %v733_v21 = vand.u32 4294901760, %v709_v33 }
  0x91   :  { %v9584_v17 = vsub.f32 %v709_v33, %v733_v21  ;;  %v721_v33 = vld [vmem:[%s11851_s3 + $0x60] sm:$0xff] }
  0x96   :  { %7993 = vmatpush3.bf16.xpose.msra.mxu0 %v7992_v36  ;;  %v710_v36 = vld [vmem:[%s11851_s3 + $0x8] sm:$0xff] }
  0x97   :  { %7994 = vmatprep.subr.bf16.mxu0 %v9192_v2  ;;  %v736_v22 = vand.u32 4294901760, %v710_v36 }
  0x99   :  { %v9582_v13 = vpack.c.bf16 %v736_v22, %v733_v21  ;;  %v9586_v20 = vsub.f32 %v710_v36, %v736_v22  ;;  %v754_v21 = vand.u32 4294901760, %v716_v63  ;;  %v757_v22 = vand.u32 4294901760, %v717_v12 }
  0x9b   :  { %8083 = vmatpush3.bf16.xpose.msra.mxu1 %v9582_v13  ;;  %v9660_v29 = vpack.c.bf16 %v760_v23, %v757_v22  ;;  %v833_v1 = vand.u32 4294901760, %v9586_v20 }
  0x9c   :  { %8084 = vmatprep.subr.bf16.mxu1 %v9192_v2 }
  0x9e   :  { %7996 = vmatpush3.bf16.xpose.msra.mxu0 %v7995_v37  ;;  %v711_v37 = vld [vmem:[%s11851_s3 + $0x10] sm:$0xff] }
  0x9f   :  { %7997 = vmatprep.subr.bf16.mxu0 %v9192_v2 }
  0xa6   :  { %7999 = vmatpush3.bf16.xpose.msra.mxu0 %v7998_v40  ;;  %v712_v40 = vld [vmem:[%s11851_s3 + $0x18] sm:$0xff] }
  0xa7   :  { %8000 = vmatprep.subr.bf16.mxu0 %v9192_v2  ;;  %v742_v4 = vand.u32 4294901760, %v712_v40 }
  0xa9   :  { %v9603_v53 = vsub.f32 %v712_v40, %v742_v4 }
  0xae   :  { %8002 = vmatpush3.bf16.xpose.msra.mxu0 %v8001_v48  ;;  %v739_v48 = vand.u32 4294901760, %v711_v37 }
  0xaf   :  { %8003 = vmatprep.subr.bf16.mxu0 %v9192_v2 }
  0xb0   :  { %v9588_v34 = vsub.f32 %v711_v37, %v739_v48  ;;  %v9627_v62 = vpack.c.bf16 %v742_v4, %v739_v48  ;;  %v8043_v4 = vpack.c.bf16 %v210_v58, %v203_v56  ;;  %v11889_v56 = vand.u32 4294901760, %v9380_v55 }
  0xb2   :  { %8086 = vmatpush3.bf16.xpose.msra.mxu1 %v9627_v62  ;;  %v8052_v58 = vpack.c.bf16 %v11889_v56, %v11888_v39 }
  0xb3   :  { %8087 = vmatprep.subr.bf16.mxu1 %v9192_v2 }
  0xb6   :  { %8005 = vmatpush3.bf16.xpose.msra.mxu0 %v8004_v57  ;;  %v713_v57 = vld [vmem:[%s11851_s3 + $0x20] sm:$0xff] }
  0xb7   :  { %8006 = vmatprep.subr.bf16.mxu0 %v9192_v2  ;;  %v745_v6 = vand.u32 4294901760, %v713_v57 }
  0xbe   :  { %8008 = vmatpush3.bf16.xpose.msra.mxu0 %v8007_v7 }
  0xbf   :  { %8009 = vmatprep.subr.bf16.mxu0 %v9192_v2 }
  0xc5   :  { %6360 = vmatmul.mubr.f32.vlgmr.msra.gmra.mrb[0].mxu0 %v9404_v3  ;;  %v714_v3 = vld [vmem:[%s11851_s3 + $0x28] sm:$0xff] }
  0xc6   :  { %8011 = vmatpush3.bf16.xpose.msra.mxu0 %v9290_v8  ;;  %6394 = vmatprep.mubr.msk.f32.mxu0 %vm9193_vm0, %v11863_v5  ;;  %v748_v7 = vand.u32 4294901760, %v714_v3 }
  0xc7   :  { %8012 = vmatprep.subr.bf16.mxu0 %v9192_v2 }
  0xc8   :  { %v9611_v36 = vsub.f32 %v714_v3, %v748_v7  ;;  %v769_v3 = vand.u32 4294901760, %v721_v33  ;;  %v9642_v48 = vpack.c.bf16 %v748_v7, %v745_v6 }
  0xca   :  { %v9631_v35 = vsub.f32 %v721_v33, %v769_v3  ;;  %8089 = vmatpush3.bf16.xpose.msra.mxu1 %v9642_v48  ;;  %v9678_v46 = vpack.c.bf16 %v772_v41, %v769_v3  ;;  %v840_v33 = vand.u32 4294901760, %v9588_v34 }
  0xcb   :  { %8090 = vmatprep.subr.bf16.mxu1 %v9192_v2 }
  0xcc   :  { %v841_v24 = vsub.f32 %v9588_v34, %v840_v33 }
  0xce   :  { %8014 = vmatpush3.bf16.xpose.msra.mxu0 %v9294_v11  ;;  %v842_v3 = vand.u32 4294901760, %v841_v24 }
  0xcf   :  { %8015 = vmatprep.subr.bf16.mxu0 %v9192_v2 }
  0xd6   :  { %8017 = vmatpush3.bf16.xpose.msra.mxu0 %v9304_v16 }
  0xd7   :  { %8018 = vmatprep.subr.bf16.mxu0 %v9192_v2 }
  0xde   :  { %8020 = vmatpush3.bf16.xpose.msra.mxu0 %v9338_v32 }
  0xdf   :  { %8021 = vmatprep.subr.bf16.mxu0 %v9192_v2 }
  0xe6   :  { %8023 = vmatpush3.bf16.xpose.msra.mxu0 %v9360_v43 }
  0xe7   :  { %8024 = vmatprep.subr.bf16.mxu0 %v9192_v2 }
  0xee   :  { %8026 = vmatpush3.bf16.xpose.msra.mxu0 %v9376_v51 }
  0xef   :  { %8027 = vmatprep.subr.bf16.mxu0 %v9192_v2 }
  0xf6   :  { %8029 = vmatpush3.bf16.xpose.msra.mxu0 %v9397_v61 }
  0xf7   :  { %8030 = vmatprep.subr.bf16.mxu0 %v9192_v2 }
  0xfe   :  { %8032 = vmatpush3.bf16.xpose.msra.mxu0 %v9413_v10 }
  0xff   :  { %8033 = vmatprep.subr.bf16.mxu0 %v9192_v2 }
 0x105   :  { %6395 = vmatmul.mubr.f32.vlgmr.msra.gmra.mrb[0].mxu0 %v150_v9  ;;  %v715_v9 = vld [vmem:[%s11851_s3 + $0x30] sm:$0xff] }
 0x106   :  { %8035 = vmatpush3.bf16.xpose.msra.mxu0 %v8034_v31  ;;  %6429 = vmatprep.mubr.msk.f32.mxu0 %vm9193_vm0, %v11863_v5  ;;  %v9605_v31 = vsub.f32 %v713_v57, %v745_v6  ;;  %v751_v37 = vand.u32 4294901760, %v715_v9  ;;  %v9619_v57 = vsub.f32 %v716_v63, %v754_v21  ;;  %v9621_v5 = vsub.f32 %v717_v12, %v757_v22 }
 0x107   :  { %8036 = vmatprep.subr.bf16.mxu0 %v9192_v2  ;;  %v8040_v63 = vpack.c.bf16 %v196_v44, %v189_v42  ;;  %v11887_v42 = vand.u32 4294901760, %v9364_v47  ;;  %v11890_v47 = vand.u32 4294901760, %v9399_v0  ;;  %v826_v0 = vand.u32 4294901760, %v9584_v17 }
 0x108   :  { %v9617_v40 = vsub.f32 %v715_v9, %v751_v37  ;;  %v9634_v9 = vsub.f32 %v722_v19, %v772_v41  ;;  %v9651_v25 = vpack.c.bf16 %v754_v21, %v751_v37  ;;  %v834_v12 = vsub.f32 %v9586_v20, %v833_v1 }
 0x109   :  { %v8049_v44 = vpack.c.bf16 %v11887_v42, %v11886_v30  ;;  %v8055_v15 = vpack.c.bf16 %v11891_v14, %v11890_v47  ;;  %v827_v7 = vsub.f32 %v9584_v17, %v826_v0  ;;  %v847_v37 = vand.u32 4294901760, %v9603_v53 }
 0x10a   :  { %8092 = vmatpush3.bf16.xpose.msra.mxu1 %v9651_v25  ;;  %v875_v47 = vand.u32 4294901760, %v9619_v57 }
 0x10b   :  { %8093 = vmatprep.subr.bf16.mxu1 %v9192_v2  ;;  %v828_v50 = vand.u32 4294901760, %v827_v7  ;;  %v848_v18 = vsub.f32 %v9603_v53, %v847_v37 }
 0x10e   :  { %8038 = vmatpush3.bf16.xpose.msra.mxu0 %v8037_v52  ;;  %v835_v52 = vand.u32 4294901760, %v834_v12  ;;  %v896_v12 = vand.u32 4294901760, %v9625_v26 }
 0x10f   :  { %8039 = vmatprep.subr.bf16.mxu0 %v9192_v2 }
 0x110   :  { %v8106_v23 = vpack.c.bf16 %v835_v52, %v828_v50  ;;  %v903_v50 = vand.u32 4294901760, %v9629_v59 }
 0x112   :  { %8095 = vmatpush3.bf16.xpose.msra.mxu1 %v9660_v29 }
 0x113   :  { %8096 = vmatprep.subr.bf16.mxu1 %v9192_v2 }
 0x116   :  { %8041 = vmatpush3.bf16.xpose.msra.mxu0 %v8040_v63  ;;  %v849_v63 = vand.u32 4294901760, %v848_v18 }
 0x117   :  { %8042 = vmatprep.subr.bf16.mxu0 %v9192_v2 }
 0x118   :  { %v8109_v30 = vpack.c.bf16 %v849_v63, %v842_v3  ;;  %v917_v3 = vand.u32 4294901760, %v9634_v9 }
 0x11a   :  { %8098 = vmatpush3.bf16.xpose.msra.mxu1 %v9669_v38 }
 0x11b   :  { %8099 = vmatprep.subr.bf16.mxu1 %v9192_v2 }
 0x11e   :  { %8044 = vmatpush3.bf16.xpose.msra.mxu0 %v8043_v4  ;;  %v854_v4 = vand.u32 4294901760, %v9605_v31 }
 0x11f   :  { %8045 = vmatprep.subr.bf16.mxu0 %v9192_v2 }
 0x120   :  { %v855_v42 = vsub.f32 %v9605_v31, %v854_v4 }
 0x122   :  { %8101 = vmatpush3.bf16.xpose.msra.mxu1 %v9678_v46  ;;  %v856_v39 = vand.u32 4294901760, %v855_v42  ;;  %v918_v42 = vsub.f32 %v9634_v9, %v917_v3 }
 0x123   :  { %8102 = vmatprep.subr.bf16.mxu1 %v9192_v2 }
 0x126   :  { %8047 = vmatpush3.bf16.xpose.msra.mxu0 %v8046_v28  ;;  %v861_v28 = vand.u32 4294901760, %v9611_v36 }
 0x127   :  { %8048 = vmatprep.subr.bf16.mxu0 %v9192_v2 }
 0x12e   :  { %8050 = vmatpush3.bf16.xpose.msra.mxu0 %v8049_v44  ;;  %v862_v44 = vsub.f32 %v9611_v36, %v861_v28 }
 0x12f   :  { %8051 = vmatprep.subr.bf16.mxu0 %v9192_v2 }
 0x130   :  { %v863_v56 = vand.u32 4294901760, %v862_v44 }
 0x132   :  { %v8112_v14 = vpack.c.bf16 %v863_v56, %v856_v39  ;;  %v919_v39 = vand.u32 4294901760, %v918_v42  ;;  %v9870_v42 = vld [vmem:[%s11853_s5 + $0x8] sm:$0xff] }
 0x136   :  { %8053 = vmatpush3.bf16.xpose.msra.mxu0 %v8052_v58  ;;  %v868_v58 = vand.u32 4294901760, %v9617_v40 }
 0x137   :  { %8054 = vmatprep.subr.bf16.mxu0 %v9192_v2 }
 0x13e   :  { %8056 = vmatpush3.bf16.xpose.msra.mxu0 %v8055_v15  ;;  %v869_v15 = vsub.f32 %v9617_v40, %v868_v58 }
 0x13f   :  { %8057 = vmatprep.subr.bf16.mxu0 %v9192_v2 }
 0x145   :  { %6430 = vmatmul.mubr.f32.vlgmr.msra.gmra.mrb[0].mxu0 %v9395_v60 }
 0x146   :  { %8059 = vmatpush3.bf16.xpose.msra.mxu0 %v9290_v8  ;;  %6464 = vmatprep.mubr.msk.f32.mxu0 %vm9193_vm0, %v11892_v54  ;;  %v723_v8 = vld [vmem:[%s11851_s3 + $0x70] sm:$0xff] }
 0x147   :  { %8060 = vmatprep.subr.bf16.mxu0 %v9192_v2 }
 0x14e   :  { %8062 = vmatpush3.bf16.xpose.msra.mxu0 %v9294_v11  ;;  %v724_v11 = vld [vmem:[%s11851_s3 + $0x78] sm:$0xff] }
 0x14f   :  { %8063 = vmatprep.subr.bf16.mxu0 %v9192_v2 }
 0x156   :  { %8065 = vmatpush3.bf16.xpose.msra.mxu0 %v9304_v16  ;;  %v775_v16 = vand.u32 4294901760, %v723_v8 }
 0x157   :  { %8066 = vmatprep.subr.bf16.mxu0 %v9192_v2 }
 0x15e   :  { %8068 = vmatpush3.bf16.xpose.msra.mxu0 %v9338_v32  ;;  %v778_v32 = vand.u32 4294901760, %v724_v11 }
 0x15f   :  { %8069 = vmatprep.subr.bf16.mxu0 %v9192_v2 }
 0x160   :  { %v9721_v55 = vsub.f32 %v724_v11, %v778_v32  ;;  %v870_v11 = vand.u32 4294901760, %v869_v15 }
 0x166   :  { %8071 = vmatpush3.bf16.xpose.msra.mxu0 %v9360_v43  ;;  %v9716_v43 = vpack.c.bf16 %v778_v32, %v775_v16  ;;  %v882_v32 = vand.u32 4294901760, %v9621_v5 }
 0x167   :  { %8072 = vmatprep.subr.bf16.mxu0 %v9192_v2 }
 0x168   :  { %8104 = vmatpush3.bf16.xpose.msra.mxu1 %v9716_v43 }
 0x169   :  { %8105 = vmatprep.subr.bf16.mxu1 %v9192_v2 }
 0x16e   :  { %8074 = vmatpush3.bf16.xpose.msra.mxu0 %v9376_v51  ;;  %v9719_v51 = vsub.f32 %v723_v8, %v775_v16  ;;  %v876_v8 = vsub.f32 %v9619_v57, %v875_v47 }
 0x16f   :  { %8075 = vmatprep.subr.bf16.mxu0 %v9192_v2 }
 0x170   :  { %v877_v16 = vand.u32 4294901760, %v876_v8  ;;  %v924_v56 = vand.u32 4294901760, %v9719_v51 }
 0x172   :  { %v925_v8 = vsub.f32 %v9719_v51, %v924_v56 }
 0x176   :  { %8077 = vmatpush3.bf16.xpose.msra.mxu0 %v9397_v61 }
 0x177   :  { %8078 = vmatprep.subr.bf16.mxu0 %v9192_v2 }
 0x17e   :  { %8080 = vmatpush3.bf16.xpose.msra.mxu0 %v9413_v10 }
 0x17f   :  { %8225 = vmatprep.subr.bf16.mxu0 %v9192_v2 }
 0x185   :  { %6465 = vmatmul.mubr.f32.vlgmr.msra.gmra.mrb[0].mxu0 %v9395_v60  ;;  %v5410_v60 = vld [vmem:[%s11850_s2] ss:$0 sm:$0xff] }
 0x186   :  { %6709 = vmatprep.mubr.msk.f32.mxu0 %vm9193_vm0, %v11892_v54 }
 0x258   :  { %v704_v61 = vpop.f32.mrb[0].mxu0 }
 0x259   :  { %v9089_v10 = vadd.f32 %v5410_v60, %v704_v61  ;;  %v6466_v41 = vpop.f32.mrb[1].mxu0  ;;  %v889_v60 = vand.u32 4294901760, %v9623_v27  ;;  %v8115_v61 = vpack.c.bf16 %v877_v16, %v870_v11  ;;  %v926_v16 = vand.u32 4294901760, %v925_v8 }
 0x25b   :  { %v708_v6 = vmax.f32 %v9089_v10, 0.0  ;;  %v883_v10 = vsub.f32 %v9621_v5, %v882_v32  ;;  %v890_v41 = vsub.f32 %v9623_v27, %v889_v60 }
 0x25d   :  { %v9735_v45 = vand.u32 4294901760, %v708_v6  ;;  %v891_v7 = vand.u32 4294901760, %v890_v41  ;;  %v8130_v41 = vpack.c.bf16 %v9586_v20, %v9584_v17  ;;  %v1394_v20 = vand.u32 4294901760, %v9870_v42 }
 0x25f   :  { %v9738_v49 = vsub.f32 %v708_v6, %v9735_v45  ;;  %v884_v6 = vand.u32 4294901760, %v883_v10 }
 0x261   :  { %v815_v21 = vand.u32 4294901760, %v9738_v49  ;;  %v8118_v52 = vpack.c.bf16 %v891_v7, %v884_v6  ;;  %v8133_v6 = vpack.c.bf16 %v9603_v53, %v9588_v34  ;;  %v8136_v7 = vpack.c.bf16 %v9611_v36, %v9605_v31  ;;  %v9911_v34 = vld [vmem:[%s11853_s5 + $0x20] sm:$0xff]  ;;  %v9916_v53 = vld [vmem:[%s11853_s5 + $0x28] sm:$0xff]  ;;  %v9936_v31 = vld [vmem:[%s11853_s5 + $0x30] sm:$0xff] }
 0x262   :  { %v1406_v8 = vand.u32 4294901760, %v9916_v53  ;;  %v9941_v36 = vld [vmem:[%s11853_s5 + $0x38] sm:$0xff] }
 0x263   :  { %v816_v22 = vsub.f32 %v9738_v49, %v815_v21 }
 0x265   :  { %v817_v19 = vand.u32 4294901760, %v816_v22  ;;  %v897_v22 = vsub.f32 %v9625_v26, %v896_v12 }
 0x267   :  { %6500 = vmatmul.mubr.f32.vlgmr.msra.gmra.mrb[0].mxu1 %v817_v19  ;;  %v898_v24 = vand.u32 4294901760, %v897_v22  ;;  %v910_v19 = vand.u32 4294901760, %v9631_v35  ;;  %v8142_v22 = vpack.c.bf16 %v9623_v27, %v9621_v5  ;;  %v9986_v5 = vld [vmem:[%s11853_s5 + $0x50] sm:$0xff]  ;;  %v9991_v27 = vld [vmem:[%s11853_s5 + $0x58] sm:$0xff] }
 0x268   :  { %8107 = vmatpush3.bf16.xpose.msra.mxu1 %v8106_v23  ;;  %6534 = vmatprep.mubr.msk.f32.mxu1 %vm9193_vm0, %v11892_v54  ;;  %v904_v23 = vsub.f32 %v9629_v59, %v903_v50 }
 0x269   :  { %8108 = vmatprep.subr.bf16.mxu1 %v9192_v2 }
 0x26a   :  { %v905_v18 = vand.u32 4294901760, %v904_v23  ;;  %v8145_v23 = vpack.c.bf16 %v9629_v59, %v9625_v26  ;;  %v10011_v59 = vld [vmem:[%s11853_s5 + $0x60] sm:$0xff]  ;;  %v10016_v26 = vld [vmem:[%s11853_s5 + $0x68] sm:$0xff] }
 0x26c   :  { %v8121_v63 = vpack.c.bf16 %v905_v18, %v898_v24  ;;  %v8148_v24 = vpack.c.bf16 %v9634_v9, %v9631_v35  ;;  %v8151_v18 = vpack.c.bf16 %v9721_v55, %v9719_v51  ;;  %v5411_v51 = vld [vmem:[%s11852_s4] ss:$0 sm:$0xff] }
 0x270   :  { %8110 = vmatpush3.bf16.xpose.msra.mxu1 %v8109_v30  ;;  %v911_v30 = vsub.f32 %v9631_v35, %v910_v19 }
 0x271   :  { %8111 = vmatprep.subr.bf16.mxu1 %v9192_v2 }
 0x272   :  { %v912_v44 = vand.u32 4294901760, %v911_v30  ;;  %v9865_v30 = vld [vmem:[%s11853_s5] sm:$0xff] }
 0x273   :  { %v1391_v17 = vand.u32 4294901760, %v9865_v30 }
 0x274   :  { %v8124_v15 = vpack.c.bf16 %v919_v39, %v912_v44 }
 0x278   :  { %8113 = vmatpush3.bf16.xpose.msra.mxu1 %v8112_v14  ;;  %v931_v14 = vand.u32 4294901760, %v9721_v55 }
 0x279   :  { %8114 = vmatprep.subr.bf16.mxu1 %v9192_v2 }
 0x27a   :  { %v932_v11 = vsub.f32 %v9721_v55, %v931_v14  ;;  %v8199_v35 = vpack.c.bf16 %v931_v14, %v924_v56 }
 0x280   :  { %8116 = vmatpush3.bf16.xpose.msra.mxu1 %v8115_v61  ;;  %v933_v61 = vand.u32 4294901760, %v932_v11 }
 0x281   :  { %8117 = vmatprep.subr.bf16.mxu1 %v9192_v2 }
 0x282   :  { %v8127_v10 = vpack.c.bf16 %v933_v61, %v926_v16  ;;  %v1412_v16 = vand.u32 4294901760, %v9941_v36 }
 0x288   :  { %8119 = vmatpush3.bf16.xpose.msra.mxu1 %v8118_v52  ;;  %v8139_v52 = vpack.c.bf16 %v9619_v57, %v9617_v40  ;;  %v9961_v40 = vld [vmem:[%s11853_s5 + $0x40] sm:$0xff]  ;;  %v9966_v57 = vld [vmem:[%s11853_s5 + $0x48] sm:$0xff] }
 0x289   :  { %8120 = vmatprep.subr.bf16.mxu1 %v9192_v2 }
 0x290   :  { %8122 = vmatpush3.bf16.xpose.msra.mxu1 %v8121_v63  ;;  %v8178_v63 = vpack.c.bf16 %v833_v1, %v826_v0  ;;  %v9880_v0 = vld [vmem:[%s11853_s5 + $0x10] sm:$0xff]  ;;  %v9885_v1 = vld [vmem:[%s11853_s5 + $0x18] sm:$0xff] }
 0x291   :  { %8123 = vmatprep.subr.bf16.mxu1 %v9192_v2  ;;  %v1397_v44 = vand.u32 4294901760, %v9880_v0  ;;  %v1400_v39 = vand.u32 4294901760, %v9885_v1 }
 0x293   :  { %v10112_v14 = vsub.f32 %v9880_v0, %v1397_v44 }
 0x298   :  { %8125 = vmatpush3.bf16.xpose.msra.mxu1 %v8124_v15  ;;  %v9905_v15 = vpack.c.bf16 %v1400_v39, %v1397_v44 }
 0x299   :  { %8126 = vmatprep.subr.bf16.mxu1 %v9192_v2 }
 0x2a0   :  { %8128 = vmatpush3.bf16.xpose.msra.mxu1 %v8127_v10  ;;  %v1418_v10 = vand.u32 4294901760, %v9966_v57 }
 0x2a1   :  { %8129 = vmatprep.subr.bf16.mxu1 %v9192_v2 }
 0x2a7   :  { %6535 = vmatmul.mubr.f32.vlgmr.msra.gmra.mrb[0].mxu1 %v9735_v45 }
 0x2a8   :  { %8131 = vmatpush3.bf16.xpose.msra.mxu1 %v8130_v41  ;;  %6569 = vmatprep.mubr.msk.f32.mxu1 %vm9193_vm0, %v11892_v54 }
 0x2a9   :  { %8132 = vmatprep.subr.bf16.mxu1 %v9192_v2 }
 0x2b0   :  { %8134 = vmatpush3.bf16.xpose.msra.mxu1 %v8133_v6  ;;  %v1424_v6 = vand.u32 4294901760, %v9991_v27 }
 0x2b1   :  { %8135 = vmatprep.subr.bf16.mxu1 %v9192_v2 }
 0x2b8   :  { %8137 = vmatpush3.bf16.xpose.msra.mxu1 %v8136_v7 }
 0x2b9   :  { %8138 = vmatprep.subr.bf16.mxu1 %v9192_v2 }
 0x2c0   :  { %8140 = vmatpush3.bf16.xpose.msra.mxu1 %v8139_v52  ;;  %v1430_v52 = vand.u32 4294901760, %v10016_v26 }
 0x2c1   :  { %8141 = vmatprep.subr.bf16.mxu1 %v9192_v2 }
 0x2c8   :  { %8143 = vmatpush3.bf16.xpose.msra.mxu1 %v8142_v22 }
 0x2c9   :  { %8144 = vmatprep.subr.bf16.mxu1 %v9192_v2 }
 0x2d0   :  { %8146 = vmatpush3.bf16.xpose.msra.mxu1 %v8145_v23  ;;  %v10117_v23 = vsub.f32 %v9885_v1, %v1400_v39 }
 0x2d1   :  { %8147 = vmatprep.subr.bf16.mxu1 %v9192_v2 }
 0x2d8   :  { %8149 = vmatpush3.bf16.xpose.msra.mxu1 %v8148_v24 }
 0x2d9   :  { %8150 = vmatprep.subr.bf16.mxu1 %v9192_v2 }
 0x2e0   :  { %8152 = vmatpush3.bf16.xpose.msra.mxu1 %v8151_v18 }
 0x2e1   :  { %8153 = vmatprep.subr.bf16.mxu1 %v9192_v2 }
 0x2e7   :  { %6570 = vmatmul.mubr.f32.vlgmr.msra.gmra.mrb[0].mxu1 %v9738_v49  ;;  %v9891_v49 = vpack.c.bf16 %v1394_v20, %v1391_v17 }
 0x2e8   :  { %8155 = vmatpush3.bf16.xpose.msra.mxu1 %v9582_v13  ;;  %6604 = vmatprep.mubr.msk.f32.mxu1 %vm9193_vm0, %v11892_v54 }
 0x2e9   :  { %8156 = vmatprep.subr.bf16.mxu1 %v9192_v2  ;;  %8227 = vmatpush3.bf16.xpose.msra.mxu0 %v9891_v49 }
 0x2ea   :  { %8228 = vmatprep.subr.bf16.mxu0 %v9192_v2 }
 0x2f0   :  { %8158 = vmatpush3.bf16.xpose.msra.mxu1 %v9627_v62 }
 0x2f1   :  { %8159 = vmatprep.subr.bf16.mxu1 %v9192_v2  ;;  %8230 = vmatpush3.bf16.xpose.msra.mxu0 %v9905_v15 }
 0x2f2   :  { %8231 = vmatprep.subr.bf16.mxu0 %v9192_v2 }
 0x2f8   :  { %8161 = vmatpush3.bf16.xpose.msra.mxu1 %v9642_v48 }
 0x2f9   :  { %8162 = vmatprep.subr.bf16.mxu1 %v9192_v2 }
 0x300   :  { %8164 = vmatpush3.bf16.xpose.msra.mxu1 %v9651_v25 }
 0x301   :  { %8165 = vmatprep.subr.bf16.mxu1 %v9192_v2 }
 0x308   :  { %8167 = vmatpush3.bf16.xpose.msra.mxu1 %v9660_v29 }
 0x309   :  { %8168 = vmatprep.subr.bf16.mxu1 %v9192_v2 }
 0x310   :  { %8170 = vmatpush3.bf16.xpose.msra.mxu1 %v9669_v38 }
 0x311   :  { %8171 = vmatprep.subr.bf16.mxu1 %v9192_v2 }
 0x318   :  { %8173 = vmatpush3.bf16.xpose.msra.mxu1 %v9678_v46 }
 0x319   :  { %8174 = vmatprep.subr.bf16.mxu1 %v9192_v2 }
 0x320   :  { %8176 = vmatpush3.bf16.xpose.msra.mxu1 %v9716_v43 }
 0x321   :  { %8177 = vmatprep.subr.bf16.mxu1 %v9192_v2 }
 0x327   :  { %6605 = vmatmul.mubr.f32.vlgmr.msra.gmra.mrb[0].mxu1 %v815_v21  ;;  %v8181_v21 = vpack.c.bf16 %v847_v37, %v840_v33  ;;  %v8184_v33 = vpack.c.bf16 %v861_v28, %v854_v4  ;;  %v1403_v37 = vand.u32 4294901760, %v9911_v34  ;;  %v8187_v4 = vpack.c.bf16 %v875_v47, %v868_v58 }
 0x328   :  { %8179 = vmatpush3.bf16.xpose.msra.mxu1 %v8178_v63  ;;  %6639 = vmatprep.mubr.msk.f32.mxu1 %vm9193_vm0, %v11892_v54  ;;  %v1409_v28 = vand.u32 4294901760, %v9936_v31  ;;  %v8190_v58 = vpack.c.bf16 %v889_v60, %v882_v32  ;;  %v1415_v47 = vand.u32 4294901760, %v9961_v40  ;;  %v8193_v32 = vpack.c.bf16 %v903_v50, %v896_v12 }
 0x329   :  { %8180 = vmatprep.subr.bf16.mxu1 %v9192_v2  ;;  %v9930_v11 = vpack.c.bf16 %v1406_v8, %v1403_v37  ;;  %v1421_v60 = vand.u32 4294901760, %v9986_v5  ;;  %v8196_v12 = vpack.c.bf16 %v917_v3, %v910_v19  ;;  %v1427_v50 = vand.u32 4294901760, %v10011_v59 }
 0x32a   :  { %v9955_v61 = vpack.c.bf16 %v1412_v16, %v1409_v28  ;;  %v9980_v41 = vpack.c.bf16 %v1418_v10, %v1415_v47 }
 0x32b   :  { %8233 = vmatpush3.bf16.xpose.msra.mxu0 %v9930_v11  ;;  %v10005_v7 = vpack.c.bf16 %v1424_v6, %v1421_v60  ;;  %v10030_v22 = vpack.c.bf16 %v1430_v52, %v1427_v50 }
 0x32c   :  { %8234 = vmatprep.subr.bf16.mxu0 %v9192_v2 }
 0x330   :  { %8182 = vmatpush3.bf16.xpose.msra.mxu1 %v8181_v21 }
 0x331   :  { %8183 = vmatprep.subr.bf16.mxu1 %v9192_v2 }
 0x333   :  { %8236 = vmatpush3.bf16.xpose.msra.mxu0 %v9955_v61 }
 0x334   :  { %8237 = vmatprep.subr.bf16.mxu0 %v9192_v2 }
 0x338   :  { %8185 = vmatpush3.bf16.xpose.msra.mxu1 %v8184_v33 }
 0x339   :  { %8186 = vmatprep.subr.bf16.mxu1 %v9192_v2 }
 0x33b   :  { %8239 = vmatpush3.bf16.xpose.msra.mxu0 %v9980_v41 }
 0x33c   :  { %8240 = vmatprep.subr.bf16.mxu0 %v9192_v2 }
 0x340   :  { %8188 = vmatpush3.bf16.xpose.msra.mxu1 %v8187_v4  ;;  %v10149_v4 = vsub.f32 %v9911_v34, %v1403_v37 }
 0x341   :  { %8189 = vmatprep.subr.bf16.mxu1 %v9192_v2 }
 0x343   :  { %8242 = vmatpush3.bf16.xpose.msra.mxu0 %v10005_v7 }
 0x344   :  { %8243 = vmatprep.subr.bf16.mxu0 %v9192_v2 }
 0x348   :  { %8191 = vmatpush3.bf16.xpose.msra.mxu1 %v8190_v58  ;;  %v10154_v58 = vsub.f32 %v9916_v53, %v1406_v8  ;;  %v10173_v8 = vsub.f32 %v9936_v31, %v1409_v28  ;;  %v10187_v31 = vsub.f32 %v9961_v40, %v1415_v47 }
 0x349   :  { %8192 = vmatprep.subr.bf16.mxu1 %v9192_v2 }
 0x34b   :  { %8245 = vmatpush3.bf16.xpose.msra.mxu0 %v10030_v22 }
 0x34c   :  { %8246 = vmatprep.subr.bf16.mxu0 %v9192_v2 }
 0x350   :  { %8194 = vmatpush3.bf16.xpose.msra.mxu1 %v8193_v32 }
 0x351   :  { %8195 = vmatprep.subr.bf16.mxu1 %v9192_v2 }
 0x358   :  { %8197 = vmatpush3.bf16.xpose.msra.mxu1 %v8196_v12 }
 0x359   :  { %8198 = vmatprep.subr.bf16.mxu1 %v9192_v2 }
 0x360   :  { %8200 = vmatpush3.bf16.xpose.msra.mxu1 %v8199_v35 }
 0x361   :  { %8201 = vmatprep.subr.bf16.mxu1 %v9192_v2 }
 0x367   :  { %6640 = vmatmul.mubr.f32.vlgmr.msra.gmra.mrb[0].mxu1 %v9735_v45 }
 0x368   :  { %8203 = vmatpush3.bf16.xpose.msra.mxu1 %v9582_v13  ;;  %6674 = vmatprep.mubr.msk.f32.mxu1 %vm9193_vm0, %v11892_v54  ;;  %v1388_v13 = vld [vmem:[%s11853_s5 + $0x78] sm:$0xff] }
 0x369   :  { %8204 = vmatprep.subr.bf16.mxu1 %v9192_v2 }
 0x370   :  { %8206 = vmatpush3.bf16.xpose.msra.mxu1 %v9627_v62  ;;  %v1387_v62 = vld [vmem:[%s11853_s5 + $0x70] sm:$0xff] }
 0x371   :  { %8207 = vmatprep.subr.bf16.mxu1 %v9192_v2  ;;  %v1433_v9 = vand.u32 4294901760, %v1387_v62 }
 0x378   :  { %8209 = vmatpush3.bf16.xpose.msra.mxu1 %v9642_v48  ;;  %v1436_v48 = vand.u32 4294901760, %v1388_v13 }
 0x379   :  { %8210 = vmatprep.subr.bf16.mxu1 %v9192_v2 }
 0x380   :  { %8212 = vmatpush3.bf16.xpose.msra.mxu1 %v9651_v25  ;;  %v10082_v25 = vpack.c.bf16 %v1436_v48, %v1433_v9 }
 0x381   :  { %8213 = vmatprep.subr.bf16.mxu1 %v9192_v2 }
 0x382   :  { %8248 = vmatpush3.bf16.xpose.msra.mxu0 %v10082_v25 }
 0x383   :  { %8249 = vmatprep.subr.bf16.mxu0 %v9192_v2 }
 0x388   :  { %8215 = vmatpush3.bf16.xpose.msra.mxu1 %v9660_v29  ;;  %v10088_v29 = vsub.f32 %v1387_v62, %v1433_v9  ;;  %v1512_v62 = vand.u32 4294901760, %v10149_v4  ;;  %v10178_v9 = vsub.f32 %v9941_v36, %v1412_v16  ;;  %v10192_v36 = vsub.f32 %v9966_v57, %v1418_v10 }
 0x389   :  { %8216 = vmatprep.subr.bf16.mxu1 %v9192_v2 }
 0x38a   :  { %v1513_v53 = vsub.f32 %v10149_v4, %v1512_v62  ;;  %v1547_v40 = vand.u32 4294901760, %v10192_v36 }
 0x38c   :  { %v1548_v10 = vsub.f32 %v10192_v36, %v1547_v40 }
 0x390   :  { %8218 = vmatpush3.bf16.xpose.msra.mxu1 %v9669_v38  ;;  %v10090_v38 = vsub.f32 %v1388_v13, %v1436_v48  ;;  %v1519_v13 = vand.u32 4294901760, %v10154_v58  ;;  %v1514_v48 = vand.u32 4294901760, %v1513_v53 }
 0x391   :  { %8219 = vmatprep.subr.bf16.mxu1 %v9192_v2 }
 0x392   :  { %v1520_v37 = vsub.f32 %v10154_v58, %v1519_v13 }
 0x398   :  { %8221 = vmatpush3.bf16.xpose.msra.mxu1 %v9678_v46  ;;  %v10095_v46 = vsub.f32 %v9865_v30, %v1391_v17  ;;  %v1505_v17 = vand.u32 4294901760, %v10117_v23 }
 0x399   :  { %8222 = vmatprep.subr.bf16.mxu1 %v9192_v2 }
 0x39a   :  { %v1484_v55 = vand.u32 4294901760, %v10095_v46  ;;  %v1506_v39 = vsub.f32 %v10117_v23, %v1505_v17 }
 0x39c   :  { %v1485_v24 = vsub.f32 %v10095_v46, %v1484_v55  ;;  %v1507_v35 = vand.u32 4294901760, %v1506_v39 }
 0x3a0   :  { %8224 = vmatpush3.bf16.xpose.msra.mxu1 %v9716_v43  ;;  %v10100_v43 = vsub.f32 %v9870_v42, %v1394_v20  ;;  %v1498_v42 = vand.u32 4294901760, %v10112_v14  ;;  %v1486_v20 = vand.u32 4294901760, %v1485_v24 }
 0x3a1   :  { %8369 = vmatprep.subr.bf16.mxu1 %v9192_v2 }
 0x3a2   :  { %v1499_v44 = vsub.f32 %v10112_v14, %v1498_v42 }
 0x3a4   :  { %v1500_v12 = vand.u32 4294901760, %v1499_v44  ;;  %v10222_v44 = vsub.f32 %v9991_v27, %v1424_v6  ;;  %v10244_v6 = vsub.f32 %v10016_v26, %v1430_v52 }
 0x3a6   :  { %v10162_v34 = vpack.c.bf16 %v1507_v35, %v1500_v12  ;;  %v1561_v35 = vand.u32 4294901760, %v10222_v44 }
 0x3a7   :  { %6675 = vmatmul.mubr.f32.vlgmr.msra.gmra.mrb[0].mxu1 %v9735_v45  ;;  %v1491_v45 = vand.u32 4294901760, %v10100_v43 }
 0x3a8   :  { %8371 = vmatpush3.bf16.msra.mxu1 %v9891_v49  ;;  %6919 = vmatprep.mubr.msk.f32.mxu1 %vm9193_vm0, %v11892_v54  ;;  %v1562_v27 = vsub.f32 %v10222_v44, %v1561_v35 }
 0x3a9   :  { %8372 = vmatprep.subr.bf16.mxu1 %v9192_v2  ;;  %v1492_v18 = vsub.f32 %v10100_v43, %v1491_v45 }
 0x3ab   :  { %v1493_v0 = vand.u32 4294901760, %v1492_v18  ;;  %v1540_v18 = vand.u32 4294901760, %v10187_v31 }
 0x3ac   :  { %8374 = vmatpush3.bf16.msra.mxu1 %v9905_v15 }
 0x3ad   :  { %8375 = vmatprep.subr.bf16.mxu1 %v9192_v2  ;;  %v10144_v33 = vpack.c.bf16 %v1493_v0, %v1486_v20  ;;  %v1541_v57 = vsub.f32 %v10187_v31, %v1540_v18 }
 0x3af   :  { %v1542_v39 = vand.u32 4294901760, %v1541_v57 }
 0x3b0   :  { %8377 = vmatpush3.bf16.msra.mxu1 %v9930_v11 }
 0x3b1   :  { %8378 = vmatprep.subr.bf16.mxu1 %v9192_v2 }
 0x3b4   :  { %8380 = vmatpush3.bf16.msra.mxu1 %v9955_v61 }
 0x3b5   :  { %8381 = vmatprep.subr.bf16.mxu1 %v9192_v2 }
 0x3b8   :  { %8383 = vmatpush3.bf16.msra.mxu1 %v9980_v41 }
 0x3b9   :  { %8384 = vmatprep.subr.bf16.mxu1 %v9192_v2 }
 0x3bc   :  { %8386 = vmatpush3.bf16.msra.mxu1 %v10005_v7 }
 0x3bd   :  { %8387 = vmatprep.subr.bf16.mxu1 %v9192_v2 }
 0x3c0   :  { %8389 = vmatpush3.bf16.msra.mxu1 %v10030_v22 }
 0x3c1   :  { %8390 = vmatprep.subr.bf16.mxu1 %v9192_v2 }
 0x3c4   :  { %8392 = vmatpush3.bf16.msra.mxu1 %v10082_v25 }
 0x3c5   :  { %8393 = vmatprep.subr.bf16.mxu1 %v9192_v2 }
 0x47a   :  { %v1369_v19 = vpop.f32.mrb[0].mxu1 }
 0x47b   :  { %v10107_v3 = vadd.f32 %v5411_v51, %v1369_v19  ;;  %v6676_v56 = vpop.f32.mrb[1].mxu1  ;;  %v1521_v51 = vand.u32 4294901760, %v1520_v37  ;;  %v1526_v19 = vand.u32 4294901760, %v10173_v8 }
 0x47c   :  { %v1533_v56 = vand.u32 4294901760, %v10178_v9 }
 0x47d   :  { %v10126_v63 = vand.u32 4294901760, %v10107_v3  ;;  %v10194_v28 = vpack.c.bf16 %v1521_v51, %v1514_v48  ;;  %v1527_v16 = vsub.f32 %v10173_v8, %v1526_v19  ;;  %v1563_v48 = vand.u32 4294901760, %v1562_v27 }
 0x47e   :  { %v1534_v24 = vsub.f32 %v10178_v9, %v1533_v56 }
 0x47f   :  { %v10130_v30 = vsub.f32 %v10107_v3, %v10126_v63  ;;  %v1528_v47 = vand.u32 4294901760, %v1527_v16  ;;  %v1575_v16 = vand.u32 4294901760, %v10244_v6 }
 0x480   :  { %v1535_v20 = vand.u32 4294901760, %v1534_v24 }
 0x481   :  { %v1473_v1 = vand.u32 4294901760, %v10130_v30  ;;  %v1576_v26 = vsub.f32 %v10244_v6, %v1575_v16 }
 0x482   :  { %v10212_v0 = vpack.c.bf16 %v1535_v20, %v1528_v47  ;;  %v1582_v47 = vand.u32 4294901760, %v10088_v29  ;;  %v1589_v20 = vand.u32 4294901760, %v10090_v38 }
 0x483   :  { %v1474_v21 = vsub.f32 %v10130_v30, %v1473_v1  ;;  %v1577_v52 = vand.u32 4294901760, %v1576_v26  ;;  %v10299_v26 = vpack.c.bf16 %v10178_v9, %v10173_v8 }
 0x485   :  { %v1475_v32 = vand.u32 4294901760, %v1474_v21  ;;  %v10217_v21 = vsub.f32 %v9986_v5, %v1421_v60  ;;  %v10239_v60 = vsub.f32 %v10011_v59, %v1427_v50 }
 0x487   :  { %6710 = vmatmul.mubr.f32.vlgmr.msra.gmra.mrb[2].mxu0 %v1475_v32  ;;  %v1549_v32 = vand.u32 4294901760, %v1548_v10  ;;  %v1554_v12 = vand.u32 4294901760, %v10217_v21  ;;  %v1568_v51 = vand.u32 4294901760, %v10239_v60  ;;  %v1583_v10 = vsub.f32 %v10088_v29, %v1582_v47 }
 0x488   :  { %8251 = vmatpush3.bf16.xpose.msra.mxu0 %v10144_v33  ;;  %6744 = vmatprep.mubr.msk.f32.mxu0 %vm9193_vm0, %v11892_v54 }
 0x489   :  { %8252 = vmatprep.subr.bf16.mxu0 %v9192_v2  ;;  %v10228_v53 = vpack.c.bf16 %v1549_v32, %v1542_v39  ;;  %v1555_v5 = vsub.f32 %v10217_v21, %v1554_v12  ;;  %v1569_v59 = vsub.f32 %v10239_v60, %v1568_v51  ;;  %v1590_v39 = vsub.f32 %v10090_v38, %v1589_v20 }
 0x48a   :  { %v1584_v32 = vand.u32 4294901760, %v1583_v10  ;;  %v10317_v10 = vpack.c.bf16 %v10244_v6, %v10239_v60 }
 0x48b   :  { %v1556_v37 = vand.u32 4294901760, %v1555_v5  ;;  %v1570_v50 = vand.u32 4294901760, %v1569_v59  ;;  %v1591_v5 = vand.u32 4294901760, %v1590_v39  ;;  %v10293_v59 = vpack.c.bf16 %v10154_v58, %v10149_v4 }
 0x48c   :  { %v10323_v39 = vpack.c.bf16 %v10090_v38, %v10088_v29  ;;  %v5412_v29 = vld [vmem:[%s11854_s6] ss:$0 sm:$0xff] }
 0x48d   :  { %v10250_v24 = vpack.c.bf16 %v1563_v48, %v1556_v37  ;;  %v10262_v57 = vpack.c.bf16 %v1577_v52, %v1570_v50  ;;  %v10272_v27 = vpack.c.bf16 %v1591_v5, %v1584_v32  ;;  %v10278_v37 = vpack.c.bf16 %v10100_v43, %v10095_v46 }
 0x48e   :  { %v10287_v48 = vpack.c.bf16 %v10117_v23, %v10112_v14  ;;  %v10305_v50 = vpack.c.bf16 %v10192_v36, %v10187_v31  ;;  %v10311_v52 = vpack.c.bf16 %v10222_v44, %v10217_v21  ;;  %v10350_v32 = vpack.c.bf16 %v1491_v45, %v1484_v55 }
 0x48f   :  { %v10362_v5 = vpack.c.bf16 %v1505_v17, %v1498_v42  ;;  %v10370_v46 = vpack.c.bf16 %v1519_v13, %v1512_v62  ;;  %v10378_v43 = vpack.c.bf16 %v1533_v56, %v1526_v19  ;;  %v10386_v55 = vpack.c.bf16 %v1547_v40, %v1540_v18 }
 0x490   :  { %8254 = vmatpush3.bf16.xpose.msra.mxu0 %v10162_v34  ;;  %v10394_v45 = vpack.c.bf16 %v1561_v35, %v1554_v12  ;;  %v10402_v14 = vpack.c.bf16 %v1575_v16, %v1568_v51  ;;  %v10410_v23 = vpack.c.bf16 %v1589_v20, %v1582_v47  ;;  %v10514_v16 = vld [vmem:[%s11853_s5 + $0x90] sm:$0xff] }
 0x491   :  { %8255 = vmatprep.subr.bf16.mxu0 %v9192_v2  ;;  %v2737_v47 = vand.u32 4294901760, %v10514_v16 }
 0x498   :  { %8257 = vmatpush3.bf16.xpose.msra.mxu0 %v10194_v28 }
 0x499   :  { %8258 = vmatprep.subr.bf16.mxu0 %v9192_v2 }
 0x4a0   :  { %8260 = vmatpush3.bf16.xpose.msra.mxu0 %v10212_v0 }
 0x4a1   :  { %8261 = vmatprep.subr.bf16.mxu0 %v9192_v2 }
 0x4a8   :  { %8263 = vmatpush3.bf16.xpose.msra.mxu0 %v10228_v53 }
 0x4a9   :  { %8264 = vmatprep.subr.bf16.mxu0 %v9192_v2 }
 0x4b0   :  { %8266 = vmatpush3.bf16.xpose.msra.mxu0 %v10250_v24 }
 0x4b1   :  { %8267 = vmatprep.subr.bf16.mxu0 %v9192_v2 }
 0x4b8   :  { %8269 = vmatpush3.bf16.xpose.msra.mxu0 %v10262_v57 }
 0x4b9   :  { %8270 = vmatprep.subr.bf16.mxu0 %v9192_v2 }
 0x4c0   :  { %8272 = vmatpush3.bf16.xpose.msra.mxu0 %v10272_v27 }
 0x4c1   :  { %8273 = vmatprep.subr.bf16.mxu0 %v9192_v2 }
 0x4c7   :  { %6745 = vmatmul.mubr.f32.vlgmr.msra.gmra.mrb[2].mxu0 %v10126_v63 }
 0x4c8   :  { %8275 = vmatpush3.bf16.xpose.msra.mxu0 %v10278_v37  ;;  %6779 = vmatprep.mubr.msk.f32.mxu0 %vm9193_vm0, %v11892_v54 }
 0x4c9   :  { %8276 = vmatprep.subr.bf16.mxu0 %v9192_v2 }
 0x4d0   :  { %8278 = vmatpush3.bf16.xpose.msra.mxu0 %v10287_v48 }
 0x4d1   :  { %8279 = vmatprep.subr.bf16.mxu0 %v9192_v2 }
 0x4d8   :  { %8281 = vmatpush3.bf16.xpose.msra.mxu0 %v10293_v59 }
 0x4d9   :  { %8282 = vmatprep.subr.bf16.mxu0 %v9192_v2 }
 0x4e0   :  { %8284 = vmatpush3.bf16.xpose.msra.mxu0 %v10299_v26 }
 0x4e1   :  { %8285 = vmatprep.subr.bf16.mxu0 %v9192_v2 }
 0x4e8   :  { %8287 = vmatpush3.bf16.xpose.msra.mxu0 %v10305_v50 }
 0x4e9   :  { %8288 = vmatprep.subr.bf16.mxu0 %v9192_v2 }
 0x4f0   :  { %8290 = vmatpush3.bf16.xpose.msra.mxu0 %v10311_v52 }
 0x4f1   :  { %8291 = vmatprep.subr.bf16.mxu0 %v9192_v2 }
 0x4f8   :  { %8293 = vmatpush3.bf16.xpose.msra.mxu0 %v10317_v10 }
 0x4f9   :  { %8294 = vmatprep.subr.bf16.mxu0 %v9192_v2 }
 0x500   :  { %8296 = vmatpush3.bf16.xpose.msra.mxu0 %v10323_v39 }
 0x501   :  { %8297 = vmatprep.subr.bf16.mxu0 %v9192_v2 }
 0x507   :  { %6780 = vmatmul.mubr.f32.vlgmr.msra.gmra.mrb[2].mxu0 %v10130_v30 }
 0x508   :  { %8299 = vmatpush3.bf16.xpose.msra.mxu0 %v9891_v49  ;;  %6814 = vmatprep.mubr.msk.f32.mxu0 %vm9193_vm0, %v11892_v54 }
 0x509   :  { %8300 = vmatprep.subr.bf16.mxu0 %v9192_v2 }
 0x510   :  { %8302 = vmatpush3.bf16.xpose.msra.mxu0 %v9905_v15 }
 0x511   :  { %8303 = vmatprep.subr.bf16.mxu0 %v9192_v2 }
 0x518   :  { %8305 = vmatpush3.bf16.xpose.msra.mxu0 %v9930_v11 }
 0x519   :  { %8306 = vmatprep.subr.bf16.mxu0 %v9192_v2 }
 0x520   :  { %8308 = vmatpush3.bf16.xpose.msra.mxu0 %v9955_v61 }
 0x521   :  { %8309 = vmatprep.subr.bf16.mxu0 %v9192_v2 }
 0x528   :  { %8311 = vmatpush3.bf16.xpose.msra.mxu0 %v9980_v41 }
 0x529   :  { %8312 = vmatprep.subr.bf16.mxu0 %v9192_v2 }
 0x530   :  { %8314 = vmatpush3.bf16.xpose.msra.mxu0 %v10005_v7 }
 0x531   :  { %8315 = vmatprep.subr.bf16.mxu0 %v9192_v2 }
 0x538   :  { %8317 = vmatpush3.bf16.xpose.msra.mxu0 %v10030_v22 }
 0x539   :  { %8318 = vmatprep.subr.bf16.mxu0 %v9192_v2 }
 0x540   :  { %8320 = vmatpush3.bf16.xpose.msra.mxu0 %v10082_v25 }
 0x541   :  { %8321 = vmatprep.subr.bf16.mxu0 %v9192_v2 }
 0x547   :  { %6815 = vmatmul.mubr.f32.vlgmr.msra.gmra.mrb[2].mxu0 %v1473_v1  ;;  %v2041_v1 = vlaneseq }
 0x548   :  { %8323 = vmatpush3.bf16.xpose.msra.mxu0 %v10350_v32  ;;  %6849 = vmatprep.mubr.msk.f32.mxu0 %vm9193_vm0, %v11892_v54 }
 0x549   :  { %8324 = vmatprep.subr.bf16.mxu0 %v9192_v2  ;;  %v10442_v4 = vand.u32 127, %v2041_v1 }
 0x550   :  { %8326 = vmatpush3.bf16.xpose.msra.mxu0 %v10362_v5 }
 0x551   :  { %8327 = vmatprep.subr.bf16.mxu0 %v9192_v2 }
 0x558   :  { %8329 = vmatpush3.bf16.xpose.msra.mxu0 %v10370_v46 }
 0x559   :  { %8330 = vmatprep.subr.bf16.mxu0 %v9192_v2 }
 0x560   :  { %8332 = vmatpush3.bf16.xpose.msra.mxu0 %v10378_v43 }
 0x561   :  { %8333 = vmatprep.subr.bf16.mxu0 %v9192_v2 }
 0x568   :  { %8335 = vmatpush3.bf16.xpose.msra.mxu0 %v10386_v55 }
 0x569   :  { %8336 = vmatprep.subr.bf16.mxu0 %v9192_v2 }
 0x570   :  { %8338 = vmatpush3.bf16.xpose.msra.mxu0 %v10394_v45 }
 0x571   :  { %8339 = vmatprep.subr.bf16.mxu0 %v9192_v2 }
 0x578   :  { %8341 = vmatpush3.bf16.xpose.msra.mxu0 %v10402_v14 }
 0x579   :  { %8342 = vmatprep.subr.bf16.mxu0 %v9192_v2 }
 0x580   :  { %8344 = vmatpush3.bf16.xpose.msra.mxu0 %v10410_v23 }
 0x581   :  { %8345 = vmatprep.subr.bf16.mxu0 %v9192_v2 }
 0x587   :  { %6850 = vmatmul.mubr.f32.vlgmr.msra.gmra.mrb[2].mxu0 %v10126_v63 }
 0x588   :  { %8347 = vmatpush3.bf16.xpose.msra.mxu0 %v9891_v49  ;;  %6884 = vmatprep.mubr.msk.f32.mxu0 %vm9193_vm0, %v11892_v54 }
 0x589   :  { %8348 = vmatprep.subr.bf16.mxu0 %v9192_v2 }
 0x590   :  { %8350 = vmatpush3.bf16.xpose.msra.mxu0 %v9905_v15 }
 0x591   :  { %8351 = vmatprep.subr.bf16.mxu0 %v9192_v2 }
 0x598   :  { %8353 = vmatpush3.bf16.xpose.msra.mxu0 %v9930_v11 }
 0x599   :  { %8354 = vmatprep.subr.bf16.mxu0 %v9192_v2 }
 0x5a0   :  { %8356 = vmatpush3.bf16.xpose.msra.mxu0 %v9955_v61 }
 0x5a1   :  { %8357 = vmatprep.subr.bf16.mxu0 %v9192_v2 }
 0x5a8   :  { %8359 = vmatpush3.bf16.xpose.msra.mxu0 %v9980_v41 }
 0x5a9   :  { %8360 = vmatprep.subr.bf16.mxu0 %v9192_v2 }
 0x5b0   :  { %8362 = vmatpush3.bf16.xpose.msra.mxu0 %v10005_v7 }
 0x5b1   :  { %8363 = vmatprep.subr.bf16.mxu0 %v9192_v2 }
 0x5b8   :  { %8365 = vmatpush3.bf16.xpose.msra.mxu0 %v10030_v22 }
 0x5b9   :  { %8366 = vmatprep.subr.bf16.mxu0 %v9192_v2 }
 0x5c0   :  { %8368 = vmatpush3.bf16.xpose.msra.mxu0 %v10082_v25 }
 0x5c1   :  { %8657 = vmatprep.subr.bf16.mxu0 %v9192_v2 }
 0x5c7   :  { %6885 = vmatmul.mubr.f32.vlgmr.msra.gmra.mrb[2].mxu0 %v10126_v63 }
 0x5c8   :  { %7339 = vmatprep.mubr.msk.f32.mxu0 %vm9193_vm0, %v11892_v54 }
 0x69a   :  { %v2027_v38 = vpop.f32.mrb[2].mxu0 }
 0x69b   :  { %v2031_v30 = vmul.f32 2.0, %v2027_v38  ;;  %v6886_v42 = vpop.f32.mrb[3].mxu0 }
 0x69c   :  { %v10591_v42 = vld [vmem:[%s11853_s5 + $0xc8] sm:$0xff] }
 0x69d   :  { %v10439_v17 = vsub.f32 %v5412_v29, %v2031_v30  ;;  %v10567_v29 = vld [vmem:[%s11853_s5 + $0xb8] sm:$0xff] }
 0x69e   :  { %v2752_v30 = vand.u32 4294901760, %v10567_v29 }
 0x69f   :  { %2039 = vmin.xlane.f32.xlu0 %v10439_v17 }
 0x72c   :  { %v10444_v58 = vpop.xlane.xlu0 %2039 }
 0x72d   :  { %vm2043_vm1 = vcmp.eq.f32.partialorder %v10439_v17, %v10444_v58 }
 0x72e   :  { %v2044_v63 = vsel %vm2043_vm1, %v10442_v4, 128 }
 0x72f   :  { %v2046_v62 = vshra.s32 %v2044_v63, 16  ;;  %v2045_v8 = vand.u32 65535, %v2044_v63 }
 0x731   :  { %v2048_v13 = vcvt.s32.f32 %v2046_v62  ;;  %v2047_v19 = vcvt.s32.f32 %v2045_v8  ;;  %v10613_v62 = vld [vmem:[%s11853_s5 + $0xd0] sm:$0xff] }
 0x732   :  { %v2761_v8 = vand.u32 4294901760, %v10613_v62 }
 0x733   :  { %2049 = vmin.xlane.f32.xlu0 %v2048_v13 }
 0x7c0   :  { %v2050_v9 = vpop.xlane.xlu0 %2049 }
 0x7c1   :  { %vm2051_vm2 = vcmp.eq.f32.partialorder %v2048_v13, %v2050_v9  ;;  %v2056_v31 = vcvt.f32.s32 %v2050_v9  ;;  %v10618_v13 = vld [vmem:[%s11853_s5 + $0xd8] sm:$0xff] }
 0x7c2   :  { %v2052_v56 = vsel %vm2051_vm2, %v2047_v19, inf  ;;  %v2764_v9 = vand.u32 4294901760, %v10618_v13 }
 0x7c3   :  { %2053 = vmin.xlane.f32.xlu1 %v2052_v56  ;;  %v2057_v18 = vshll.u32 %v2056_v31, 16  ;;  %v10637_v56 = vld [vmem:[%s11853_s5 + $0xe0] sm:$0xff]  ;;  %v10642_v31 = vld [vmem:[%s11853_s5 + $0xe8] sm:$0xff] }
 0x7c4   :  { %v10628_v19 = vpack.c.bf16 %v2764_v9, %v2761_v8 }
 0x850   :  { %v2054_v36 = vpop.xlane.xlu1 %2053 }
 0x851   :  { %v2055_v40 = vcvt.f32.s32 %v2054_v36  ;;  %v2767_v36 = vand.u32 4294901760, %v10637_v56 }
 0x853   :  { %v10449_v21 = vadd.s32 %v2057_v18, %v2055_v40  ;;  %v2770_v18 = vand.u32 4294901760, %v10642_v31 }
 0x855   :  { %vm2059_vm3 = vcmp.eq.s32.totalorder %v10442_v4, %v10449_v21  ;;  %v10652_v40 = vpack.c.bf16 %v2770_v18, %v2767_v36 }
 0x856   :  { %v5413_v44 = vsel %vm2059_vm3, 1.0, %v11892_v54 }
 0x857   :  { %v10457_v12 = vsub.f32 %v5413_v44, %v5413_v44 }
 0x859   :  { %v2145_v35 = vand.u32 4294901760, %v10457_v12 }
 0x85b   :  { %v2146_v60 = vsub.f32 %v10457_v12, %v2145_v35 }
 0x85d   :  { %v2147_v6 = vand.u32 4294901760, %v2146_v60 }
 0x85f   :  { %6920 = vmatmul.mubr.f32.vlgmr.msra.gmra.mrb[2].mxu1 %v2147_v6 }
 0x860   :  { %8395 = vmatpush3.bf16.msra.mxu1 %v10144_v33  ;;  %6954 = vmatprep.mubr.msk.f32.mxu1 %vm9193_vm0, %v11892_v54  ;;  %v11871_v33 = vmov 1.0  }
 0x861   :  { %8396 = vmatprep.subr.bf16.mxu1 %v9192_v2 }
 0x864   :  { %8398 = vmatpush3.bf16.msra.mxu1 %v10162_v34  ;;  %v10488_v34 = vld [vmem:[%s11853_s5 + $0x80] sm:$0xff] }
 0x865   :  { %8399 = vmatprep.subr.bf16.mxu1 %v9192_v2 }
 0x868   :  { %8401 = vmatpush3.bf16.msra.mxu1 %v10194_v28  ;;  %v10493_v28 = vld [vmem:[%s11853_s5 + $0x88] sm:$0xff] }
 0x869   :  { %8402 = vmatprep.subr.bf16.mxu1 %v9192_v2 }
 0x86c   :  { %8404 = vmatpush3.bf16.msra.mxu1 %v10212_v0  ;;  %v2731_v0 = vand.u32 4294901760, %v10488_v34 }
 0x86d   :  { %8405 = vmatprep.subr.bf16.mxu1 %v9192_v2 }
 0x870   :  { %8407 = vmatpush3.bf16.msra.mxu1 %v10228_v53  ;;  %v2734_v53 = vand.u32 4294901760, %v10493_v28 }
 0x871   :  { %8408 = vmatprep.subr.bf16.mxu1 %v9192_v2 }
 0x872   :  { %v10505_v51 = vpack.c.bf16 %v2734_v53, %v2731_v0 }
 0x874   :  { %8410 = vmatpush3.bf16.msra.mxu1 %v10250_v24  ;;  %8659 = vmatpush3.bf16.msra.mxu0 %v10505_v51  ;;  %v10519_v24 = vld [vmem:[%s11853_s5 + $0x98] sm:$0xff] }
 0x875   :  { %8411 = vmatprep.subr.bf16.mxu1 %v9192_v2  ;;  %8660 = vmatprep.subr.bf16.mxu0 %v9192_v2  ;;  %v2740_v20 = vand.u32 4294901760, %v10519_v24 }
 0x878   :  { %8413 = vmatpush3.bf16.msra.mxu1 %v10262_v57  ;;  %v10529_v57 = vpack.c.bf16 %v2740_v20, %v2737_v47 }
 0x879   :  { %8414 = vmatprep.subr.bf16.mxu1 %v9192_v2 }
 0x87a   :  { %8662 = vmatpush3.bf16.msra.mxu0 %v10529_v57 }
 0x87b   :  { %8663 = vmatprep.subr.bf16.mxu0 %v9192_v2 }
 0x87c   :  { %8416 = vmatpush3.bf16.msra.mxu1 %v10272_v27  ;;  %v10538_v27 = vld [vmem:[%s11853_s5 + $0xa0] sm:$0xff] }
 0x87d   :  { %8417 = vmatprep.subr.bf16.mxu1 %v9192_v2 }
 0x87f   :  { %6955 = vmatmul.mubr.msk.f32.vlgmr.msra.gmra.mrb[2].mxu1 %vm2059_vm3, %v11871_v33 }
 0x880   :  { %8419 = vmatpush3.bf16.msra.mxu1 %v10278_v37  ;;  %6989 = vmatprep.mubr.msk.f32.mxu1 %vm9193_vm0, %v11892_v54  ;;  %v10543_v37 = vld [vmem:[%s11853_s5 + $0xa8] sm:$0xff] }
 0x881   :  { %8420 = vmatprep.subr.bf16.mxu1 %v9192_v2 }
 0x884   :  { %8422 = vmatpush3.bf16.msra.mxu1 %v10287_v48  ;;  %v2743_v48 = vand.u32 4294901760, %v10538_v27 }
 0x885   :  { %8423 = vmatprep.subr.bf16.mxu1 %v9192_v2 }
 0x888   :  { %8425 = vmatpush3.bf16.msra.mxu1 %v10293_v59  ;;  %v2746_v59 = vand.u32 4294901760, %v10543_v37 }
 0x889   :  { %8426 = vmatprep.subr.bf16.mxu1 %v9192_v2 }
 0x88c   :  { %8428 = vmatpush3.bf16.msra.mxu1 %v10299_v26  ;;  %v10553_v26 = vpack.c.bf16 %v2746_v59, %v2743_v48 }
 0x88d   :  { %8429 = vmatprep.subr.bf16.mxu1 %v9192_v2 }
 0x88e   :  { %8665 = vmatpush3.bf16.msra.mxu0 %v10553_v26 }
 0x88f   :  { %8666 = vmatprep.subr.bf16.mxu0 %v9192_v2 }
 0x890   :  { %8431 = vmatpush3.bf16.msra.mxu1 %v10305_v50  ;;  %v10562_v50 = vld [vmem:[%s11853_s5 + $0xb0] sm:$0xff] }
 0x891   :  { %8432 = vmatprep.subr.bf16.mxu1 %v9192_v2  ;;  %v2749_v38 = vand.u32 4294901760, %v10562_v50 }
 0x894   :  { %8434 = vmatpush3.bf16.msra.mxu1 %v10311_v52  ;;  %v10577_v52 = vpack.c.bf16 %v2752_v30, %v2749_v38 }
 0x895   :  { %8435 = vmatprep.subr.bf16.mxu1 %v9192_v2 }
 0x896   :  { %8668 = vmatpush3.bf16.msra.mxu0 %v10577_v52 }
 0x897   :  { %8669 = vmatprep.subr.bf16.mxu0 %v9192_v2 }
 0x898   :  { %8437 = vmatpush3.bf16.msra.mxu1 %v10317_v10  ;;  %v10586_v10 = vld [vmem:[%s11853_s5 + $0xc0] sm:$0xff] }
 0x899   :  { %8438 = vmatprep.subr.bf16.mxu1 %v9192_v2  ;;  %v2755_v1 = vand.u32 4294901760, %v10586_v10 }
 0x89c   :  { %8440 = vmatpush3.bf16.msra.mxu1 %v10323_v39  ;;  %v2758_v39 = vand.u32 4294901760, %v10591_v42 }
 0x89d   :  { %8441 = vmatprep.subr.bf16.mxu1 %v9192_v2 }
 0x89e   :  { %v10604_v63 = vpack.c.bf16 %v2758_v39, %v2755_v1 }
 0x89f   :  { %6990 = vmatmul.mubr.f32.vlgmr.msra.gmra.mrb[2].mxu1 %v10457_v12 }
 0x8a0   :  { %8443 = vmatpush3.bf16.msra.mxu1 %v9891_v49  ;;  %7024 = vmatprep.mubr.msk.f32.mxu1 %vm9193_vm0, %v11892_v54 }
 0x8a1   :  { %8444 = vmatprep.subr.bf16.mxu1 %v9192_v2  ;;  %8671 = vmatpush3.bf16.msra.mxu0 %v10604_v63 }
 0x8a2   :  { %8672 = vmatprep.subr.bf16.mxu0 %v9192_v2 }
 0x8a4   :  { %8446 = vmatpush3.bf16.msra.mxu1 %v9905_v15 }
 0x8a5   :  { %8447 = vmatprep.subr.bf16.mxu1 %v9192_v2  ;;  %8674 = vmatpush3.bf16.msra.mxu0 %v10628_v19 }
 0x8a6   :  { %8675 = vmatprep.subr.bf16.mxu0 %v9192_v2 }
 0x8a8   :  { %8449 = vmatpush3.bf16.msra.mxu1 %v9930_v11 }
 0x8a9   :  { %8450 = vmatprep.subr.bf16.mxu1 %v9192_v2  ;;  %8677 = vmatpush3.bf16.msra.mxu0 %v10652_v40 }
 0x8aa   :  { %8678 = vmatprep.subr.bf16.mxu0 %v9192_v2 }
 0x8ac   :  { %8452 = vmatpush3.bf16.msra.mxu1 %v9955_v61 }
 0x8ad   :  { %8453 = vmatprep.subr.bf16.mxu1 %v9192_v2 }
 0x8b0   :  { %8455 = vmatpush3.bf16.msra.mxu1 %v9980_v41 }
 0x8b1   :  { %8456 = vmatprep.subr.bf16.mxu1 %v9192_v2 }
 0x8b4   :  { %8458 = vmatpush3.bf16.msra.mxu1 %v10005_v7 }
 0x8b5   :  { %8459 = vmatprep.subr.bf16.mxu1 %v9192_v2 }
 0x8b8   :  { %8461 = vmatpush3.bf16.msra.mxu1 %v10030_v22 }
 0x8b9   :  { %8462 = vmatprep.subr.bf16.mxu1 %v9192_v2 }
 0x8bc   :  { %8464 = vmatpush3.bf16.msra.mxu1 %v10082_v25 }
 0x8bd   :  { %8465 = vmatprep.subr.bf16.mxu1 %v9192_v2 }
 0x8bf   :  { %7025 = vmatmul.mubr.f32.vlgmr.msra.gmra.mrb[2].mxu1 %v2145_v35 }
 0x8c0   :  { %8467 = vmatpush3.bf16.msra.mxu1 %v10350_v32  ;;  %7059 = vmatprep.mubr.msk.f32.mxu1 %vm9193_vm0, %v11892_v54  ;;  %v10748_v32 = vsub.f32 %v10493_v28, %v2734_v53 }
 0x8c1   :  { %8468 = vmatprep.subr.bf16.mxu1 %v9192_v2 }
 0x8c4   :  { %8470 = vmatpush3.bf16.msra.mxu1 %v10362_v5 }
 0x8c5   :  { %8471 = vmatprep.subr.bf16.mxu1 %v9192_v2 }
 0x8c8   :  { %8473 = vmatpush3.bf16.msra.mxu1 %v10370_v46  ;;  %v2831_v46 = vand.u32 4294901760, %v10748_v32 }
 0x8c9   :  { %8474 = vmatprep.subr.bf16.mxu1 %v9192_v2 }
 0x8ca   :  { %v2832_v12 = vsub.f32 %v10748_v32, %v2831_v46 }
 0x8cc   :  { %8476 = vmatpush3.bf16.msra.mxu1 %v10378_v43 }
 0x8cd   :  { %8477 = vmatprep.subr.bf16.mxu1 %v9192_v2 }
 0x8d0   :  { %8479 = vmatpush3.bf16.msra.mxu1 %v10386_v55 }
 0x8d1   :  { %8480 = vmatprep.subr.bf16.mxu1 %v9192_v2 }
 0x8d4   :  { %8482 = vmatpush3.bf16.msra.mxu1 %v10394_v45 }
 0x8d5   :  { %8483 = vmatprep.subr.bf16.mxu1 %v9192_v2 }
 0x8d8   :  { %8485 = vmatpush3.bf16.msra.mxu1 %v10402_v14  ;;  %v10761_v14 = vsub.f32 %v10514_v16, %v2737_v47 }
 0x8d9   :  { %8486 = vmatprep.subr.bf16.mxu1 %v9192_v2 }
 0x8da   :  { %v2838_v6 = vand.u32 4294901760, %v10761_v14 }
 0x8dc   :  { %8488 = vmatpush3.bf16.msra.mxu1 %v10410_v23  ;;  %v10766_v23 = vsub.f32 %v10519_v24, %v2740_v20  ;;  %v2839_v24 = vsub.f32 %v10761_v14, %v2838_v6 }
 0x8dd   :  { %8489 = vmatprep.subr.bf16.mxu1 %v9192_v2 }
 0x8df   :  { %7060 = vmatmul.mubr.msk.f32.vlgmr.msra.gmra.mrb[2].mxu1 %vm2059_vm3, %v11871_v33 }
 0x8e0   :  { %8491 = vmatpush3.bf16.msra.mxu1 %v9891_v49  ;;  %7094 = vmatprep.mubr.msk.f32.mxu1 %vm9193_vm0, %v11892_v54  ;;  %v5431_v49 = vld [vmem:[%s11853_s5 + $0xf0] sm:$0xff] }
 0x8e1   :  { %8492 = vmatprep.subr.bf16.mxu1 %v9192_v2 }
 0x8e4   :  { %8494 = vmatpush3.bf16.msra.mxu1 %v9905_v15  ;;  %v5432_v15 = vld [vmem:[%s11853_s5 + $0xf8] sm:$0xff] }
 0x8e5   :  { %8495 = vmatprep.subr.bf16.mxu1 %v9192_v2 }
 0x8e8   :  { %8497 = vmatpush3.bf16.msra.mxu1 %v9930_v11  ;;  %v2773_v11 = vand.u32 4294901760, %v5431_v49 }
 0x8e9   :  { %8498 = vmatprep.subr.bf16.mxu1 %v9192_v2 }
 0x8ec   :  { %8500 = vmatpush3.bf16.msra.mxu1 %v9955_v61  ;;  %v2776_v61 = vand.u32 4294901760, %v5432_v15 }
 0x8ed   :  { %8501 = vmatprep.subr.bf16.mxu1 %v9192_v2 }
 0x8f0   :  { %8503 = vmatpush3.bf16.msra.mxu1 %v9980_v41  ;;  %v10730_v41 = vpack.c.bf16 %v2776_v61, %v2773_v11 }
 0x8f1   :  { %8504 = vmatprep.subr.bf16.mxu1 %v9192_v2 }
 0x8f2   :  { %8680 = vmatpush3.bf16.msra.mxu0 %v10730_v41 }
 0x8f3   :  { %8681 = vmatprep.subr.bf16.mxu0 %v9192_v2 }
 0x8f4   :  { %8506 = vmatpush3.bf16.msra.mxu1 %v10005_v7  ;;  %v10736_v7 = vsub.f32 %v5431_v49, %v2773_v11  ;;  %v10798_v49 = vsub.f32 %v10538_v27, %v2743_v48 }
 0x8f5   :  { %8507 = vmatprep.subr.bf16.mxu1 %v9192_v2 }
 0x8f8   :  { %8509 = vmatpush3.bf16.msra.mxu1 %v10030_v22  ;;  %v10738_v22 = vsub.f32 %v5432_v15, %v2776_v61  ;;  %v10803_v15 = vsub.f32 %v10543_v37, %v2746_v59  ;;  %v2840_v61 = vand.u32 4294901760, %v2839_v24  ;;  %v10822_v59 = vsub.f32 %v10562_v50, %v2749_v38 }
 0x8f9   :  { %8510 = vmatprep.subr.bf16.mxu1 %v9192_v2  ;;  %v10836_v50 = vsub.f32 %v10586_v10, %v2755_v1 }
 0x8fa   :  { %v2866_v24 = vand.u32 4294901760, %v10822_v59 }
 0x8fc   :  { %8512 = vmatpush3.bf16.msra.mxu1 %v10082_v25  ;;  %v10743_v25 = vsub.f32 %v10488_v34, %v2731_v0  ;;  %v2845_v34 = vand.u32 4294901760, %v10766_v23  ;;  %v2833_v0 = vand.u32 4294901760, %v2832_v12  ;;  %v2859_v12 = vand.u32 4294901760, %v10803_v15 }
 0x8fd   :  { %8513 = vmatprep.subr.bf16.mxu1 %v9192_v2 }
 0x8fe   :  { %v2824_v5 = vand.u32 4294901760, %v10743_v25  ;;  %v2846_v47 = vsub.f32 %v10766_v23, %v2845_v34  ;;  %v2860_v48 = vsub.f32 %v10803_v15, %v2859_v12 }
 0x8ff   :  { %7095 = vmatmul.mubr.msk.f32.vlgmr.msra.gmra.mrb[2].mxu1 %vm2059_vm3, %v11871_v33 }
 0x900   :  { %7129 = vmatprep.mubr.msk.f32.mxu1 %vm9193_vm0, %v11892_v54  ;;  %v2825_v44 = vsub.f32 %v10743_v25, %v2824_v5 }
 0x902   :  { %v2826_v28 = vand.u32 4294901760, %v2825_v44  ;;  %v2852_v44 = vand.u32 4294901760, %v10798_v49 }
 0x904   :  { %v10793_v20 = vpack.c.bf16 %v2833_v0, %v2826_v28  ;;  %v2853_v37 = vsub.f32 %v10798_v49, %v2852_v44  ;;  %v10827_v28 = vsub.f32 %v10567_v29, %v2752_v30  ;;  %v10841_v29 = vsub.f32 %v10591_v42, %v2758_v39 }
 0x905   :  { %8515 = vmatpush3.bf16.xpose.msra.mxu1 %v10505_v51  ;;  %v2867_v30 = vsub.f32 %v10822_v59, %v2866_v24 }
 0x906   :  { %8516 = vmatprep.subr.bf16.mxu1 %v9192_v2  ;;  %v2854_v0 = vand.u32 4294901760, %v2853_v37  ;;  %v2887_v10 = vand.u32 4294901760, %v10841_v29 }
 0x907   :  { %v2868_v1 = vand.u32 4294901760, %v2867_v30 }
 0x908   :  { %v2888_v39 = vsub.f32 %v10841_v29, %v2887_v10 }
 0x90a   :  { %v2889_v30 = vand.u32 4294901760, %v2888_v39 }
 0x90d   :  { %8518 = vmatpush3.bf16.xpose.msra.mxu1 %v10529_v57 }
 0x90e   :  { %8519 = vmatprep.subr.bf16.mxu1 %v9192_v2 }
 0x915   :  { %8521 = vmatpush3.bf16.xpose.msra.mxu1 %v10553_v26 }
 0x916   :  { %8522 = vmatprep.subr.bf16.mxu1 %v9192_v2 }
 0x91d   :  { %8524 = vmatpush3.bf16.xpose.msra.mxu1 %v10577_v52 }
 0x91e   :  { %8525 = vmatprep.subr.bf16.mxu1 %v9192_v2 }
 0x925   :  { %8527 = vmatpush3.bf16.xpose.msra.mxu1 %v10604_v63 }
 0x926   :  { %8528 = vmatprep.subr.bf16.mxu1 %v9192_v2 }
 0x92d   :  { %8530 = vmatpush3.bf16.xpose.msra.mxu1 %v10628_v19 }
 0x92e   :  { %8531 = vmatprep.subr.bf16.mxu1 %v9192_v2 }
 0x935   :  { %8533 = vmatpush3.bf16.xpose.msra.mxu1 %v10652_v40 }
 0x936   :  { %8534 = vmatprep.subr.bf16.mxu1 %v9192_v2 }
 0x93d   :  { %8536 = vmatpush3.bf16.xpose.msra.mxu1 %v10730_v41 }
 0x93e   :  { %8537 = vmatprep.subr.bf16.mxu1 %v9192_v2 }
 0x9d2   :  { %v10752_v43 = vpop.f32.mrb[2].mxu1 }
 0x9d3   :  { %v10756_v55 = vsub.f32 %v10107_v3, %v10752_v43  ;;  %v7096_v45 = vpop.f32.mrb[3].mxu1 }
 0x9d4   :  { %v2847_v45 = vand.u32 4294901760, %v2846_v47  ;;  %v2873_v47 = vand.u32 4294901760, %v10827_v28 }
 0x9d5   :  { %v10775_v35 = vand.u32 4294901760, %v10756_v55 }
 0x9d6   :  { %v10811_v27 = vpack.c.bf16 %v2847_v45, %v2840_v61  ;;  %v2880_v61 = vand.u32 4294901760, %v10836_v50 }
 0x9d7   :  { %v10779_v60 = vsub.f32 %v10756_v55, %v10775_v35 }
 0x9d8   :  { %v2881_v42 = vsub.f32 %v10836_v50, %v2880_v61 }
 0x9d9   :  { %v2813_v53 = vand.u32 4294901760, %v10779_v60 }
 0x9db   :  { %v2814_v16 = vsub.f32 %v10779_v60, %v2813_v53 }
 0x9dd   :  { %v2815_v11 = vand.u32 4294901760, %v2814_v16  ;;  %v2861_v16 = vand.u32 4294901760, %v2860_v48  ;;  %v10866_v48 = vsub.f32 %v10613_v62, %v2761_v8  ;;  %v10888_v8 = vsub.f32 %v10637_v56, %v2767_v36 }
 0x9df   :  { %7130 = vmatmul.mubr.f32.vlgmr.msra.gmra.mrb[4].mxu1 %v2815_v11  ;;  %v10843_v38 = vpack.c.bf16 %v2861_v16, %v2854_v0  ;;  %v2874_v11 = vsub.f32 %v10827_v28, %v2873_v47  ;;  %v10871_v0 = vsub.f32 %v10618_v13, %v2764_v9  ;;  %v2882_v16 = vand.u32 4294901760, %v2881_v42 }
 0x9e0   :  { %8539 = vmatpush3.bf16.xpose.msra.mxu1 %v10793_v20  ;;  %7164 = vmatprep.mubr.msk.f32.mxu1 %vm9193_vm0, %v11892_v54  ;;  %v10893_v9 = vsub.f32 %v10642_v31, %v2770_v18  ;;  %v11874_v39 = vand.u32 4294901760, %v10888_v8 }
 0x9e1   :  { %8540 = vmatprep.subr.bf16.mxu1 %v9192_v2  ;;  %v2875_v45 = vand.u32 4294901760, %v2874_v11  ;;  %v11878_v11 = vand.u32 4294901760, %v10866_v48  ;;  %v11877_v33 = vand.u32 4294901760, %v10871_v0 }
 0x9e2   :  { %v2909_v56 = vsub.f32 %v10888_v8, %v11874_v39 }
 0x9e3   :  { %v10861_v37 = vpack.c.bf16 %v2875_v45, %v2868_v1  ;;  %v10877_v1 = vpack.c.bf16 %v2889_v30, %v2882_v16  ;;  %v2895_v62 = vsub.f32 %v10866_v48, %v11878_v11  ;;  %v2902_v13 = vsub.f32 %v10871_v0, %v11877_v33 }
 0x9e4   :  { %v11873_v16 = vand.u32 4294901760, %v10893_v9  ;;  %v2910_v36 = vand.u32 4294901760, %v2909_v56  ;;  %v10999_v33 = vpack.c.bf16 %v2831_v46, %v2824_v5  ;;  %v11011_v11 = vpack.c.bf16 %v2845_v34, %v2838_v6 }
 0x9e5   :  { %v2896_v45 = vand.u32 4294901760, %v2895_v62  ;;  %v2903_v42 = vand.u32 4294901760, %v2902_v13  ;;  %v11876_v62 = vand.u32 4294901760, %v10736_v7  ;;  %v11875_v13 = vand.u32 4294901760, %v10738_v22 }
 0x9e6   :  { %v2916_v31 = vsub.f32 %v10893_v9, %v11873_v16  ;;  %v11035_v5 = vpack.c.bf16 %v2887_v10, %v2880_v61  ;;  %v11893_v46 = vand.u32 4294901760, %v10866_v48  ;;  %v11896_v6 = vand.u32 4294901760, %v10893_v9 }
 0x9e7   :  { %v10899_v30 = vpack.c.bf16 %v2903_v42, %v2896_v45  ;;  %v2923_v42 = vsub.f32 %v10736_v7, %v11876_v62  ;;  %v2930_v16 = vsub.f32 %v10738_v22, %v11875_v13  ;;  %v10966_v13 = vpack.c.bf16 %v10893_v9, %v10888_v8 }
 0x9e8   :  { %8542 = vmatpush3.bf16.xpose.msra.mxu1 %v10811_v27  ;;  %v2917_v18 = vand.u32 4294901760, %v2916_v31  ;;  %v10972_v62 = vpack.c.bf16 %v10738_v22, %v10736_v7  ;;  %v4041_v9 = vmul.f32 %v10756_v55, %v10756_v55 }
 0x9e9   :  { %8543 = vmatprep.subr.bf16.mxu1 %v9192_v2  ;;  %v2924_v56 = vand.u32 4294901760, %v2923_v42  ;;  %v2931_v31 = vand.u32 4294901760, %v2930_v16  ;;  %v10936_v16 = vpack.c.bf16 %v10766_v23, %v10761_v14  ;;  %v10948_v42 = vpack.c.bf16 %v10827_v28, %v10822_v59 }
 0x9ea   :  { %v10911_v45 = vpack.c.bf16 %v2917_v18, %v2910_v36  ;;  %v10927_v36 = vpack.c.bf16 %v10748_v32, %v10743_v25  ;;  %v10942_v18 = vpack.c.bf16 %v10803_v15, %v10798_v49  ;;  %v11019_v25 = vpack.c.bf16 %v2859_v12, %v2852_v44 }
 0x9eb   :  { %v10921_v39 = vpack.c.bf16 %v2931_v31, %v2924_v56  ;;  %v10954_v56 = vpack.c.bf16 %v10841_v29, %v10836_v50  ;;  %v10960_v31 = vpack.c.bf16 %v10871_v0, %v10866_v48  ;;  %v11027_v32 = vpack.c.bf16 %v2873_v47, %v2866_v24 }
 0x9ec   :  { %v11894_v14 = vand.u32 4294901760, %v10871_v0  ;;  %v11898_v49 = vand.u32 4294901760, %v10738_v22 }
 0x9ee   :  { %v11043_v23 = vpack.c.bf16 %v11894_v14, %v11893_v46 }
 0x9f0   :  { %8545 = vmatpush3.bf16.xpose.msra.mxu1 %v10843_v38 }
 0x9f1   :  { %8546 = vmatprep.subr.bf16.mxu1 %v9192_v2 }
 0x9f8   :  { %8548 = vmatpush3.bf16.xpose.msra.mxu1 %v10861_v37 }
 0x9f9   :  { %8549 = vmatprep.subr.bf16.mxu1 %v9192_v2 }
 0xa00   :  { %8551 = vmatpush3.bf16.xpose.msra.mxu1 %v10877_v1 }
 0xa01   :  { %8552 = vmatprep.subr.bf16.mxu1 %v9192_v2 }
 0xa08   :  { %8554 = vmatpush3.bf16.xpose.msra.mxu1 %v10899_v30 }
 0xa09   :  { %8555 = vmatprep.subr.bf16.mxu1 %v9192_v2 }
 0xa10   :  { %8557 = vmatpush3.bf16.xpose.msra.mxu1 %v10911_v45 }
 0xa11   :  { %8558 = vmatprep.subr.bf16.mxu1 %v9192_v2 }
 0xa18   :  { %8560 = vmatpush3.bf16.xpose.msra.mxu1 %v10921_v39 }
 0xa19   :  { %8561 = vmatprep.subr.bf16.mxu1 %v9192_v2 }
 0xa1f   :  { %7165 = vmatmul.mubr.f32.vlgmr.msra.gmra.mrb[4].mxu1 %v10775_v35 }
 0xa20   :  { %8563 = vmatpush3.bf16.xpose.msra.mxu1 %v10927_v36  ;;  %7199 = vmatprep.mubr.msk.f32.mxu1 %vm9193_vm0, %v11892_v54 }
 0xa21   :  { %8564 = vmatprep.subr.bf16.mxu1 %v9192_v2 }
 0xa28   :  { %8566 = vmatpush3.bf16.xpose.msra.mxu1 %v10936_v16 }
 0xa29   :  { %8567 = vmatprep.subr.bf16.mxu1 %v9192_v2 }
 0xa30   :  { %8569 = vmatpush3.bf16.xpose.msra.mxu1 %v10942_v18 }
 0xa31   :  { %8570 = vmatprep.subr.bf16.mxu1 %v9192_v2 }
 0xa38   :  { %8572 = vmatpush3.bf16.xpose.msra.mxu1 %v10948_v42 }
 0xa39   :  { %8573 = vmatprep.subr.bf16.mxu1 %v9192_v2 }
 0xa40   :  { %8575 = vmatpush3.bf16.xpose.msra.mxu1 %v10954_v56 }
 0xa41   :  { %8576 = vmatprep.subr.bf16.mxu1 %v9192_v2 }
 0xa48   :  { %8578 = vmatpush3.bf16.xpose.msra.mxu1 %v10960_v31 }
 0xa49   :  { %8579 = vmatprep.subr.bf16.mxu1 %v9192_v2 }
 0xa50   :  { %8581 = vmatpush3.bf16.xpose.msra.mxu1 %v10966_v13 }
 0xa51   :  { %8582 = vmatprep.subr.bf16.mxu1 %v9192_v2 }
 0xa58   :  { %8584 = vmatpush3.bf16.xpose.msra.mxu1 %v10972_v62 }
 0xa59   :  { %8585 = vmatprep.subr.bf16.mxu1 %v9192_v2 }
 0xa5f   :  { %7200 = vmatmul.mubr.f32.vlgmr.msra.gmra.mrb[4].mxu1 %v10779_v60  ;;  %v11895_v60 = vand.u32 4294901760, %v10888_v8 }
 0xa60   :  { %8587 = vmatpush3.bf16.xpose.msra.mxu1 %v10505_v51  ;;  %7234 = vmatprep.mubr.msk.f32.mxu1 %vm9193_vm0, %v11892_v54 }
 0xa61   :  { %8588 = vmatprep.subr.bf16.mxu1 %v9192_v2  ;;  %v11051_v34 = vpack.c.bf16 %v11896_v6, %v11895_v60 }
 0xa68   :  { %8590 = vmatpush3.bf16.xpose.msra.mxu1 %v10529_v57 }
 0xa69   :  { %8591 = vmatprep.subr.bf16.mxu1 %v9192_v2 }
 0xa70   :  { %8593 = vmatpush3.bf16.xpose.msra.mxu1 %v10553_v26 }
 0xa71   :  { %8594 = vmatprep.subr.bf16.mxu1 %v9192_v2 }
 0xa78   :  { %8596 = vmatpush3.bf16.xpose.msra.mxu1 %v10577_v52 }
 0xa79   :  { %8597 = vmatprep.subr.bf16.mxu1 %v9192_v2 }
 0xa80   :  { %8599 = vmatpush3.bf16.xpose.msra.mxu1 %v10604_v63 }
 0xa81   :  { %8600 = vmatprep.subr.bf16.mxu1 %v9192_v2 }
 0xa88   :  { %8602 = vmatpush3.bf16.xpose.msra.mxu1 %v10628_v19 }
 0xa89   :  { %8603 = vmatprep.subr.bf16.mxu1 %v9192_v2 }
 0xa90   :  { %8605 = vmatpush3.bf16.xpose.msra.mxu1 %v10652_v40 }
 0xa91   :  { %8606 = vmatprep.subr.bf16.mxu1 %v9192_v2 }
 0xa98   :  { %8608 = vmatpush3.bf16.xpose.msra.mxu1 %v10730_v41 }
 0xa99   :  { %8609 = vmatprep.subr.bf16.mxu1 %v9192_v2 }
 0xa9f   :  { %7235 = vmatmul.mubr.f32.vlgmr.msra.gmra.mrb[4].mxu1 %v2813_v53  ;;  %v11897_v53 = vand.u32 4294901760, %v10736_v7  ;;  %v5434_v7 = vld [vmem:[%s11854_s6 + $0x1] ss:$0 sm:$0xff] }
 0xaa0   :  { %8611 = vmatpush3.bf16.xpose.msra.mxu1 %v10999_v33  ;;  %7269 = vmatprep.mubr.msk.f32.mxu1 %vm9193_vm0, %v11892_v54 }
 0xaa1   :  { %8612 = vmatprep.subr.bf16.mxu1 %v9192_v2  ;;  %v11059_v15 = vpack.c.bf16 %v11898_v49, %v11897_v53 }
 0xaa8   :  { %8614 = vmatpush3.bf16.xpose.msra.mxu1 %v11011_v11 }
 0xaa9   :  { %8615 = vmatprep.subr.bf16.mxu1 %v9192_v2 }
 0xab0   :  { %8617 = vmatpush3.bf16.xpose.msra.mxu1 %v11019_v25 }
 0xab1   :  { %8618 = vmatprep.subr.bf16.mxu1 %v9192_v2 }
 0xab8   :  { %8620 = vmatpush3.bf16.xpose.msra.mxu1 %v11027_v32 }
 0xab9   :  { %8621 = vmatprep.subr.bf16.mxu1 %v9192_v2 }
 0xac0   :  { %8623 = vmatpush3.bf16.xpose.msra.mxu1 %v11035_v5 }
 0xac1   :  { %8624 = vmatprep.subr.bf16.mxu1 %v9192_v2 }
 0xac8   :  { %8626 = vmatpush3.bf16.xpose.msra.mxu1 %v11043_v23 }
 0xac9   :  { %8627 = vmatprep.subr.bf16.mxu1 %v9192_v2 }
 0xad0   :  { %8629 = vmatpush3.bf16.xpose.msra.mxu1 %v11051_v34 }
 0xad1   :  { %8630 = vmatprep.subr.bf16.mxu1 %v9192_v2 }
 0xad8   :  { %8632 = vmatpush3.bf16.xpose.msra.mxu1 %v11059_v15 }
 0xad9   :  { %8633 = vmatprep.subr.bf16.mxu1 %v9192_v2 }
 0xadf   :  { %7270 = vmatmul.mubr.f32.vlgmr.msra.gmra.mrb[4].mxu1 %v10775_v35 }
 0xae0   :  { %8635 = vmatpush3.bf16.xpose.msra.mxu1 %v10505_v51  ;;  %7304 = vmatprep.mubr.msk.f32.mxu1 %vm9193_vm0, %v11892_v54 }
 0xae1   :  { %8636 = vmatprep.subr.bf16.mxu1 %v9192_v2 }
 0xae8   :  { %8638 = vmatpush3.bf16.xpose.msra.mxu1 %v10529_v57 }
 0xae9   :  { %8639 = vmatprep.subr.bf16.mxu1 %v9192_v2 }
 0xaf0   :  { %8641 = vmatpush3.bf16.xpose.msra.mxu1 %v10553_v26 }
 0xaf1   :  { %8642 = vmatprep.subr.bf16.mxu1 %v9192_v2 }
 0xaf8   :  { %8644 = vmatpush3.bf16.xpose.msra.mxu1 %v10577_v52 }
 0xaf9   :  { %8645 = vmatprep.subr.bf16.mxu1 %v9192_v2 }
 0xb00   :  { %8647 = vmatpush3.bf16.xpose.msra.mxu1 %v10604_v63 }
 0xb01   :  { %8648 = vmatprep.subr.bf16.mxu1 %v9192_v2 }
 0xb08   :  { %8650 = vmatpush3.bf16.xpose.msra.mxu1 %v10628_v19 }
 0xb09   :  { %8651 = vmatprep.subr.bf16.mxu1 %v9192_v2 }
 0xb10   :  { %8653 = vmatpush3.bf16.xpose.msra.mxu1 %v10652_v40 }
 0xb11   :  { %8654 = vmatprep.subr.bf16.mxu1 %v9192_v2 }
 0xb18   :  { %8656 = vmatpush3.bf16.xpose.msra.mxu1 %v10730_v41 }
 0xb19   :  { %8945 = vmatprep.subr.bf16.mxu1 %v9192_v2 }
 0xb1f   :  { %7305 = vmatmul.mubr.f32.vlgmr.msra.gmra.mrb[4].mxu1 %v10775_v35  ;;  %v2703_v35 = vmul.f32 %v10107_v3, %v10107_v3 }
 0xb20   :  { %7759 = vmatprep.mubr.msk.f32.mxu1 %vm9193_vm0, %v11892_v54 }
 0xbf2   :  { %v3367_v22 = vpop.f32.mrb[4].mxu1 }
 0xbf3   :  { %v3371_v44 = vmul.f32 2.0, %v3367_v22  ;;  %v7306_v12 = vpop.f32.mrb[5].mxu1 }
 0xbf5   :  { %v3378_v59 = vsub.f32 %v5434_v7, %v3371_v44 }
 0xbf7   :  { %3379 = vmin.xlane.f32.xlu1 %v3378_v59 }
 0xc84   :  { %v3380_v28 = vpop.xlane.xlu1 %3379 }
 0xc85   :  { %vm3381_vm4 = vcmp.eq.f32.partialorder %v3378_v59, %v3380_v28 }
 0xc86   :  { %v3382_v24 = vsel %vm3381_vm4, %v10442_v4, 128 }
 0xc87   :  { %v3384_v47 = vshra.s32 %v3382_v24, 16  ;;  %v3383_v29 = vand.u32 65535, %v3382_v24 }
 0xc89   :  { %v3386_v50 = vcvt.s32.f32 %v3384_v47  ;;  %v3385_v10 = vcvt.s32.f32 %v3383_v29 }
 0xc8b   :  { %3387 = vmin.xlane.f32.xlu0 %v3386_v50 }
 0xc8f   :  { %2704 = vadd.xlane.f32.xlu0 %v2703_v35  ;;  %v4067_v35 = vld [vmem:[%s11855_s7 + $0x68] sm:$0xff] }
 0xd18   :  { %v3388_v61 = vpop.xlane.xlu0 %3387 }
 0xd19   :  { %vm3389_vm5 = vcmp.eq.f32.partialorder %v3386_v50, %v3388_v61  ;;  %v3394_v46 = vcvt.f32.s32 %v3388_v61  ;;  %v4066_v50 = vld [vmem:[%s11855_s7 + $0x60] sm:$0xff] }
 0xd1a   :  { %v3390_v48 = vsel %vm3389_vm5, %v3385_v10, inf }
 0xd1b   :  { %3391 = vmin.xlane.f32.xlu1 %v3390_v48  ;;  %v3395_v14 = vshll.u32 %v3394_v46, 16  ;;  %v4114_v46 = vand.u32 4294901760, %v4066_v50 }
 0xd1c   :  { %v2705_v0 = vpop.xlane.xlu0 %2704 }
 0xd1d   :  { %v2706_v8 = vadd.f32 %v2705_v0, %v10439_v17  ;;  %v2708_v53 = vadd.f32 %v2705_v0, %v10444_v58 }
 0xd1f   :  { %2707 = vst [vmem:[%s11861_s13] sm:$0xff] %v2706_v8  ;;  %4042 = vadd.xlane.f32.xlu1 %v4041_v9 }
 0xda8   :  { %v3392_v3 = vpop.xlane.xlu1 %3391 }
 0xda9   :  { %v3393_v60 = vcvt.f32.s32 %v3392_v3  ;;  %v4117_v3 = vand.u32 4294901760, %v4067_v35 }
 0xdab   :  { %v11097_v6 = vadd.s32 %v3395_v14, %v3393_v60  ;;  %v11303_v14 = vsub.f32 %v4066_v50, %v4114_v46  ;;  %v11305_v60 = vsub.f32 %v4067_v35, %v4117_v3 }
 0xdac   :  { %v4043_v49 = vpop.xlane.xlu1 %4042 }
 0xdad   :  { %vm3397_vm8 = vcmp.eq.s32.totalorder %v10442_v4, %v11097_v6  ;;  %v4049_v17 = vsel %vm4048_vm6, %v10449_v21, %v11097_v6  ;;  %v4044_v55 = vadd.f32 %v4043_v49, %v3378_v59  ;;  %v4046_v7 = vadd.f32 %v4043_v49, %v3380_v28  ;;  %v4057_v4 = vld [vmem:[%s11855_s7 + $0x18] sm:$0xff] }
 0xdae   :  { %v5435_v22 = vsel %vm3397_vm8, 1.0, %v11892_v54  ;;  %4051 = vst.msk [vmem:[%s11860_s12] sm:$0xff] %vm4050_vm7, %v4049_v17  ;;  %v11315_v49 = vpack.c.bf16 %v4117_v3, %v4114_v46 }
 0xdaf   :  { %v3482_v44 = vsub.f32 %v5435_v22, %v5435_v22  ;;  %4045 = vst [vmem:[%s11861_s13 + $0x8] sm:$0xff] %v4044_v55  ;;  %v4052_v58 = vsel %vm4048_vm6, %v2708_v53, %v4046_v7  ;;  %v4068_v22 = vld [vmem:[%s11855_s7 + $0x70] sm:$0xff] }
 0xdb0   :  { %4053 = vst.msk [vmem:[%s11862_s14] sm:$0xff] %vm4050_vm7, %v4052_v58  ;;  %v4120_v58 = vand.u32 4294901760, %v4068_v22 }
 0xdb1   :  { %v3483_v21 = vand.u32 4294901760, %v3482_v44 }
 0xdb3   :  { %v3484_v12 = vsub.f32 %v3482_v44, %v3483_v21 }
 0xdb5   :  { %v3485_v59 = vand.u32 4294901760, %v3484_v12 }
 0xdb7   :  { %7340 = vmatmul.mubr.f32.vlgmr.msra.gmra.mrb[4].mxu0 %v3485_v59  ;;  %v11329_v59 = vsub.f32 %v4068_v22, %v4120_v58 }
 0xdb8   :  { %8683 = vmatpush3.bf16.msra.mxu0 %v10793_v20  ;;  %7374 = vmatprep.mubr.msk.f32.mxu0 %vm9193_vm0, %v11892_v54  ;;  %v11899_v20 = vmov 1.0  }
 0xdb9   :  { %8684 = vmatprep.subr.bf16.mxu0 %v9192_v2 }
 0xdbc   :  { %8686 = vmatpush3.bf16.msra.mxu0 %v10811_v27 }
 0xdbd   :  { %8687 = vmatprep.subr.bf16.mxu0 %v9192_v2 }
 0xdc0   :  { %8689 = vmatpush3.bf16.msra.mxu0 %v10843_v38 }
 0xdc1   :  { %8690 = vmatprep.subr.bf16.mxu0 %v9192_v2 }
 0xdc4   :  { %8692 = vmatpush3.bf16.msra.mxu0 %v10861_v37 }
 0xdc5   :  { %8693 = vmatprep.subr.bf16.mxu0 %v9192_v2 }
 0xdc8   :  { %8695 = vmatpush3.bf16.msra.mxu0 %v10877_v1 }
 0xdc9   :  { %8696 = vmatprep.subr.bf16.mxu0 %v9192_v2 }
 0xdcc   :  { %8698 = vmatpush3.bf16.msra.mxu0 %v10899_v30 }
 0xdcd   :  { %8699 = vmatprep.subr.bf16.mxu0 %v9192_v2 }
 0xdd0   :  { %8701 = vmatpush3.bf16.msra.mxu0 %v10911_v45 }
 0xdd1   :  { %8702 = vmatprep.subr.bf16.mxu0 %v9192_v2 }
 0xdd4   :  { %8704 = vmatpush3.bf16.msra.mxu0 %v10921_v39 }
 0xdd5   :  { %8705 = vmatprep.subr.bf16.mxu0 %v9192_v2 }
 0xdd7   :  { %7375 = vmatmul.mubr.msk.f32.vlgmr.msra.gmra.mrb[6].mxu0 %vm3397_vm8, %v11899_v20 }
 0xdd8   :  { %8707 = vmatpush3.bf16.msra.mxu0 %v10927_v36  ;;  %7409 = vmatprep.mubr.msk.f32.mxu0 %vm9193_vm0, %v11892_v54 }
 0xdd9   :  { %8708 = vmatprep.subr.bf16.mxu0 %v9192_v2 }
 0xddc   :  { %8710 = vmatpush3.bf16.msra.mxu0 %v10936_v16 }
 0xddd   :  { %8711 = vmatprep.subr.bf16.mxu0 %v9192_v2 }
 0xde0   :  { %8713 = vmatpush3.bf16.msra.mxu0 %v10942_v18 }
 0xde1   :  { %8714 = vmatprep.subr.bf16.mxu0 %v9192_v2 }
 0xde4   :  { %8716 = vmatpush3.bf16.msra.mxu0 %v10948_v42  ;;  %v4060_v42 = vld [vmem:[%s11855_s7 + $0x30] sm:$0xff] }
 0xde5   :  { %8717 = vmatprep.subr.bf16.mxu0 %v9192_v2 }
 0xde8   :  { %8719 = vmatpush3.bf16.msra.mxu0 %v10954_v56  ;;  %v4061_v56 = vld [vmem:[%s11855_s7 + $0x38] sm:$0xff] }
 0xde9   :  { %8720 = vmatprep.subr.bf16.mxu0 %v9192_v2 }
 0xdec   :  { %8722 = vmatpush3.bf16.msra.mxu0 %v10960_v31  ;;  %v4062_v31 = vld [vmem:[%s11855_s7 + $0x40] sm:$0xff] }
 0xded   :  { %8723 = vmatprep.subr.bf16.mxu0 %v9192_v2 }
 0xdf0   :  { %8725 = vmatpush3.bf16.msra.mxu0 %v10966_v13 }
 0xdf1   :  { %8726 = vmatprep.subr.bf16.mxu0 %v9192_v2 }
 0xdf4   :  { %8728 = vmatpush3.bf16.msra.mxu0 %v10972_v62 }
 0xdf5   :  { %8729 = vmatprep.subr.bf16.mxu0 %v9192_v2 }
 0xdf7   :  { %7410 = vmatmul.mubr.f32.vlgmr.msra.gmra.mrb[8].mxu0 %v3482_v44  ;;  %v4069_v44 = vld [vmem:[%s11855_s7 + $0x78] sm:$0xff] }
 0xdf8   :  { %8731 = vmatpush3.bf16.msra.mxu0 %v10505_v51  ;;  %7444 = vmatprep.mubr.msk.f32.mxu0 %vm9193_vm0, %v11892_v54 }
 0xdf9   :  { %8732 = vmatprep.subr.bf16.mxu0 %v9192_v2 }
 0xdfc   :  { %8734 = vmatpush3.bf16.msra.mxu0 %v10529_v57 }
 0xdfd   :  { %8735 = vmatprep.subr.bf16.mxu0 %v9192_v2 }
 0xe00   :  { %8737 = vmatpush3.bf16.msra.mxu0 %v10553_v26 }
 0xe01   :  { %8738 = vmatprep.subr.bf16.mxu0 %v9192_v2 }
 0xe04   :  { %8740 = vmatpush3.bf16.msra.mxu0 %v10577_v52 }
 0xe05   :  { %8741 = vmatprep.subr.bf16.mxu0 %v9192_v2 }
 0xe08   :  { %8743 = vmatpush3.bf16.msra.mxu0 %v10604_v63 }
 0xe09   :  { %8744 = vmatprep.subr.bf16.mxu0 %v9192_v2 }
 0xe0c   :  { %8746 = vmatpush3.bf16.msra.mxu0 %v10628_v19 }
 0xe0d   :  { %8747 = vmatprep.subr.bf16.mxu0 %v9192_v2 }
 0xe10   :  { %8749 = vmatpush3.bf16.msra.mxu0 %v10652_v40 }
 0xe11   :  { %8750 = vmatprep.subr.bf16.mxu0 %v9192_v2 }
 0xe14   :  { %8752 = vmatpush3.bf16.msra.mxu0 %v10730_v41 }
 0xe15   :  { %8753 = vmatprep.subr.bf16.mxu0 %v9192_v2 }
 0xe17   :  { %7445 = vmatmul.mubr.f32.vlgmr.msra.gmra.mrb[10].mxu0 %v3483_v21  ;;  %v4123_v21 = vand.u32 4294901760, %v4069_v44 }
 0xe18   :  { %8755 = vmatpush3.bf16.msra.mxu0 %v10999_v33  ;;  %7479 = vmatprep.mubr.msk.f32.mxu0 %vm9193_vm0, %v11892_v54  ;;  %v4054_v33 = vld [vmem:[%s11855_s7] sm:$0xff] }
 0xe19   :  { %8756 = vmatprep.subr.bf16.mxu0 %v9192_v2  ;;  %v11325_v12 = vpack.c.bf16 %v4123_v21, %v4120_v58 }
 0xe1c   :  { %8758 = vmatpush3.bf16.msra.mxu0 %v11011_v11 }
 0xe1d   :  { %8759 = vmatprep.subr.bf16.mxu0 %v9192_v2 }
 0xe20   :  { %8761 = vmatpush3.bf16.msra.mxu0 %v11019_v25  ;;  %v4096_v25 = vand.u32 4294901760, %v4060_v42 }
 0xe21   :  { %8762 = vmatprep.subr.bf16.mxu0 %v9192_v2 }
 0xe22   :  { %v11289_v61 = vsub.f32 %v4060_v42, %v4096_v25 }
 0xe24   :  { %8764 = vmatpush3.bf16.msra.mxu0 %v11027_v32  ;;  %v4099_v32 = vand.u32 4294901760, %v4061_v56 }
 0xe25   :  { %8765 = vmatprep.subr.bf16.mxu0 %v9192_v2 }
 0xe26   :  { %v11287_v29 = vpack.c.bf16 %v4099_v32, %v4096_v25  ;;  %v11291_v10 = vsub.f32 %v4061_v56, %v4099_v32 }
 0xe28   :  { %8767 = vmatpush3.bf16.msra.mxu0 %v11035_v5  ;;  %v4063_v5 = vld [vmem:[%s11855_s7 + $0x48] sm:$0xff] }
 0xe29   :  { %8768 = vmatprep.subr.bf16.mxu0 %v9192_v2  ;;  %v4105_v28 = vand.u32 4294901760, %v4063_v5 }
 0xe2b   :  { %v11295_v0 = vsub.f32 %v4063_v5, %v4105_v28 }
 0xe2c   :  { %8770 = vmatpush3.bf16.msra.mxu0 %v11043_v23  ;;  %v4102_v23 = vand.u32 4294901760, %v4062_v31 }
 0xe2d   :  { %8771 = vmatprep.subr.bf16.mxu0 %v9192_v2 }
 0xe2e   :  { %v11293_v48 = vsub.f32 %v4062_v31, %v4102_v23  ;;  %v11307_v6 = vpack.c.bf16 %v4105_v28, %v4102_v23 }
 0xe30   :  { %8773 = vmatpush3.bf16.msra.mxu0 %v11051_v34  ;;  %v4064_v34 = vld [vmem:[%s11855_s7 + $0x50] sm:$0xff] }
 0xe31   :  { %8774 = vmatprep.subr.bf16.mxu0 %v9192_v2  ;;  %v4108_v24 = vand.u32 4294901760, %v4064_v34 }
 0xe33   :  { %v11297_v8 = vsub.f32 %v4064_v34, %v4108_v24 }
 0xe34   :  { %8776 = vmatpush3.bf16.msra.mxu0 %v11059_v15  ;;  %v4065_v15 = vld [vmem:[%s11855_s7 + $0x58] sm:$0xff] }
 0xe35   :  { %8777 = vmatprep.subr.bf16.mxu0 %v9192_v2  ;;  %v4111_v47 = vand.u32 4294901760, %v4065_v15 }
 0xe37   :  { %7480 = vmatmul.mubr.msk.f32.vlgmr.msra.gmra.mrb[12].mxu0 %vm3397_vm8, %v11899_v20  ;;  %v11300_v9 = vsub.f32 %v4065_v15, %v4111_v47  ;;  %v11311_v53 = vpack.c.bf16 %v4111_v47, %v4108_v24 }
 0xe38   :  { %8779 = vmatpush3.bf16.msra.mxu0 %v10505_v51  ;;  %7514 = vmatprep.mubr.msk.f32.mxu0 %vm9193_vm0, %v11892_v54  ;;  %v4055_v51 = vld [vmem:[%s11855_s7 + $0x8] sm:$0xff] }
 0xe39   :  { %8780 = vmatprep.subr.bf16.mxu0 %v9192_v2 }
 0xe3c   :  { %8782 = vmatpush3.bf16.msra.mxu0 %v10529_v57  ;;  %v4056_v57 = vld [vmem:[%s11855_s7 + $0x10] sm:$0xff] }
 0xe3d   :  { %8783 = vmatprep.subr.bf16.mxu0 %v9192_v2 }
 0xe40   :  { %8785 = vmatpush3.bf16.msra.mxu0 %v10553_v26  ;;  %v4078_v26 = vand.u32 4294901760, %v4054_v33 }
 0xe41   :  { %8786 = vmatprep.subr.bf16.mxu0 %v9192_v2 }
 0xe42   :  { %v11241_v11 = vsub.f32 %v4054_v33, %v4078_v26 }
 0xe44   :  { %8788 = vmatpush3.bf16.msra.mxu0 %v10577_v52  ;;  %v4081_v52 = vand.u32 4294901760, %v4055_v51 }
 0xe45   :  { %8789 = vmatprep.subr.bf16.mxu0 %v9192_v2 }
 0xe46   :  { %v11239_v37 = vpack.c.bf16 %v4081_v52, %v4078_v26  ;;  %v11243_v1 = vsub.f32 %v4055_v51, %v4081_v52 }
 0xe48   :  { %8791 = vmatpush3.bf16.msra.mxu0 %v10604_v63  ;;  %v4084_v63 = vand.u32 4294901760, %v4056_v57 }
 0xe49   :  { %8792 = vmatprep.subr.bf16.mxu0 %v9192_v2 }
 0xe4a   :  { %v11245_v39 = vsub.f32 %v4056_v57, %v4084_v63 }
 0xe4c   :  { %8794 = vmatpush3.bf16.msra.mxu0 %v10628_v19  ;;  %v4058_v19 = vld [vmem:[%s11855_s7 + $0x20] sm:$0xff]  ;;  %v4185_v34 = vand.u32 4294901760, %v11245_v39 }
 0xe4d   :  { %8795 = vmatprep.subr.bf16.mxu0 %v9192_v2  ;;  %v4090_v27 = vand.u32 4294901760, %v4058_v19 }
 0xe4e   :  { %v4186_v47 = vsub.f32 %v11245_v39, %v4185_v34 }
 0xe4f   :  { %v11249_v62 = vsub.f32 %v4058_v19, %v4090_v27 }
 0xe50   :  { %8797 = vmatpush3.bf16.msra.mxu0 %v10652_v40  ;;  %v4059_v40 = vld [vmem:[%s11855_s7 + $0x28] sm:$0xff]  ;;  %v4187_v46 = vand.u32 4294901760, %v4186_v47 }
 0xe51   :  { %8798 = vmatprep.subr.bf16.mxu0 %v9192_v2  ;;  %v4093_v38 = vand.u32 4294901760, %v4059_v40 }
 0xe53   :  { %v11252_v13 = vsub.f32 %v4059_v40, %v4093_v38  ;;  %v11259_v36 = vpack.c.bf16 %v4093_v38, %v4090_v27  ;;  %v4171_v27 = vand.u32 4294901760, %v11241_v11  ;;  %v4178_v38 = vand.u32 4294901760, %v11243_v1 }
 0xe54   :  { %8800 = vmatpush3.bf16.msra.mxu0 %v10730_v41  ;;  %v4087_v41 = vand.u32 4294901760, %v4057_v4 }
 0xe55   :  { %8801 = vmatprep.subr.bf16.mxu0 %v9192_v2  ;;  %v4172_v56 = vsub.f32 %v11241_v11, %v4171_v27  ;;  %v4179_v31 = vsub.f32 %v11243_v1, %v4178_v38 }
 0xe56   :  { %v11247_v30 = vsub.f32 %v4057_v4, %v4087_v41  ;;  %v11255_v45 = vpack.c.bf16 %v4087_v41, %v4084_v63 }
 0xe57   :  { %7515 = vmatmul.mubr.msk.f32.vlgmr.msra.gmra.mrb[14].mxu0 %vm3397_vm8, %v11899_v20  ;;  %v11331_v20 = vsub.f32 %v4069_v44, %v4123_v21  ;;  %v4173_v5 = vand.u32 4294901760, %v4172_v56  ;;  %v4180_v23 = vand.u32 4294901760, %v4179_v31  ;;  %v11884_v31 = vand.u32 4294901760, %v11297_v8 }
 0xe58   :  { %7549 = vmatprep.mubr.msk.f32.mxu0 %vm9193_vm0, %v11892_v54  ;;  %v4192_v15 = vand.u32 4294901760, %v11247_v30 }
 0xe59   :  { %v8826_v24 = vpack.c.bf16 %v4180_v23, %v4173_v5  ;;  %v11883_v5 = vand.u32 4294901760, %v11300_v9 }
 0xe5a   :  { %v4193_v50 = vsub.f32 %v11247_v30, %v4192_v15 }
 0xe5c   :  { %v4194_v3 = vand.u32 4294901760, %v4193_v50 }
 0xe5d   :  { %8803 = vmatpush3.bf16.xpose.msra.mxu0 %v11239_v37 }
 0xe5e   :  { %8804 = vmatprep.subr.bf16.mxu0 %v9192_v2 }
 0xe65   :  { %8806 = vmatpush3.bf16.xpose.msra.mxu0 %v11255_v45 }
 0xe66   :  { %8807 = vmatprep.subr.bf16.mxu0 %v9192_v2 }
 0xe6d   :  { %8809 = vmatpush3.bf16.xpose.msra.mxu0 %v11259_v36 }
 0xe6e   :  { %8810 = vmatprep.subr.bf16.mxu0 %v9192_v2 }
 0xe75   :  { %8812 = vmatpush3.bf16.xpose.msra.mxu0 %v11287_v29 }
 0xe76   :  { %8813 = vmatprep.subr.bf16.mxu0 %v9192_v2 }
 0xe7d   :  { %8815 = vmatpush3.bf16.xpose.msra.mxu0 %v11307_v6 }
 0xe7e   :  { %8816 = vmatprep.subr.bf16.mxu0 %v9192_v2 }
 0xe85   :  { %8818 = vmatpush3.bf16.xpose.msra.mxu0 %v11311_v53 }
 0xe86   :  { %8819 = vmatprep.subr.bf16.mxu0 %v9192_v2 }
 0xe8a   :  { %v3487_v16 = vpop.f32.mrb[4].mxu0 }
 0xe8b   :  { %v7341_v18 = vpop.f32.mrb[5].mxu0 }
 0xe8d   :  { %8821 = vmatpush3.bf16.xpose.msra.mxu0 %v11315_v49 }
 0xe8e   :  { %8822 = vmatprep.subr.bf16.mxu0 %v9192_v2 }
 0xe95   :  { %8824 = vmatpush3.bf16.xpose.msra.mxu0 %v11325_v12 }
 0xe96   :  { %8825 = vmatprep.subr.bf16.mxu0 %v9192_v2 }
 0xeaa   :  { %v3638_v17 = vpop.f32.mrb[6].mxu0 }
 0xeab   :  { %v3639_v55 = vadd.f32 %v3638_v17, %v3487_v16  ;;  %v7376_v7 = vpop.f32.mrb[7].mxu0  ;;  %v4199_v17 = vand.u32 4294901760, %v11249_v62 }
 0xeac   :  { %v8829_v7 = vpack.c.bf16 %v4194_v3, %v4187_v46  ;;  %v11881_v46 = vand.u32 4294901760, %v11305_v60 }
 0xead   :  { %v4200_v22 = vsub.f32 %v11249_v62, %v4199_v17 }
 0xeaf   :  { %v4201_v58 = vand.u32 4294901760, %v4200_v22  ;;  %v4263_v22 = vsub.f32 %v11305_v60, %v11881_v46 }
 0xeca   :  { %v3742_v33 = vpop.f32.mrb[8].mxu0 }
 0xecb   :  { %v3743_v51 = vadd.f32 %v3742_v33, %v3639_v55  ;;  %v7411_v57 = vpop.f32.mrb[9].mxu0  ;;  %v4206_v55 = vand.u32 4294901760, %v11252_v13  ;;  %v4213_v33 = vand.u32 4294901760, %v11289_v61 }
 0xecd   :  { %v4207_v44 = vsub.f32 %v11252_v13, %v4206_v55 }
 0xecf   :  { %v4208_v21 = vand.u32 4294901760, %v4207_v44 }
 0xed1   :  { %v8832_v57 = vpack.c.bf16 %v4208_v21, %v4201_v58  ;;  %v4264_v58 = vand.u32 4294901760, %v4263_v22  ;;  %v11880_v21 = vand.u32 4294901760, %v11329_v59  ;;  %v4720_v22 = vld [vmem:[%s11857_s9 + $0x8] sm:$0xff] }
 0xeea   :  { %v3831_v26 = vpop.f32.mrb[10].mxu0 }
 0xeeb   :  { %v3832_v52 = vadd.f32 %v3831_v26, %v3743_v51  ;;  %v7446_v4 = vpop.f32.mrb[11].mxu0  ;;  %v4220_v51 = vand.u32 4294901760, %v11291_v10  ;;  %v4214_v26 = vsub.f32 %v11289_v61, %v4213_v33 }
 0xeed   :  { %v4215_v4 = vand.u32 4294901760, %v4214_v26 }
 0xf0a   :  { %v3950_v63 = vpop.f32.mrb[12].mxu0 }
 0xf0b   :  { %v3951_v19 = vadd.f32 %v3950_v63, %v3832_v52  ;;  %v7481_v40 = vpop.f32.mrb[13].mxu0  ;;  %v4221_v52 = vsub.f32 %v11291_v10, %v4220_v51 }
 0xf0c   :  { %v11885_v40 = vand.u32 4294901760, %v11295_v0 }
 0xf0d   :  { %v4222_v63 = vand.u32 4294901760, %v4221_v52  ;;  %v4270_v52 = vsub.f32 %v11329_v59, %v11880_v21 }
 0xf2a   :  { %v4037_v41 = vpop.f32.mrb[14].mxu0 }
 0xf2b   :  { %v4038_v16 = vadd.f32 %v4037_v41, %v3951_v19  ;;  %v7516_v18 = vpop.f32.mrb[15].mxu0  ;;  %v4227_v19 = vand.u32 4294901760, %v11293_v48  ;;  %v8835_v41 = vpack.c.bf16 %v4222_v63, %v4215_v4  ;;  %v4271_v63 = vand.u32 4294901760, %v4270_v52 }
 0xf2c   :  { %v4235_v18 = vsub.f32 %v11295_v0, %v11885_v40 }
 0xf2d   :  { %v4047_v42 = vadd.f32 %v4038_v16, %v10752_v43  ;;  %v4228_v16 = vsub.f32 %v11293_v48, %v4227_v19 }
 0xf2e   :  { %v4236_v56 = vand.u32 4294901760, %v4235_v18  ;;  %v8850_v18 = vpack.c.bf16 %v11243_v1, %v11241_v11  ;;  %v4746_v1 = vand.u32 4294901760, %v4720_v22 }
 0xf2f   :  { %v11342_v25 = vand.u32 4294901760, %v4047_v42 }
 0xf31   :  { %v11345_v32 = vsub.f32 %v4047_v42, %v11342_v25  ;;  %v4229_v42 = vand.u32 4294901760, %v4228_v16 }
 0xf33   :  { %v4160_v43 = vand.u32 4294901760, %v11345_v32  ;;  %v8838_v23 = vpack.c.bf16 %v4236_v56, %v4229_v42  ;;  %v8853_v42 = vpack.c.bf16 %v11247_v30, %v11245_v39  ;;  %v8856_v56 = vpack.c.bf16 %v11252_v13, %v11249_v62 }
 0xf34   :  { %v11900_v13 = vand.u32 4294901760, %v11295_v0 }
 0xf35   :  { %v4161_v28 = vsub.f32 %v11345_v32, %v4160_v43 }
 0xf37   :  { %v4162_v35 = vand.u32 4294901760, %v4161_v28  ;;  %v4242_v28 = vsub.f32 %v11297_v8, %v11884_v31 }
 0xf39   :  { %7550 = vmatmul.mubr.f32.vlgmr.msra.gmra.mrb[16].mxu0 %v4162_v35  ;;  %v4243_v47 = vand.u32 4294901760, %v4242_v28  ;;  %v11882_v35 = vand.u32 4294901760, %v11303_v14  ;;  %v8862_v28 = vpack.c.bf16 %v11295_v0, %v11293_v48  ;;  %v11903_v0 = vand.u32 4294901760, %v11303_v14 }
 0xf3a   :  { %8827 = vmatpush3.bf16.xpose.msra.mxu0 %v8826_v24  ;;  %7584 = vmatprep.mubr.msk.f32.mxu0 %vm9193_vm0, %v11892_v54  ;;  %v4249_v24 = vsub.f32 %v11300_v9, %v11883_v5 }
 0xf3b   :  { %8828 = vmatprep.subr.bf16.mxu0 %v9192_v2 }
 0xf3c   :  { %v4250_v50 = vand.u32 4294901760, %v4249_v24  ;;  %v8865_v24 = vpack.c.bf16 %v11300_v9, %v11297_v8 }
 0xf3e   :  { %v8841_v3 = vpack.c.bf16 %v4250_v50, %v4243_v47  ;;  %v8868_v47 = vpack.c.bf16 %v11305_v60, %v11303_v14  ;;  %v8871_v50 = vpack.c.bf16 %v11331_v20, %v11329_v59 }
 0xf42   :  { %8830 = vmatpush3.bf16.xpose.msra.mxu0 %v8829_v7  ;;  %v4256_v7 = vsub.f32 %v11303_v14, %v11882_v35 }
 0xf43   :  { %8831 = vmatprep.subr.bf16.mxu0 %v9192_v2 }
 0xf44   :  { %v4257_v44 = vand.u32 4294901760, %v4256_v7  ;;  %v4719_v7 = vld [vmem:[%s11857_s9] sm:$0xff] }
 0xf45   :  { %v4743_v11 = vand.u32 4294901760, %v4719_v7 }
 0xf46   :  { %v8844_v26 = vpack.c.bf16 %v4264_v58, %v4257_v44  ;;  %v4721_v44 = vld [vmem:[%s11857_s9 + $0x10] sm:$0xff] }
 0xf4a   :  { %8833 = vmatpush3.bf16.xpose.msra.mxu0 %v8832_v57  ;;  %v11879_v57 = vand.u32 4294901760, %v11331_v20 }
 0xf4b   :  { %8834 = vmatprep.subr.bf16.mxu0 %v9192_v2 }
 0xf4c   :  { %v4277_v4 = vsub.f32 %v11331_v20, %v11879_v57 }
 0xf52   :  { %8836 = vmatpush3.bf16.xpose.msra.mxu0 %v8835_v41  ;;  %v4278_v41 = vand.u32 4294901760, %v4277_v4  ;;  %v4725_v4 = vld [vmem:[%s11857_s9 + $0x30] sm:$0xff] }
 0xf53   :  { %8837 = vmatprep.subr.bf16.mxu0 %v9192_v2 }
 0xf54   :  { %v8847_v16 = vpack.c.bf16 %v4278_v41, %v4271_v63  ;;  %v4726_v63 = vld [vmem:[%s11857_s9 + $0x38] sm:$0xff]  ;;  %v4727_v41 = vld [vmem:[%s11857_s9 + $0x40] sm:$0xff] }
 0xf5a   :  { %8839 = vmatpush3.bf16.xpose.msra.mxu0 %v8838_v23  ;;  %v8859_v23 = vpack.c.bf16 %v11291_v10, %v11289_v61  ;;  %v11901_v10 = vand.u32 4294901760, %v11297_v8 }
 0xf5b   :  { %8840 = vmatprep.subr.bf16.mxu0 %v9192_v2 }
 0xf62   :  { %8842 = vmatpush3.bf16.xpose.msra.mxu0 %v8841_v3  ;;  %v8898_v3 = vpack.c.bf16 %v4178_v38, %v4171_v27  ;;  %v4722_v27 = vld [vmem:[%s11857_s9 + $0x18] sm:$0xff]  ;;  %v4749_v38 = vand.u32 4294901760, %v4721_v44 }
 0xf63   :  { %8843 = vmatprep.subr.bf16.mxu0 %v9192_v2  ;;  %v4752_v58 = vand.u32 4294901760, %v4722_v27 }
 0xf65   :  { %v11544_v35 = vpack.c.bf16 %v4752_v58, %v4749_v38 }
 0xf6a   :  { %8845 = vmatpush3.bf16.xpose.msra.mxu0 %v8844_v26 }
 0xf6b   :  { %8846 = vmatprep.subr.bf16.mxu0 %v9192_v2 }
 0xf72   :  { %8848 = vmatpush3.bf16.xpose.msra.mxu0 %v8847_v16  ;;  %v11499_v16 = vpack.c.bf16 %v4746_v1, %v4743_v11 }
 0xf73   :  { %8849 = vmatprep.subr.bf16.mxu0 %v9192_v2 }
 0xf74   :  { %8947 = vmatpush3.bf16.xpose.msra.mxu1 %v11499_v16 }
 0xf75   :  { %8948 = vmatprep.subr.bf16.mxu1 %v9192_v2 }
 0xf79   :  { %7585 = vmatmul.mubr.f32.vlgmr.msra.gmra.mrb[16].mxu0 %v11342_v25 }
 0xf7a   :  { %8851 = vmatpush3.bf16.xpose.msra.mxu0 %v8850_v18  ;;  %7619 = vmatprep.mubr.msk.f32.mxu0 %vm9193_vm0, %v11892_v54  ;;  %v11501_v18 = vsub.f32 %v4719_v7, %v4743_v11  ;;  %v4731_v7 = vld [vmem:[%s11857_s9 + $0x60] sm:$0xff]  ;;  %v4764_v11 = vand.u32 4294901760, %v4726_v63 }
 0xf7b   :  { %8852 = vmatprep.subr.bf16.mxu0 %v9192_v2 }
 0xf7c   :  { %8950 = vmatpush3.bf16.xpose.msra.mxu1 %v11544_v35 }
 0xf7d   :  { %8951 = vmatprep.subr.bf16.mxu1 %v9192_v2 }
 0xf82   :  { %8854 = vmatpush3.bf16.xpose.msra.mxu0 %v8853_v42  ;;  %v11503_v42 = vsub.f32 %v4720_v22, %v4746_v1  ;;  %v4767_v1 = vand.u32 4294901760, %v4727_v41 }
 0xf83   :  { %8855 = vmatprep.subr.bf16.mxu0 %v9192_v2 }
 0xf84   :  { %v11538_v57 = vsub.f32 %v4727_v41, %v4767_v1 }
 0xf8a   :  { %8857 = vmatpush3.bf16.xpose.msra.mxu0 %v8856_v56  ;;  %v11505_v56 = vsub.f32 %v4721_v44, %v4749_v38  ;;  %v4761_v44 = vand.u32 4294901760, %v4725_v4 }
 0xf8b   :  { %8858 = vmatprep.subr.bf16.mxu0 %v9192_v2 }
 0xf8c   :  { %v11568_v62 = vpack.c.bf16 %v4764_v11, %v4761_v44 }
 0xf92   :  { %8860 = vmatpush3.bf16.xpose.msra.mxu0 %v8859_v23  ;;  %v4728_v23 = vld [vmem:[%s11857_s9 + $0x48] sm:$0xff] }
 0xf93   :  { %8861 = vmatprep.subr.bf16.mxu0 %v9192_v2  ;;  %v4770_v39 = vand.u32 4294901760, %v4728_v23 }
 0xf95   :  { %v11540_v21 = vsub.f32 %v4728_v23, %v4770_v39  ;;  %v11577_v61 = vpack.c.bf16 %v4770_v39, %v4767_v1 }
 0xf9a   :  { %8863 = vmatpush3.bf16.xpose.msra.mxu0 %v8862_v28  ;;  %v4729_v28 = vld [vmem:[%s11857_s9 + $0x50] sm:$0xff] }
 0xf9b   :  { %8864 = vmatprep.subr.bf16.mxu0 %v9192_v2  ;;  %v4773_v30 = vand.u32 4294901760, %v4729_v28 }
 0xf9d   :  { %v11542_v46 = vsub.f32 %v4729_v28, %v4773_v30 }
 0xfa2   :  { %8866 = vmatpush3.bf16.xpose.msra.mxu0 %v8865_v24  ;;  %v4730_v24 = vld [vmem:[%s11857_s9 + $0x58] sm:$0xff] }
 0xfa3   :  { %8867 = vmatprep.subr.bf16.mxu0 %v9192_v2 }
 0xfaa   :  { %8869 = vmatpush3.bf16.xpose.msra.mxu0 %v8868_v47  ;;  %v8901_v47 = vpack.c.bf16 %v4192_v15, %v4185_v34  ;;  %v4776_v34 = vand.u32 4294901760, %v4730_v24  ;;  %v4732_v15 = vld [vmem:[%s11857_s9 + $0x68] sm:$0xff] }
 0xfab   :  { %8870 = vmatprep.subr.bf16.mxu0 %v9192_v2  ;;  %v4782_v31 = vand.u32 4294901760, %v4732_v15 }
 0xfac   :  { %v11546_v5 = vsub.f32 %v4730_v24, %v4776_v34  ;;  %v11586_v48 = vpack.c.bf16 %v4776_v34, %v4773_v30 }
 0xfb2   :  { %8872 = vmatpush3.bf16.xpose.msra.mxu0 %v8871_v50  ;;  %v11520_v50 = vsub.f32 %v4722_v27, %v4752_v58  ;;  %v11534_v27 = vsub.f32 %v4725_v4, %v4761_v44  ;;  %v11551_v4 = vsub.f32 %v4732_v15, %v4782_v31  ;;  %v8907_v58 = vpack.c.bf16 %v4220_v51, %v4213_v33 }
 0xfb3   :  { %8873 = vmatprep.subr.bf16.mxu0 %v9192_v2  ;;  %v11904_v51 = vand.u32 4294901760, %v11305_v60  ;;  %v4850_v44 = vand.u32 4294901760, %v11505_v56 }
 0xfb5   :  { %v4851_v34 = vsub.f32 %v11505_v56, %v4850_v44 }
 0xfb9   :  { %7620 = vmatmul.mubr.f32.vlgmr.msra.gmra.mrb[16].mxu0 %v11345_v32  ;;  %v4723_v32 = vld [vmem:[%s11857_s9 + $0x20] sm:$0xff] }
 0xfba   :  { %8875 = vmatpush3.bf16.xpose.msra.mxu0 %v11239_v37  ;;  %7654 = vmatprep.mubr.msk.f32.mxu0 %vm9193_vm0, %v11892_v54  ;;  %v4755_v26 = vand.u32 4294901760, %v4723_v32 }
 0xfbb   :  { %8876 = vmatprep.subr.bf16.mxu0 %v9192_v2 }
 0xfc2   :  { %8878 = vmatpush3.bf16.xpose.msra.mxu0 %v11255_v45 }
 0xfc3   :  { %8879 = vmatprep.subr.bf16.mxu0 %v9192_v2 }
 0xfca   :  { %8881 = vmatpush3.bf16.xpose.msra.mxu0 %v11259_v36 }
 0xfcb   :  { %8882 = vmatprep.subr.bf16.mxu0 %v9192_v2 }
 0xfd2   :  { %8884 = vmatpush3.bf16.xpose.msra.mxu0 %v11287_v29 }
 0xfd3   :  { %8885 = vmatprep.subr.bf16.mxu0 %v9192_v2 }
 0xfda   :  { %8887 = vmatpush3.bf16.xpose.msra.mxu0 %v11307_v6 }
 0xfdb   :  { %8888 = vmatprep.subr.bf16.mxu0 %v9192_v2 }
 0xfe2   :  { %8890 = vmatpush3.bf16.xpose.msra.mxu0 %v11311_v53 }
 0xfe3   :  { %8891 = vmatprep.subr.bf16.mxu0 %v9192_v2 }
 0xfea   :  { %8893 = vmatpush3.bf16.xpose.msra.mxu0 %v11315_v49 }
 0xfeb   :  { %8894 = vmatprep.subr.bf16.mxu0 %v9192_v2 }
 0xff2   :  { %8896 = vmatpush3.bf16.xpose.msra.mxu0 %v11325_v12 }
 0xff3   :  { %8897 = vmatprep.subr.bf16.mxu0 %v9192_v2 }
 0xff9   :  { %7655 = vmatmul.mubr.f32.vlgmr.msra.gmra.mrb[16].mxu0 %v4160_v43  ;;  %v4724_v43 = vld [vmem:[%s11857_s9 + $0x28] sm:$0xff] }
 0xffa   :  { %8899 = vmatpush3.bf16.xpose.msra.mxu0 %v8898_v3  ;;  %7689 = vmatprep.mubr.msk.f32.mxu0 %vm9193_vm0, %v11892_v54  ;;  %v4758_v52 = vand.u32 4294901760, %v4724_v43  ;;  %v11522_v3 = vsub.f32 %v4723_v32, %v4755_v26  ;;  %v11536_v32 = vsub.f32 %v4726_v63, %v4764_v11  ;;  %v8904_v63 = vpack.c.bf16 %v4206_v55, %v4199_v17 }
 0xffb   :  { %8900 = vmatprep.subr.bf16.mxu0 %v9192_v2  ;;  %v8910_v17 = vpack.c.bf16 %v11900_v13, %v4227_v19  ;;  %v11902_v55 = vand.u32 4294901760, %v11300_v9  ;;  %v8916_v19 = vpack.c.bf16 %v11904_v51, %v11903_v0  ;;  %v11905_v9 = vand.u32 4294901760, %v11329_v59 }
 0xffc   :  { %v11528_v22 = vsub.f32 %v4724_v43, %v4758_v52  ;;  %v4779_v43 = vand.u32 4294901760, %v4731_v7  ;;  %v11559_v38 = vpack.c.bf16 %v4758_v52, %v4755_v26  ;;  %v11906_v26 = vand.u32 4294901760, %v11331_v20 }
 0xffd   :  { %v8913_v33 = vpack.c.bf16 %v11902_v55, %v11901_v10  ;;  %v4843_v59 = vand.u32 4294901760, %v11503_v42  ;;  %v4857_v11 = vand.u32 4294901760, %v11520_v50  ;;  %v4864_v13 = vand.u32 4294901760, %v11522_v3 }
 0xffe   :  { %v11548_v40 = vsub.f32 %v4731_v7, %v4779_v43  ;;  %8953 = vmatpush3.bf16.xpose.msra.mxu1 %v11559_v38  ;;  %v11595_v8 = vpack.c.bf16 %v4782_v31, %v4779_v43  ;;  %v8919_v52 = vpack.c.bf16 %v11906_v26, %v11905_v9  ;;  %v4885_v9 = vand.u32 4294901760, %v11536_v32 }
 0xfff   :  { %8954 = vmatprep.subr.bf16.mxu1 %v9192_v2  ;;  %v4844_v23 = vsub.f32 %v11503_v42, %v4843_v59  ;;  %v4858_v15 = vsub.f32 %v11520_v50, %v4857_v11  ;;  %v4865_v55 = vsub.f32 %v11522_v3, %v4864_v13 }
0x1001   :  { %v4845_v7 = vand.u32 4294901760, %v4844_v23  ;;  %v4866_v0 = vand.u32 4294901760, %v4865_v55  ;;  %v4906_v23 = vand.u32 4294901760, %v11542_v46 }
0x1002   :  { %8902 = vmatpush3.bf16.xpose.msra.mxu0 %v8901_v47 }
0x1003   :  { %8903 = vmatprep.subr.bf16.mxu0 %v9192_v2 }
0x1006   :  { %8956 = vmatpush3.bf16.xpose.msra.mxu1 %v11568_v62 }
0x1007   :  { %8957 = vmatprep.subr.bf16.mxu1 %v9192_v2 }
0x100a   :  { %8905 = vmatpush3.bf16.xpose.msra.mxu0 %v8904_v63  ;;  %v4852_v63 = vand.u32 4294901760, %v4851_v34 }
0x100b   :  { %8906 = vmatprep.subr.bf16.mxu0 %v9192_v2 }
0x100e   :  { %8959 = vmatpush3.bf16.xpose.msra.mxu1 %v11577_v61 }
0x100f   :  { %8960 = vmatprep.subr.bf16.mxu1 %v9192_v2 }
0x1012   :  { %8908 = vmatpush3.bf16.xpose.msra.mxu0 %v8907_v58  ;;  %v4859_v58 = vand.u32 4294901760, %v4858_v15 }
0x1013   :  { %8909 = vmatprep.subr.bf16.mxu0 %v9192_v2 }
0x1014   :  { %v8973_v10 = vpack.c.bf16 %v4859_v58, %v4852_v63  ;;  %v4927_v63 = vand.u32 4294901760, %v11551_v4 }
0x1016   :  { %8962 = vmatpush3.bf16.xpose.msra.mxu1 %v11586_v48  ;;  %v4928_v55 = vsub.f32 %v11551_v4, %v4927_v63 }
0x1017   :  { %8963 = vmatprep.subr.bf16.mxu1 %v9192_v2 }
0x101a   :  { %8911 = vmatpush3.bf16.xpose.msra.mxu0 %v8910_v17  ;;  %v4871_v17 = vand.u32 4294901760, %v11528_v22 }
0x101b   :  { %8912 = vmatprep.subr.bf16.mxu0 %v9192_v2 }
0x101e   :  { %8965 = vmatpush3.bf16.xpose.msra.mxu1 %v11595_v8 }
0x101f   :  { %8966 = vmatprep.subr.bf16.mxu1 %v9192_v2 }
0x1022   :  { %8914 = vmatpush3.bf16.xpose.msra.mxu0 %v8913_v33  ;;  %v4872_v33 = vsub.f32 %v11528_v22, %v4871_v17 }
0x1023   :  { %8915 = vmatprep.subr.bf16.mxu0 %v9192_v2 }
0x1024   :  { %v4873_v51 = vand.u32 4294901760, %v4872_v33 }
0x1026   :  { %v8976_v26 = vpack.c.bf16 %v4873_v51, %v4866_v0  ;;  %v4929_v0 = vand.u32 4294901760, %v4928_v55 }
0x102a   :  { %8917 = vmatpush3.bf16.xpose.msra.mxu0 %v8916_v19  ;;  %v4878_v19 = vand.u32 4294901760, %v11534_v27 }
0x102b   :  { %8918 = vmatprep.subr.bf16.mxu0 %v9192_v2 }
0x1032   :  { %8920 = vmatpush3.bf16.xpose.msra.mxu0 %v8919_v52  ;;  %v4879_v52 = vsub.f32 %v11534_v27, %v4878_v19 }
0x1033   :  { %8921 = vmatprep.subr.bf16.mxu0 %v9192_v2 }
0x1039   :  { %7690 = vmatmul.mubr.f32.vlgmr.msra.gmra.mrb[16].mxu0 %v11342_v25 }
0x103a   :  { %8923 = vmatpush3.bf16.xpose.msra.mxu0 %v11239_v37  ;;  %7724 = vmatprep.mubr.msk.f32.mxu0 %vm9193_vm0, %v11892_v54  ;;  %v4733_v37 = vld [vmem:[%s11857_s9 + $0x70] sm:$0xff] }
0x103b   :  { %8924 = vmatprep.subr.bf16.mxu0 %v9192_v2 }
0x1042   :  { %8926 = vmatpush3.bf16.xpose.msra.mxu0 %v11255_v45  ;;  %v4734_v45 = vld [vmem:[%s11857_s9 + $0x78] sm:$0xff] }
0x1043   :  { %8927 = vmatprep.subr.bf16.mxu0 %v9192_v2 }
0x104a   :  { %8929 = vmatpush3.bf16.xpose.msra.mxu0 %v11259_v36  ;;  %v4785_v36 = vand.u32 4294901760, %v4733_v37 }
0x104b   :  { %8930 = vmatprep.subr.bf16.mxu0 %v9192_v2 }
0x104c   :  { %v11634_v60 = vsub.f32 %v4733_v37, %v4785_v36  ;;  %v4886_v37 = vsub.f32 %v11536_v32, %v4885_v9 }
0x104e   :  { %v4934_v51 = vand.u32 4294901760, %v11634_v60 }
0x1052   :  { %8932 = vmatpush3.bf16.xpose.msra.mxu0 %v11287_v29  ;;  %v4788_v29 = vand.u32 4294901760, %v4734_v45 }
0x1053   :  { %8933 = vmatprep.subr.bf16.mxu0 %v9192_v2 }
0x1054   :  { %v11630_v14 = vpack.c.bf16 %v4788_v29, %v4785_v36  ;;  %v4887_v36 = vand.u32 4294901760, %v4886_v37  ;;  %v4935_v37 = vsub.f32 %v11634_v60, %v4934_v51 }
0x1056   :  { %8968 = vmatpush3.bf16.xpose.msra.mxu1 %v11630_v14 }
0x1057   :  { %8969 = vmatprep.subr.bf16.mxu1 %v9192_v2 }
0x105a   :  { %8935 = vmatpush3.bf16.xpose.msra.mxu0 %v11307_v6  ;;  %v11636_v6 = vsub.f32 %v4734_v45, %v4788_v29  ;;  %v4880_v45 = vand.u32 4294901760, %v4879_v52  ;;  %v4892_v29 = vand.u32 4294901760, %v11538_v57 }
0x105b   :  { %8936 = vmatprep.subr.bf16.mxu0 %v9192_v2 }
0x1062   :  { %8938 = vmatpush3.bf16.xpose.msra.mxu0 %v11311_v53  ;;  %v5439_v53 = vld [vmem:[%s11856_s8] ss:$0 sm:$0xff] }
0x1063   :  { %8939 = vmatprep.subr.bf16.mxu0 %v9192_v2 }
0x106a   :  { %8941 = vmatpush3.bf16.xpose.msra.mxu0 %v11315_v49 }
0x106b   :  { %8942 = vmatprep.subr.bf16.mxu0 %v9192_v2 }
0x1072   :  { %8944 = vmatpush3.bf16.xpose.msra.mxu0 %v11325_v12  ;;  %v4836_v12 = vand.u32 4294901760, %v11501_v18 }
0x1074   :  { %v4837_v41 = vsub.f32 %v11501_v18, %v4836_v12 }
0x1076   :  { %v4838_v47 = vand.u32 4294901760, %v4837_v41 }
0x1078   :  { %v8970_v30 = vpack.c.bf16 %v4845_v7, %v4838_v47  ;;  %v4913_v47 = vand.u32 4294901760, %v11546_v5 }
0x1079   :  { %7725 = vmatmul.mubr.f32.vlgmr.msra.gmra.mrb[16].mxu0 %v11342_v25 }
0x114c   :  { %v4714_v49 = vpop.f32.mrb[16].mxu0 }
0x114d   :  { %v9091_v20 = vadd.f32 %v5439_v53, %v4714_v49  ;;  %v7726_v25 = vpop.f32.mrb[17].mxu0  ;;  %v4899_v53 = vand.u32 4294901760, %v11540_v21  ;;  %v8979_v49 = vpack.c.bf16 %v4887_v36, %v4880_v45  ;;  %v4936_v36 = vand.u32 4294901760, %v4935_v37 }
0x114f   :  { %v4718_v31 = vmax.f32 %v9091_v20, 0.0  ;;  %v4893_v20 = vsub.f32 %v11538_v57, %v4892_v29  ;;  %v4900_v25 = vsub.f32 %v11540_v21, %v4899_v53 }
0x1151   :  { %v11649_v28 = vand.u32 4294901760, %v4718_v31  ;;  %v4901_v41 = vand.u32 4294901760, %v4900_v25  ;;  %v8994_v25 = vpack.c.bf16 %v11503_v42, %v11501_v18  ;;  %v9048_v18 = vpack.c.bf16 %v4871_v17, %v4864_v13 }
0x1152   :  { %v9051_v42 = vpack.c.bf16 %v4885_v9, %v4878_v19 }
0x1153   :  { %v11652_v24 = vsub.f32 %v4718_v31, %v11649_v28  ;;  %v4894_v31 = vand.u32 4294901760, %v4893_v20 }
0x1155   :  { %v4825_v1 = vand.u32 4294901760, %v11652_v24  ;;  %v8982_v7 = vpack.c.bf16 %v4901_v41, %v4894_v31  ;;  %v8997_v31 = vpack.c.bf16 %v11520_v50, %v11505_v56  ;;  %v9000_v41 = vpack.c.bf16 %v11528_v22, %v11522_v3 }
0x1156   :  { %v9054_v56 = vpack.c.bf16 %v4899_v53, %v4892_v29  ;;  %v9057_v50 = vpack.c.bf16 %v4913_v47, %v4906_v23 }
0x1157   :  { %v4826_v39 = vsub.f32 %v11652_v24, %v4825_v1 }
0x1159   :  { %v4827_v43 = vand.u32 4294901760, %v4826_v39  ;;  %v4907_v39 = vsub.f32 %v11542_v46, %v4906_v23 }
0x115b   :  { %7760 = vmatmul.mubr.f32.vlgmr.msra.gmra.mrb[6].mxu1 %v4827_v43  ;;  %v4908_v34 = vand.u32 4294901760, %v4907_v39  ;;  %v4920_v43 = vand.u32 4294901760, %v11548_v40  ;;  %v9006_v39 = vpack.c.bf16 %v11540_v21, %v11538_v57 }
0x115c   :  { %8971 = vmatpush3.bf16.xpose.msra.mxu1 %v8970_v30  ;;  %7794 = vmatprep.mubr.msk.f32.mxu1 %vm9193_vm0, %v11892_v54  ;;  %v4914_v30 = vsub.f32 %v11546_v5, %v4913_v47 }
0x115d   :  { %8972 = vmatprep.subr.bf16.mxu1 %v9192_v2  ;;  %v9060_v3 = vpack.c.bf16 %v4927_v63, %v4920_v43 }
0x115e   :  { %v4915_v15 = vand.u32 4294901760, %v4914_v30  ;;  %v9009_v30 = vpack.c.bf16 %v11546_v5, %v11542_v46 }
0x1160   :  { %v8985_v58 = vpack.c.bf16 %v4915_v15, %v4908_v34  ;;  %v9012_v34 = vpack.c.bf16 %v11551_v4, %v11548_v40  ;;  %v9015_v15 = vpack.c.bf16 %v11636_v6, %v11634_v60 }
0x1164   :  { %8974 = vmatpush3.bf16.xpose.msra.mxu1 %v8973_v10  ;;  %v4921_v10 = vsub.f32 %v11548_v40, %v4920_v43 }
0x1165   :  { %8975 = vmatprep.subr.bf16.mxu1 %v9192_v2 }
0x1166   :  { %v4922_v33 = vand.u32 4294901760, %v4921_v10  ;;  %v9045_v10 = vpack.c.bf16 %v4857_v11, %v4850_v44 }
0x1168   :  { %v8988_v52 = vpack.c.bf16 %v4929_v0, %v4922_v33 }
0x116c   :  { %8977 = vmatpush3.bf16.xpose.msra.mxu1 %v8976_v26  ;;  %v4941_v26 = vand.u32 4294901760, %v11636_v6 }
0x116d   :  { %8978 = vmatprep.subr.bf16.mxu1 %v9192_v2 }
0x116e   :  { %v4942_v45 = vsub.f32 %v11636_v6, %v4941_v26  ;;  %v9063_v21 = vpack.c.bf16 %v4941_v26, %v4934_v51 }
0x1174   :  { %8980 = vmatpush3.bf16.xpose.msra.mxu1 %v8979_v49  ;;  %v4943_v49 = vand.u32 4294901760, %v4942_v45 }
0x1175   :  { %8981 = vmatprep.subr.bf16.mxu1 %v9192_v2 }
0x1176   :  { %v8991_v20 = vpack.c.bf16 %v4943_v49, %v4936_v36 }
0x117c   :  { %8983 = vmatpush3.bf16.xpose.msra.mxu1 %v8982_v7  ;;  %v9003_v7 = vpack.c.bf16 %v11536_v32, %v11534_v27 }
0x117d   :  { %8984 = vmatprep.subr.bf16.mxu1 %v9192_v2 }
0x1184   :  { %8986 = vmatpush3.bf16.xpose.msra.mxu1 %v8985_v58  ;;  %v9042_v58 = vpack.c.bf16 %v4843_v59, %v4836_v12 }
0x1185   :  { %8987 = vmatprep.subr.bf16.mxu1 %v9192_v2 }
0x118c   :  { %8989 = vmatpush3.bf16.xpose.msra.mxu1 %v8988_v52 }
0x118d   :  { %8990 = vmatprep.subr.bf16.mxu1 %v9192_v2 }
0x1194   :  { %8992 = vmatpush3.bf16.xpose.msra.mxu1 %v8991_v20 }
0x1195   :  { %8993 = vmatprep.subr.bf16.mxu1 %v9192_v2 }
0x119b   :  { %7795 = vmatmul.mubr.f32.vlgmr.msra.gmra.mrb[6].mxu1 %v11649_v28 }
0x119c   :  { %8995 = vmatpush3.bf16.xpose.msra.mxu1 %v8994_v25  ;;  %7829 = vmatprep.mubr.msk.f32.mxu1 %vm9193_vm0, %v11892_v54 }
0x119d   :  { %8996 = vmatprep.subr.bf16.mxu1 %v9192_v2 }
0x11a4   :  { %8998 = vmatpush3.bf16.xpose.msra.mxu1 %v8997_v31 }
0x11a5   :  { %8999 = vmatprep.subr.bf16.mxu1 %v9192_v2 }
0x11ac   :  { %9001 = vmatpush3.bf16.xpose.msra.mxu1 %v9000_v41 }
0x11ad   :  { %9002 = vmatprep.subr.bf16.mxu1 %v9192_v2 }
0x11b4   :  { %9004 = vmatpush3.bf16.xpose.msra.mxu1 %v9003_v7 }
0x11b5   :  { %9005 = vmatprep.subr.bf16.mxu1 %v9192_v2 }
0x11bc   :  { %9007 = vmatpush3.bf16.xpose.msra.mxu1 %v9006_v39 }
0x11bd   :  { %9008 = vmatprep.subr.bf16.mxu1 %v9192_v2 }
0x11c4   :  { %9010 = vmatpush3.bf16.xpose.msra.mxu1 %v9009_v30 }
0x11c5   :  { %9011 = vmatprep.subr.bf16.mxu1 %v9192_v2 }
0x11cc   :  { %9013 = vmatpush3.bf16.xpose.msra.mxu1 %v9012_v34 }
0x11cd   :  { %9014 = vmatprep.subr.bf16.mxu1 %v9192_v2 }
0x11d4   :  { %9016 = vmatpush3.bf16.xpose.msra.mxu1 %v9015_v15 }
0x11d5   :  { %9017 = vmatprep.subr.bf16.mxu1 %v9192_v2 }
0x11db   :  { %7830 = vmatmul.mubr.f32.vlgmr.msra.gmra.mrb[6].mxu1 %v11652_v24 }
0x11dc   :  { %9019 = vmatpush3.bf16.xpose.msra.mxu1 %v11499_v16  ;;  %7864 = vmatprep.mubr.msk.f32.mxu1 %vm9193_vm0, %v11892_v54 }
0x11dd   :  { %9020 = vmatprep.subr.bf16.mxu1 %v9192_v2 }
0x11e4   :  { %9022 = vmatpush3.bf16.xpose.msra.mxu1 %v11544_v35 }
0x11e5   :  { %9023 = vmatprep.subr.bf16.mxu1 %v9192_v2 }
0x11ec   :  { %9025 = vmatpush3.bf16.xpose.msra.mxu1 %v11559_v38 }
0x11ed   :  { %9026 = vmatprep.subr.bf16.mxu1 %v9192_v2 }
0x11f4   :  { %9028 = vmatpush3.bf16.xpose.msra.mxu1 %v11568_v62 }
0x11f5   :  { %9029 = vmatprep.subr.bf16.mxu1 %v9192_v2 }
0x11fc   :  { %9031 = vmatpush3.bf16.xpose.msra.mxu1 %v11577_v61 }
0x11fd   :  { %9032 = vmatprep.subr.bf16.mxu1 %v9192_v2 }
0x1204   :  { %9034 = vmatpush3.bf16.xpose.msra.mxu1 %v11586_v48 }
0x1205   :  { %9035 = vmatprep.subr.bf16.mxu1 %v9192_v2 }
0x120c   :  { %9037 = vmatpush3.bf16.xpose.msra.mxu1 %v11595_v8 }
0x120d   :  { %9038 = vmatprep.subr.bf16.mxu1 %v9192_v2 }
0x1214   :  { %9040 = vmatpush3.bf16.xpose.msra.mxu1 %v11630_v14 }
0x1215   :  { %9041 = vmatprep.subr.bf16.mxu1 %v9192_v2 }
0x121b   :  { %7865 = vmatmul.mubr.f32.vlgmr.msra.gmra.mrb[6].mxu1 %v4825_v1 }
0x121c   :  { %9043 = vmatpush3.bf16.xpose.msra.mxu1 %v9042_v58  ;;  %7899 = vmatprep.mubr.msk.f32.mxu1 %vm9193_vm0, %v11892_v54 }
0x121d   :  { %9044 = vmatprep.subr.bf16.mxu1 %v9192_v2 }
0x1224   :  { %9046 = vmatpush3.bf16.xpose.msra.mxu1 %v9045_v10 }
0x1225   :  { %9047 = vmatprep.subr.bf16.mxu1 %v9192_v2 }
0x122c   :  { %9049 = vmatpush3.bf16.xpose.msra.mxu1 %v9048_v18 }
0x122d   :  { %9050 = vmatprep.subr.bf16.mxu1 %v9192_v2 }
0x1234   :  { %9052 = vmatpush3.bf16.xpose.msra.mxu1 %v9051_v42 }
0x1235   :  { %9053 = vmatprep.subr.bf16.mxu1 %v9192_v2 }
0x123c   :  { %9055 = vmatpush3.bf16.xpose.msra.mxu1 %v9054_v56 }
0x123d   :  { %9056 = vmatprep.subr.bf16.mxu1 %v9192_v2 }
0x1244   :  { %9058 = vmatpush3.bf16.xpose.msra.mxu1 %v9057_v50 }
0x1245   :  { %9059 = vmatprep.subr.bf16.mxu1 %v9192_v2 }
0x124c   :  { %9061 = vmatpush3.bf16.xpose.msra.mxu1 %v9060_v3 }
0x124d   :  { %9062 = vmatprep.subr.bf16.mxu1 %v9192_v2 }
0x1254   :  { %9064 = vmatpush3.bf16.xpose.msra.mxu1 %v9063_v21 }
0x1255   :  { %9065 = vmatprep.subr.bf16.mxu1 %v9192_v2 }
0x125b   :  { %7900 = vmatmul.mubr.f32.vlgmr.msra.gmra.mrb[6].mxu1 %v11649_v28 }
0x125c   :  { %9067 = vmatpush3.bf16.xpose.msra.mxu1 %v11499_v16  ;;  %7934 = vmatprep.mubr.msk.f32.mxu1 %vm9193_vm0, %v11892_v54  ;;  %v5440_v54 = vld [vmem:[%s11858_s10] ss:$0 sm:$0xff] }
0x125d   :  { %9068 = vmatprep.subr.bf16.mxu1 %v9192_v2 }
0x1264   :  { %9070 = vmatpush3.bf16.xpose.msra.mxu1 %v11544_v35 }
0x1265   :  { %9071 = vmatprep.subr.bf16.mxu1 %v9192_v2 }
0x126c   :  { %9073 = vmatpush3.bf16.xpose.msra.mxu1 %v11559_v38 }
0x126d   :  { %9074 = vmatprep.subr.bf16.mxu1 %v9192_v2 }
0x1274   :  { %9076 = vmatpush3.bf16.xpose.msra.mxu1 %v11568_v62 }
0x1275   :  { %9077 = vmatprep.subr.bf16.mxu1 %v9192_v2 }
0x127c   :  { %9079 = vmatpush3.bf16.xpose.msra.mxu1 %v11577_v61 }
0x127d   :  { %9080 = vmatprep.subr.bf16.mxu1 %v9192_v2 }
0x1284   :  { %9082 = vmatpush3.bf16.xpose.msra.mxu1 %v11586_v48 }
0x1285   :  { %9083 = vmatprep.subr.bf16.mxu1 %v9192_v2 }
0x128c   :  { %9085 = vmatpush3.bf16.xpose.msra.mxu1 %v11595_v8 }
0x128d   :  { %9086 = vmatprep.subr.bf16.mxu1 %v9192_v2 }
0x1294   :  { %9088 = vmatpush3.bf16.xpose.msra.mxu1 %v11630_v14 }
0x129b   :  { %7935 = vmatmul.mubr.f32.vlgmr.msra.gmra.mrb[6].mxu1 %v11649_v28 }
0x136e   :  { %v5379_v40 = vpop.f32.mrb[6].mxu1 }
0x136f   :  { %v9092_v5 = vadd.f32 %v5440_v54, %v5379_v40  ;;  %v7936_v35 = vpop.f32.mrb[7].mxu1 }
0x1371   :  { %5383 = vst [vmem:[#allocation2] sm:$0xff] %v9092_v5 }
0x1372   :  { %9179 = shalt.err (!%p9176_p4)
}
0x1373   :  { %s9180_s15 = scalar_lea.hbm %s11859_s11, 128 }
0x1374   :  { %p9181_p5 = scmp.ne.s32.totalorder %s11859_s11, %s9180_s15  ;;  %p9184_p6 = scmp.lt.u32.totalorder %s9180_s15, %s11859_s11 }
0x1376   :  { %p9186_p7 = pnand %p9184_p6, %p9181_p5 }
0x1378   :  { %9189 = shalt.err (!%p9186_p7)
}
0x1379   :  { %5393 = dma.vmem_to_hbm [thread:$0]  %s5391_s30, 128, %s11859_s11, [#allocation3]  }
0x137a   :  { %9190 = dma.done.wait [#allocation3], 128  }
0x137b   :  { %9191 = vsyncadd [#allocation3], 4294967168 }
0x137c   :  { %5409 = vsyncpa [#allocation3], 1 }

</bundles_post_ra>
